<compile_context>
chip_gen: v5e
topology: v5e:2x2
jax: 0.10.0
libtpu: 0.0.40
codegen_flags: <defaults>
</compile_context>

<pallas_src>
import jax
import jax.numpy as jnp
from jax.experimental import pallas as pl
from jax.experimental.pallas import tpu as pltpu


HEAD_P = 128  # lane-dense slab width holding [mean(2) | logvar(2) | zeros]


def _leaky_relu(x, slope=0.2):
    return jnp.where(x > 0, x, slope * x)


def _round_up(n, m=128):
    return ((n + m - 1) // m) * m


# --------------------------------------------------------------------------
# Kernel
# --------------------------------------------------------------------------
def vae_kernel(
    x_ref, eps_ref,
    w1_ref, b1_ref, w2_ref, b2_ref,
    whead_ref, bhead_ref,
    wd1_ref, bd1_ref, wd2_ref, bd2_ref, wd3_ref, bd3_ref,
    xhat_ref, head_ref,
):
    x = x_ref[...]                                           # (TB, IN_P)

    # ---------------- encoder ----------------
    h = jnp.dot(x, w1_ref[...], preferred_element_type=jnp.float32) + b1_ref[...]
    h = _leaky_relu(h)
    h = jnp.dot(h, w2_ref[...], preferred_element_type=jnp.float32) + b2_ref[...]
    h = _leaky_relu(h)                                       # (TB, LAT_P)

    # Fused mean/logvar heads: one lane-dense (LAT_P, 128) matmul.
    # cols 0:2 = mean, cols 2:4 = logvar, cols 4:128 = exact zeros.
    head = jnp.dot(h, whead_ref[...], preferred_element_type=jnp.float32) + bhead_ref[...]

    # ------------- reparameterization (z = mean + logvar * eps, as in reference) -------------
    eps = eps_ref[...]                                       # (TB, 128), cols 0:2 used
    z0 = head[:, 0:1] + head[:, 2:3] * eps[:, 0:1]           # (TB, 1)
    z1 = head[:, 1:2] + head[:, 3:4] * eps[:, 1:2]           # (TB, 1)

    # ---------------- decoder ----------------
    # K=2 layer on the VPU (broadcast-multiply-add) instead of an empty MXU pass.
    d = z0 * wd1_ref[0:1, :] + z1 * wd1_ref[1:2, :] + bd1_ref[...]   # (TB, LAT_P)
    d = _leaky_relu(d)
    d = jnp.dot(d, wd2_ref[...], preferred_element_type=jnp.float32) + bd2_ref[...]
    d = _leaky_relu(d)
    d = jnp.dot(d, wd3_ref[...], preferred_element_type=jnp.float32) + bd3_ref[...]
    x_hat = jax.nn.sigmoid(d)                                # (TB, IN_P)

    xhat_ref[...] = x_hat.astype(xhat_ref.dtype)
    head_ref[...] = head.astype(head_ref.dtype)


# --------------------------------------------------------------------------
# Wrapper: padding, tiling, pallas_call
# --------------------------------------------------------------------------
def _pad2(a, rows, cols):
    r, c = a.shape
    return jnp.pad(a, ((0, rows - r), (0, cols - c)))


def pad_params(p, input_dim, hidden_dim, latent_dim, dtype=jnp.float32):
    """Zero-pad weights to 128-multiples and fuse mean/logvar heads."""
    IN_P, HID_P, LAT_P = _round_up(input_dim), _round_up(hidden_dim), _round_up(latent_dim)

    whead = jnp.pad(jnp.concatenate([p["wm"], p["wv"]], axis=1),
                    ((0, LAT_P - latent_dim), (0, HEAD_P - 4)))
    bhead = jnp.pad(jnp.concatenate([p["bm"], p["bv"]], axis=1),
                    ((0, 0), (0, HEAD_P - 4)))

    pp = dict(
        w1=_pad2(p["w1"], IN_P, HID_P),  b1=_pad2(p["b1"], 1, HID_P),
        w2=_pad2(p["w2"], HID_P, LAT_P), b2=_pad2(p["b2"], 1, LAT_P),
        whead=whead,                      bhead=bhead,
        wd1=_pad2(p["wd1"], 2, LAT_P),    bd1=_pad2(p["bd1"], 1, LAT_P),
        wd2=_pad2(p["wd2"], LAT_P, HID_P), bd2=_pad2(p["bd2"], 1, HID_P),
        wd3=_pad2(p["wd3"], HID_P, IN_P),  bd3=_pad2(p["bd3"], 1, IN_P),
    )
    return {k: v.astype(dtype) for k, v in pp.items()}, (IN_P, HID_P, LAT_P)


def _pick_tile_b(B):
    # Small batch: one grid step (no pipeline overhead at all).
    if B <= 256:
        return B
    # Large batch: fill the MXU rows and keep >=2 grid steps for v7x megacore.
    for t in (256, 128, 64, 32, 16, 8):
        if B % t == 0:
            return t
    return B


def vae_forward(x, eps, params, *, tile_b=None, use_bf16=False):
    """Runs the VAE forward pass in a single Pallas kernel tiled over batch.

    Returns (x_hat, mean, logvar) with the original (unpadded) feature dims.
    """
    B, input_dim = x.shape
    hidden_dim = params["w1"].shape[1]
    latent_dim = params["w2"].shape[1]

    compute_dtype = jnp.bfloat16 if use_bf16 else jnp.float32
    pp, (IN_P, HID_P, LAT_P) = pad_params(params, input_dim, hidden_dim, latent_dim,
                                          dtype=compute_dtype)

    # Pad activations to lane-dense widths.
    x_p = _pad2(x, B, IN_P).astype(compute_dtype)
    eps_p = _pad2(eps, B, HEAD_P).astype(compute_dtype)

    if tile_b is None:
        tile_b = _pick_tile_b(B)
    assert B % tile_b == 0, "batch must be divisible by tile_b"
    grid = (B // tile_b,)

    def full_spec(shape):
        # Whole (small) weight / bias resident in VMEM for every grid step.
        return pl.BlockSpec(shape, lambda i: tuple(0 for _ in shape))

    in_specs = [
        pl.BlockSpec((tile_b, IN_P), lambda i: (i, 0)),     # x (padded)
        pl.BlockSpec((tile_b, HEAD_P), lambda i: (i, 0)),   # eps (padded, lane-dense)
        full_spec(pp["w1"].shape),  full_spec(pp["b1"].shape),
        full_spec(pp["w2"].shape),  full_spec(pp["b2"].shape),
        full_spec(pp["whead"].shape), full_spec(pp["bhead"].shape),
        full_spec(pp["wd1"].shape), full_spec(pp["bd1"].shape),
        full_spec(pp["wd2"].shape), full_spec(pp["bd2"].shape),
        full_spec(pp["wd3"].shape), full_spec(pp["bd3"].shape),
    ]
    out_specs = [
        pl.BlockSpec((tile_b, IN_P), lambda i: (i, 0)),     # x_hat (padded)
        pl.BlockSpec((tile_b, HEAD_P), lambda i: (i, 0)),   # [mean|logvar|0...] slab
    ]
    out_shape = [
        jax.ShapeDtypeStruct((B, IN_P), jnp.float32),
        jax.ShapeDtypeStruct((B, HEAD_P), jnp.float32),
    ]

    grid_spec = pltpu.PrefetchScalarGridSpec(
        num_scalar_prefetch=0,
        grid=grid,
        in_specs=in_specs,
        out_specs=out_specs,
    )

    f = pl.pallas_call(
        vae_kernel,
        grid_spec=grid_spec,
        out_shape=out_shape,
        compiler_params=pltpu.CompilerParams(
            dimension_semantics=("parallel",),
        ),
    )
    xhat_p, head = f(
        x_p, eps_p,
        pp["w1"], pp["b1"], pp["w2"], pp["b2"],
        pp["whead"], pp["bhead"],
        pp["wd1"], pp["bd1"], pp["wd2"], pp["bd2"], pp["wd3"], pp["bd3"],
    )

    # Slice off padding (sigmoid(0)=0.5 lives in padded x_hat columns).
    x_hat = xhat_p[:, :input_dim]
    mean = head[:, 0:2]
    logvar = head[:, 2:4]
    return x_hat, mean, logvar


# --------------------------------------------------------------------------
# Params & pure-JAX reference
# --------------------------------------------------------------------------
def init_params(key, input_dim=784, hidden_dim=400, latent_dim=200):
    """PyTorch-style uniform(-1/sqrt(fan_in), 1/sqrt(fan_in)) init.

    Weights are stored transposed: shape = (in_features, out_features).
    Biases are stored as (1, out_features).
    """
    def linear(key, fan_in, fan_out):
        kw, kb = jax.random.split(key)
        bound = 1.0 / jnp.sqrt(fan_in)
        w = jax.random.uniform(kw, (fan_in, fan_out), jnp.float32, -bound, bound)
        b = jax.random.uniform(kb, (1, fan_out), jnp.float32, -bound, bound)
        return w, b

    keys = jax.random.split(key, 7)
    w1, b1 = linear(keys[0], input_dim, hidden_dim)
    w2, b2 = linear(keys[1], hidden_dim, latent_dim)
    wm, bm = linear(keys[2], latent_dim, 2)
    wv, bv = linear(keys[3], latent_dim, 2)
    wd1, bd1 = linear(keys[4], 2, latent_dim)
    wd2, bd2 = linear(keys[5], latent_dim, hidden_dim)
    wd3, bd3 = linear(keys[6], hidden_dim, input_dim)
    return dict(w1=w1, b1=b1, w2=w2, b2=b2, wm=wm, bm=bm, wv=wv, bv=bv,
                wd1=wd1, bd1=bd1, wd2=wd2, bd2=bd2, wd3=wd3, bd3=bd3)


def vae_forward_ref(x, eps, p):
    """Pure-JAX reference for correctness checking (unpadded params)."""
    h = _leaky_relu(x @ p["w1"] + p["b1"])
    h = _leaky_relu(h @ p["w2"] + p["b2"])
    mean = h @ p["wm"] + p["bm"]
    logvar = h @ p["wv"] + p["bv"]
    z = mean + logvar * eps
    d = _leaky_relu(z @ p["wd1"] + p["bd1"])
    d = _leaky_relu(d @ p["wd2"] + p["bd2"])
    x_hat = jax.nn.sigmoid(d @ p["wd3"] + p["bd3"])
    return x_hat, mean, logvar


if __name__ == "__main__":
    INPUT_DIM, HIDDEN_DIM, LATENT_DIM = 784, 400, 200
    BATCH = 16

    root = jax.random.PRNGKey(0)
    k_params, k_x, k_eps = jax.random.split(root, 3)

    params = init_params(k_params, INPUT_DIM, HIDDEN_DIM, LATENT_DIM)
    x = jax.random.uniform(k_x, (BATCH, INPUT_DIM), jnp.float32)   # flattened MNIST-like input
    eps = jax.random.normal(k_eps, (BATCH, 2), jnp.float32)        # epsilon for reparameterization

    x_hat, mean, logvar = vae_forward(x, eps, params)              # tile_b = BATCH (single grid step)
    jax.block_until_ready((x_hat, mean, logvar))

    # correctness check against pure-JAX reference
    x_hat_r, mean_r, logvar_r = vae_forward_ref(x, eps, params)
    assert jnp.allclose(x_hat, x_hat_r, atol=1e-4, rtol=1e-4), "x_hat mismatch"
    assert jnp.allclose(mean, mean_r, atol=1e-4, rtol=1e-4), "mean mismatch"
    assert jnp.allclose(logvar, logvar_r, atol=1e-4, rtol=1e-4), "logvar mismatch"

    print("KERNEL_OK")
</pallas_src>

<mosaic_0001>
module attributes {stable_mosaic.version = 11 : i64} {
  func.func @vae_kernel(%arg0: i32, %arg1: memref<16x896xf32, #tpu.memory_space<vmem>>, %arg2: memref<16x128xf32, #tpu.memory_space<vmem>>, %arg3: memref<896x512xf32, #tpu.memory_space<vmem>>, %arg4: memref<1x512xf32, #tpu.memory_space<vmem>>, %arg5: memref<512x256xf32, #tpu.memory_space<vmem>>, %arg6: memref<1x256xf32, #tpu.memory_space<vmem>>, %arg7: memref<256x128xf32, #tpu.memory_space<vmem>>, %arg8: memref<1x128xf32, #tpu.memory_space<vmem>>, %arg9: memref<2x256xf32, #tpu.memory_space<vmem>>, %arg10: memref<1x256xf32, #tpu.memory_space<vmem>>, %arg11: memref<256x512xf32, #tpu.memory_space<vmem>>, %arg12: memref<1x512xf32, #tpu.memory_space<vmem>>, %arg13: memref<512x896xf32, #tpu.memory_space<vmem>>, %arg14: memref<1x896xf32, #tpu.memory_space<vmem>>, %arg15: memref<16x896xf32, #tpu.memory_space<vmem>>, %arg16: memref<16x128xf32, #tpu.memory_space<vmem>>) attributes {dimension_semantics = [#tpu.dimension_semantics<parallel>], iteration_bounds = array<i64: 1>, scalar_prefetch = 0 : i64, scratch_operands = 0 : i64, tpu.core_type = #tpu.core_type<tc>, window_params = [{transform_indices = @transform_0, window_bounds = array<i64: 16, 896>}, {transform_indices = @transform_1, window_bounds = array<i64: 16, 128>}, {pipeline_mode = #tpu.pipeline_mode<synchronous>, transform_indices = @transform_2, window_bounds = array<i64: 896, 512>}, {pipeline_mode = #tpu.pipeline_mode<synchronous>, transform_indices = @transform_3, window_bounds = array<i64: 1, 512>}, {pipeline_mode = #tpu.pipeline_mode<synchronous>, transform_indices = @transform_4, window_bounds = array<i64: 512, 256>}, {pipeline_mode = #tpu.pipeline_mode<synchronous>, transform_indices = @transform_5, window_bounds = array<i64: 1, 256>}, {pipeline_mode = #tpu.pipeline_mode<synchronous>, transform_indices = @transform_6, window_bounds = array<i64: 256, 128>}, {pipeline_mode = #tpu.pipeline_mode<synchronous>, transform_indices = @transform_7, window_bounds = array<i64: 1, 128>}, {pipeline_mode = #tpu.pipeline_mode<synchronous>, transform_indices = @transform_8, window_bounds = array<i64: 2, 256>}, {pipeline_mode = #tpu.pipeline_mode<synchronous>, transform_indices = @transform_9, window_bounds = array<i64: 1, 256>}, {pipeline_mode = #tpu.pipeline_mode<synchronous>, transform_indices = @transform_10, window_bounds = array<i64: 256, 512>}, {pipeline_mode = #tpu.pipeline_mode<synchronous>, transform_indices = @transform_11, window_bounds = array<i64: 1, 512>}, {pipeline_mode = #tpu.pipeline_mode<synchronous>, transform_indices = @transform_12, window_bounds = array<i64: 512, 896>}, {pipeline_mode = #tpu.pipeline_mode<synchronous>, transform_indices = @transform_13, window_bounds = array<i64: 1, 896>}, {transform_indices = @transform_14, window_bounds = array<i64: 16, 896>}, {transform_indices = @transform_15, window_bounds = array<i64: 16, 128>}]} {
    %c0 = arith.constant 0 : index
    %c0_0 = arith.constant 0 : index
    %0 = vector.load %arg1[%c0, %c0_0] : memref<16x896xf32, #tpu.memory_space<vmem>>, vector<16x896xf32>
    %c0_1 = arith.constant 0 : index
    %c0_2 = arith.constant 0 : index
    %1 = vector.load %arg3[%c0_1, %c0_2] : memref<896x512xf32, #tpu.memory_space<vmem>>, vector<896x512xf32>
    %cst = arith.constant dense<0.000000e+00> : vector<16x512xf32>
    %2 = tpu.matmul %0, %1, %cst {dimension_numbers = #tpu.dot_dimension_numbers<[1], [0], [0], [1], [0, 0, 1, 1], [], []>} : vector<16x896xf32>, vector<896x512xf32>, vector<16x512xf32> -> vector<16x512xf32>
    %c0_3 = arith.constant 0 : index
    %c0_4 = arith.constant 0 : index
    %3 = vector.load %arg4[%c0_3, %c0_4] : memref<1x512xf32, #tpu.memory_space<vmem>>, vector<1x512xf32>
    %4 = vector.broadcast %3 : vector<1x512xf32> to vector<16x512xf32>
    %5 = arith.addf %2, %4 : vector<16x512xf32>
    %cst_5 = arith.constant 0.000000e+00 : f32
    %6 = vector.broadcast %cst_5 : f32 to vector<16x512xf32>
    %7 = arith.cmpf ogt, %5, %6 : vector<16x512xf32>
    %cst_6 = arith.constant 2.000000e-01 : f32
    %8 = vector.broadcast %cst_6 : f32 to vector<16x512xf32>
    %9 = arith.mulf %8, %5 : vector<16x512xf32>
    %10 = arith.select %7, %5, %9 : vector<16x512xi1>, vector<16x512xf32>
    %c0_7 = arith.constant 0 : index
    %c0_8 = arith.constant 0 : index
    %11 = vector.load %arg5[%c0_7, %c0_8] : memref<512x256xf32, #tpu.memory_space<vmem>>, vector<512x256xf32>
    %cst_9 = arith.constant dense<0.000000e+00> : vector<16x256xf32>
    %12 = tpu.matmul %10, %11, %cst_9 {dimension_numbers = #tpu.dot_dimension_numbers<[1], [0], [0], [1], [0, 0, 1, 1], [], []>} : vector<16x512xf32>, vector<512x256xf32>, vector<16x256xf32> -> vector<16x256xf32>
    %c0_10 = arith.constant 0 : index
    %c0_11 = arith.constant 0 : index
    %13 = vector.load %arg6[%c0_10, %c0_11] : memref<1x256xf32, #tpu.memory_space<vmem>>, vector<1x256xf32>
    %14 = vector.broadcast %13 : vector<1x256xf32> to vector<16x256xf32>
    %15 = arith.addf %12, %14 : vector<16x256xf32>
    %cst_12 = arith.constant 0.000000e+00 : f32
    %16 = vector.broadcast %cst_12 : f32 to vector<16x256xf32>
    %17 = arith.cmpf ogt, %15, %16 : vector<16x256xf32>
    %cst_13 = arith.constant 2.000000e-01 : f32
    %18 = vector.broadcast %cst_13 : f32 to vector<16x256xf32>
    %19 = arith.mulf %18, %15 : vector<16x256xf32>
    %20 = arith.select %17, %15, %19 : vector<16x256xi1>, vector<16x256xf32>
    %c0_14 = arith.constant 0 : index
    %c0_15 = arith.constant 0 : index
    %21 = vector.load %arg7[%c0_14, %c0_15] : memref<256x128xf32, #tpu.memory_space<vmem>>, vector<256x128xf32>
    %cst_16 = arith.constant dense<0.000000e+00> : vector<16x128xf32>
    %22 = tpu.matmul %20, %21, %cst_16 {dimension_numbers = #tpu.dot_dimension_numbers<[1], [0], [0], [1], [0, 0, 1, 1], [], []>} : vector<16x256xf32>, vector<256x128xf32>, vector<16x128xf32> -> vector<16x128xf32>
    %c0_17 = arith.constant 0 : index
    %c0_18 = arith.constant 0 : index
    %23 = vector.load %arg8[%c0_17, %c0_18] : memref<1x128xf32, #tpu.memory_space<vmem>>, vector<1x128xf32>
    %24 = vector.broadcast %23 : vector<1x128xf32> to vector<16x128xf32>
    %25 = arith.addf %22, %24 : vector<16x128xf32>
    %c0_19 = arith.constant 0 : index
    %c0_20 = arith.constant 0 : index
    %26 = vector.load %arg2[%c0_19, %c0_20] : memref<16x128xf32, #tpu.memory_space<vmem>>, vector<16x128xf32>
    %27 = vector.extract_strided_slice %25 {offsets = [0, 0], sizes = [16, 1], strides = [1, 1]} : vector<16x128xf32> to vector<16x1xf32>
    %28 = vector.extract_strided_slice %25 {offsets = [0, 2], sizes = [16, 1], strides = [1, 1]} : vector<16x128xf32> to vector<16x1xf32>
    %29 = vector.extract_strided_slice %26 {offsets = [0, 0], sizes = [16, 1], strides = [1, 1]} : vector<16x128xf32> to vector<16x1xf32>
    %30 = arith.mulf %28, %29 : vector<16x1xf32>
    %31 = arith.addf %27, %30 : vector<16x1xf32>
    %32 = vector.extract_strided_slice %25 {offsets = [0, 1], sizes = [16, 1], strides = [1, 1]} : vector<16x128xf32> to vector<16x1xf32>
    %33 = vector.extract_strided_slice %25 {offsets = [0, 3], sizes = [16, 1], strides = [1, 1]} : vector<16x128xf32> to vector<16x1xf32>
    %34 = vector.extract_strided_slice %26 {offsets = [0, 1], sizes = [16, 1], strides = [1, 1]} : vector<16x128xf32> to vector<16x1xf32>
    %35 = arith.mulf %33, %34 : vector<16x1xf32>
    %36 = arith.addf %32, %35 : vector<16x1xf32>
    %c0_21 = arith.constant 0 : index
    %c0_22 = arith.constant 0 : index
    %37 = vector.load %arg9[%c0_21, %c0_22] : memref<2x256xf32, #tpu.memory_space<vmem>>, vector<1x256xf32>
    %38 = vector.broadcast %31 : vector<16x1xf32> to vector<16x256xf32>
    %39 = vector.broadcast %37 : vector<1x256xf32> to vector<16x256xf32>
    %40 = arith.mulf %38, %39 : vector<16x256xf32>
    %c1 = arith.constant 1 : index
    %c0_23 = arith.constant 0 : index
    %41 = vector.load %arg9[%c1, %c0_23] : memref<2x256xf32, #tpu.memory_space<vmem>>, vector<1x256xf32>
    %42 = vector.broadcast %36 : vector<16x1xf32> to vector<16x256xf32>
    %43 = vector.broadcast %41 : vector<1x256xf32> to vector<16x256xf32>
    %44 = arith.mulf %42, %43 : vector<16x256xf32>
    %45 = arith.addf %40, %44 : vector<16x256xf32>
    %c0_24 = arith.constant 0 : index
    %c0_25 = arith.constant 0 : index
    %46 = vector.load %arg10[%c0_24, %c0_25] : memref<1x256xf32, #tpu.memory_space<vmem>>, vector<1x256xf32>
    %47 = vector.broadcast %46 : vector<1x256xf32> to vector<16x256xf32>
    %48 = arith.addf %45, %47 : vector<16x256xf32>
    %cst_26 = arith.constant 0.000000e+00 : f32
    %49 = vector.broadcast %cst_26 : f32 to vector<16x256xf32>
    %50 = arith.cmpf ogt, %48, %49 : vector<16x256xf32>
    %cst_27 = arith.constant 2.000000e-01 : f32
    %51 = vector.broadcast %cst_27 : f32 to vector<16x256xf32>
    %52 = arith.mulf %51, %48 : vector<16x256xf32>
    %53 = arith.select %50, %48, %52 : vector<16x256xi1>, vector<16x256xf32>
    %c0_28 = arith.constant 0 : index
    %c0_29 = arith.constant 0 : index
    %54 = vector.load %arg11[%c0_28, %c0_29] : memref<256x512xf32, #tpu.memory_space<vmem>>, vector<256x512xf32>
    %cst_30 = arith.constant dense<0.000000e+00> : vector<16x512xf32>
    %55 = tpu.matmul %53, %54, %cst_30 {dimension_numbers = #tpu.dot_dimension_numbers<[1], [0], [0], [1], [0, 0, 1, 1], [], []>} : vector<16x256xf32>, vector<256x512xf32>, vector<16x512xf32> -> vector<16x512xf32>
    %c0_31 = arith.constant 0 : index
    %c0_32 = arith.constant 0 : index
    %56 = vector.load %arg12[%c0_31, %c0_32] : memref<1x512xf32, #tpu.memory_space<vmem>>, vector<1x512xf32>
    %57 = vector.broadcast %56 : vector<1x512xf32> to vector<16x512xf32>
    %58 = arith.addf %55, %57 : vector<16x512xf32>
    %cst_33 = arith.constant 0.000000e+00 : f32
    %59 = vector.broadcast %cst_33 : f32 to vector<16x512xf32>
    %60 = arith.cmpf ogt, %58, %59 : vector<16x512xf32>
    %cst_34 = arith.constant 2.000000e-01 : f32
    %61 = vector.broadcast %cst_34 : f32 to vector<16x512xf32>
    %62 = arith.mulf %61, %58 : vector<16x512xf32>
    %63 = arith.select %60, %58, %62 : vector<16x512xi1>, vector<16x512xf32>
    %c0_35 = arith.constant 0 : index
    %c0_36 = arith.constant 0 : index
    %64 = vector.load %arg13[%c0_35, %c0_36] : memref<512x896xf32, #tpu.memory_space<vmem>>, vector<512x896xf32>
    %cst_37 = arith.constant dense<0.000000e+00> : vector<16x896xf32>
    %65 = tpu.matmul %63, %64, %cst_37 {dimension_numbers = #tpu.dot_dimension_numbers<[1], [0], [0], [1], [0, 0, 1, 1], [], []>} : vector<16x512xf32>, vector<512x896xf32>, vector<16x896xf32> -> vector<16x896xf32>
    %c0_38 = arith.constant 0 : index
    %c0_39 = arith.constant 0 : index
    %66 = vector.load %arg14[%c0_38, %c0_39] : memref<1x896xf32, #tpu.memory_space<vmem>>, vector<1x896xf32>
    %67 = vector.broadcast %66 : vector<1x896xf32> to vector<16x896xf32>
    %68 = arith.addf %65, %67 : vector<16x896xf32>
    %69 = arith.negf %68 : vector<16x896xf32>
    %70 = math.exp %69 : vector<16x896xf32>
    %cst_40 = arith.constant 1.000000e+00 : f32
    %71 = vector.broadcast %cst_40 : f32 to vector<16x896xf32>
    %72 = arith.addf %71, %70 : vector<16x896xf32>
    %73 = arith.divf %71, %72 : vector<16x896xf32>
    %c0_41 = arith.constant 0 : index
    %c0_42 = arith.constant 0 : index
    %74 = vector.load %arg15[%c0_41, %c0_42] : memref<16x896xf32, #tpu.memory_space<vmem>>, vector<16x896xf32>
    tpu.vector_store %arg15[%c0_41, %c0_42], %73 {strides = array<i32>} : memref<16x896xf32, #tpu.memory_space<vmem>>, vector<16x896xf32>,
    %c0_43 = arith.constant 0 : index
    %c0_44 = arith.constant 0 : index
    %75 = vector.load %arg16[%c0_43, %c0_44] : memref<16x128xf32, #tpu.memory_space<vmem>>, vector<16x128xf32>
    tpu.vector_store %arg16[%c0_43, %c0_44], %25 {strides = array<i32>} : memref<16x128xf32, #tpu.memory_space<vmem>>, vector<16x128xf32>,
    return
  }
  func.func @transform_0(%arg0: i32) -> (i32, i32) {
    %c0_i32 = arith.constant 0 : i32
    %c0_i32_0 = arith.constant 0 : i32
    return %arg0, %c0_i32 : i32, i32
  }
  func.func @transform_1(%arg0: i32) -> (i32, i32) {
    %c0_i32 = arith.constant 0 : i32
    %c0_i32_0 = arith.constant 0 : i32
    return %arg0, %c0_i32 : i32, i32
  }
  func.func @transform_2(%arg0: i32) -> (i32, i32) {
    %c0_i32 = arith.constant 0 : i32
    %c0_i32_0 = arith.constant 0 : i32
    %c0_i32_1 = arith.constant 0 : i32
    return %c0_i32, %c0_i32_0 : i32, i32
  }
  func.func @transform_3(%arg0: i32) -> (i32, i32) {
    %c0_i32 = arith.constant 0 : i32
    %c0_i32_0 = arith.constant 0 : i32
    %c0_i32_1 = arith.constant 0 : i32
    return %c0_i32, %c0_i32_0 : i32, i32
  }
  func.func @transform_4(%arg0: i32) -> (i32, i32) {
    %c0_i32 = arith.constant 0 : i32
    %c0_i32_0 = arith.constant 0 : i32
    %c0_i32_1 = arith.constant 0 : i32
    return %c0_i32, %c0_i32_0 : i32, i32
  }
  func.func @transform_5(%arg0: i32) -> (i32, i32) {
    %c0_i32 = arith.constant 0 : i32
    %c0_i32_0 = arith.constant 0 : i32
    %c0_i32_1 = arith.constant 0 : i32
    return %c0_i32, %c0_i32_0 : i32, i32
  }
  func.func @transform_6(%arg0: i32) -> (i32, i32) {
    %c0_i32 = arith.constant 0 : i32
    %c0_i32_0 = arith.constant 0 : i32
    %c0_i32_1 = arith.constant 0 : i32
    return %c0_i32, %c0_i32_0 : i32, i32
  }
  func.func @transform_7(%arg0: i32) -> (i32, i32) {
    %c0_i32 = arith.constant 0 : i32
    %c0_i32_0 = arith.constant 0 : i32
    %c0_i32_1 = arith.constant 0 : i32
    return %c0_i32, %c0_i32_0 : i32, i32
  }
  func.func @transform_8(%arg0: i32) -> (i32, i32) {
    %c0_i32 = arith.constant 0 : i32
    %c0_i32_0 = arith.constant 0 : i32
    %c0_i32_1 = arith.constant 0 : i32
    return %c0_i32, %c0_i32_0 : i32, i32
  }
  func.func @transform_9(%arg0: i32) -> (i32, i32) {
    %c0_i32 = arith.constant 0 : i32
    %c0_i32_0 = arith.constant 0 : i32
    %c0_i32_1 = arith.constant 0 : i32
    return %c0_i32, %c0_i32_0 : i32, i32
  }
  func.func @transform_10(%arg0: i32) -> (i32, i32) {
    %c0_i32 = arith.constant 0 : i32
    %c0_i32_0 = arith.constant 0 : i32
    %c0_i32_1 = arith.constant 0 : i32
    return %c0_i32, %c0_i32_0 : i32, i32
  }
  func.func @transform_11(%arg0: i32) -> (i32, i32) {
    %c0_i32 = arith.constant 0 : i32
    %c0_i32_0 = arith.constant 0 : i32
    %c0_i32_1 = arith.constant 0 : i32
    return %c0_i32, %c0_i32_0 : i32, i32
  }
  func.func @transform_12(%arg0: i32) -> (i32, i32) {
    %c0_i32 = arith.constant 0 : i32
    %c0_i32_0 = arith.constant 0 : i32
    %c0_i32_1 = arith.constant 0 : i32
    return %c0_i32, %c0_i32_0 : i32, i32
  }
  func.func @transform_13(%arg0: i32) -> (i32, i32) {
    %c0_i32 = arith.constant 0 : i32
    %c0_i32_0 = arith.constant 0 : i32
    %c0_i32_1 = arith.constant 0 : i32
    return %c0_i32, %c0_i32_0 : i32, i32
  }
  func.func @transform_14(%arg0: i32) -> (i32, i32) {
    %c0_i32 = arith.constant 0 : i32
    %c0_i32_0 = arith.constant 0 : i32
    return %arg0, %c0_i32 : i32, i32
  }
  func.func @transform_15(%arg0: i32) -> (i32, i32) {
    %c0_i32 = arith.constant 0 : i32
    %c0_i32_0 = arith.constant 0 : i32
    return %arg0, %c0_i32 : i32, i32
  }
}

</mosaic_0001>

<bundles_post_ra>
// kernel: tpu_custom_call.1
= control target key start
LH: loop header
LB: loop body
LE: loop exit
PB: predicated region body
PF: predicated region fallthrough
CT: control target
= control target key end

     0   :  { %21 = vsyncpa [#allocation3], 0  ;;  %s4760_s0 = inlined_call_operand.hbm [shape: f32[16,896], index: 0, kind: input, shape index: {}]   ;;  %s4761_s1 = inlined_call_operand.hbm [shape: f32[16,128], index: 1, kind: input, shape index: {}]   ;;  %s4762_s2 = inlined_call_operand.hbm [shape: f32[896,512], index: 2, kind: input, shape index: {}]   ;;  %s4763_s3 = inlined_call_operand.hbm [shape: f32[1,512], index: 3, kind: input, shape index: {}]   ;;  %s4764_s4 = inlined_call_operand.hbm [shape: f32[512,256], index: 4, kind: input, shape index: {}]   ;;  %s4765_s5 = inlined_call_operand.hbm [shape: f32[1,256], index: 5, kind: input, shape index: {}]   ;;  %s4766_s6 = inlined_call_operand.hbm [shape: f32[256,128], index: 6, kind: input, shape index: {}]   ;;  %s4767_s7 = inlined_call_operand.hbm [shape: f32[1,128], index: 7, kind: input, shape index: {}]   ;;  %s4768_s8 = inlined_call_operand.hbm [shape: f32[2,256], index: 8, kind: input, shape index: {}]   ;;  %s4769_s9 = inlined_call_operand.hbm [shape: f32[1,256], index: 9, kind: input, shape index: {}]   ;;  %s4770_s10 = inlined_call_operand.hbm [shape: f32[256,512], index: 10, kind: input, shape index: {}]   ;;  %s4771_s11 = inlined_call_operand.hbm [shape: f32[1,512], index: 11, kind: input, shape index: {}]   ;;  %s4772_s12 = inlined_call_operand.hbm [shape: f32[512,896], index: 12, kind: input, shape index: {}]   ;;  %s4773_s13 = inlined_call_operand.hbm [shape: f32[1,896], index: 13, kind: input, shape index: {}]   ;;  %s4774_s14 = inlined_call_operand.hbm [shape: f32[16,896], index: 14, kind: output, shape index: {0}]   ;;  %s4775_s15 = inlined_call_operand.hbm [shape: f32[16,128], index: 15, kind: output, shape index: {1}]  }
   0x1   :  { %22 = vsyncpa [#allocation6], 0 }
   0x2   :  { %23 = vsyncpa [#allocation9], 0 }
   0x3   :  { %24 = vsyncpa [#allocation12], 0 }
   0x4   :  { %25 = vsyncpa [#allocation15], 0 }
   0x5   :  { %26 = vsyncpa [#allocation18], 0 }
   0x6   :  { %27 = vsyncpa [#allocation21], 0 }
   0x7   :  { %28 = vsyncpa [#allocation24], 0 }
   0x8   :  { %29 = vsyncpa [#allocation4], 0  ;;  %s48_s20 = sshll.u32 %s4761_s1, 4  ;;  %s49_s20 = int_to_ptr.hbm [resolvable:$true] %s48_s20 }
   0x9   :  { %30 = vsyncpa [#allocation27], 0  ;;  %s4229_s21 = smov [#allocation5]   ;;  %s75_s25 = sshll.u32 %s4763_s3, 4  ;;  %s76_s25 = int_to_ptr.hbm [resolvable:$true] %s75_s25 }
   0xa   :  { %s50_s22 = sshll.u32 %s4229_s21, 4  ;;  %s4230_s26 = smov 128   ;;  %s51_s22 = int_to_ptr.vmem [resolvable:$true] %s50_s22 }
   0xb   :  { %s4231_s27 = smov 8   ;;  %s4232_s28 = smov [#allocation8]  }
   0xc   :  { %56 = dma.hbm_to_vmem [thread:$0]  %s49_s20, 256, %s51_s22, [#allocation6], %s4230_s26, %s4230_s26, %s4231_s27  }
   0xd   :  { %s77_s29 = sshll.u32 %s4232_s28, 4  ;;  %s99_s16 = sshll.u32 %s4765_s5, 4  ;;  %s78_s29 = int_to_ptr.vmem [resolvable:$true] %s77_s29  ;;  %s100_s16 = int_to_ptr.hbm [resolvable:$true] %s99_s16 }
   0xe   :  { %80 = dma.hbm_to_vmem [thread:$0]  %s76_s25, 64, %s78_s29, [#allocation9]  }
   0xf   :  { %s123_s3 = sshll.u32 %s4767_s7, 4  ;;  %s4233_s19 = smov [#allocation11]   ;;  %s124_s3 = int_to_ptr.hbm [resolvable:$true] %s123_s3 }
  0x10   :  { %s101_s21 = sshll.u32 %s4233_s19, 4  ;;  %s4234_s20 = smov [#allocation14]   ;;  %s102_s21 = int_to_ptr.vmem [resolvable:$true] %s101_s21 }
  0x11   :  { %104 = dma.hbm_to_vmem [thread:$0]  %s100_s16, 32, %s102_s21, [#allocation12]  }
  0x12   :  { %s125_s22 = sshll.u32 %s4234_s20, 4  ;;  %s145_s28 = sshll.u32 %s4769_s9, 4  ;;  %s126_s22 = int_to_ptr.vmem [resolvable:$true] %s125_s22  ;;  %s146_s28 = int_to_ptr.hbm [resolvable:$true] %s145_s28 }
  0x13   :  { %128 = dma.hbm_to_vmem [thread:$0]  %s124_s3, 16, %s126_s22, [#allocation15]  }
  0x14   :  { %s169_s29 = sshll.u32 %s4771_s11, 4  ;;  %s4235_s30 = smov [#allocation17]   ;;  %s170_s29 = int_to_ptr.hbm [resolvable:$true] %s169_s29 }
  0x15   :  { %s147_s7 = sshll.u32 %s4235_s30, 4  ;;  %s4236_s1 = smov [#allocation20]   ;;  %s148_s7 = int_to_ptr.vmem [resolvable:$true] %s147_s7 }
  0x16   :  { %150 = dma.hbm_to_vmem [thread:$0]  %s146_s28, 32, %s148_s7, [#allocation18]  }
  0x17   :  { %s171_s16 = sshll.u32 %s4236_s1, 4  ;;  %s35_s19 = sshll.u32 %s4760_s0, 4  ;;  %s172_s16 = int_to_ptr.vmem [resolvable:$true] %s171_s16  ;;  %s36_s19 = int_to_ptr.hbm [resolvable:$true] %s35_s19 }
  0x18   :  { %174 = dma.hbm_to_vmem [thread:$0]  %s170_s29, 64, %s172_s16, [#allocation21]  }
  0x19   :  { %s4237_s9 = smov [#allocation2]   ;;  %s61_s11 = sshll.u32 %s4762_s2, 4  ;;  %s62_s11 = int_to_ptr.hbm [resolvable:$true] %s61_s11 }
  0x1a   :  { %s37_s3 = sshll.u32 %s4237_s9, 4  ;;  %s4238_s22 = smov 896   ;;  %s38_s3 = int_to_ptr.vmem [resolvable:$true] %s37_s3 }
  0x1b   :  { %s4239_s23 = smov 56   ;;  %s4240_s24 = smov [#allocation7]  }
  0x1c   :  { %43 = dma.hbm_to_vmem [thread:$0]  %s36_s19, 1792, %s38_s3, [#allocation3], %s4238_s22, %s4238_s22, %s4239_s23  }
  0x1d   :  { %s63_s28 = sshll.u32 %s4240_s24, 4  ;;  %s4241_s0 = smov 512   ;;  %s64_s28 = int_to_ptr.vmem [resolvable:$true] %s63_s28 }
  0x1e   :  { %s4242_s5 = smov 32   ;;  %s85_s2 = sshll.u32 %s4764_s4, 4  ;;  %s86_s2 = int_to_ptr.hbm [resolvable:$true] %s85_s2 }
  0x1f   :  { %69 = dma.hbm_to_vmem [thread:$0]  %s62_s11, 57344, %s64_s28, [#allocation6], %s4241_s0, %s4241_s0, %s4242_s5  }
  0x20   :  { %s4243_s30 = smov [#allocation10]   ;;  %s109_s17 = sshll.u32 %s4766_s6, 4  ;;  %s110_s17 = int_to_ptr.hbm [resolvable:$true] %s109_s17 }
  0x21   :  { %s87_s7 = sshll.u32 %s4243_s30, 4  ;;  %s4244_s18 = smov 256   ;;  %s88_s7 = int_to_ptr.vmem [resolvable:$true] %s87_s7 }
  0x22   :  { %s4245_s19 = smov 16   ;;  %s4246_s9 = smov [#allocation13]  }
  0x23   :  { %93 = dma.hbm_to_vmem [thread:$0]  %s86_s2, 16384, %s88_s7, [#allocation9], %s4244_s18, %s4244_s18, %s4245_s19  }
  0x24   :  { %s111_s3 = sshll.u32 %s4246_s9, 4  ;;  %s134_s11 = sshll.u32 %s4768_s8, 4  ;;  %s112_s3 = int_to_ptr.vmem [resolvable:$true] %s111_s3  ;;  %s135_s11 = int_to_ptr.hbm [resolvable:$true] %s134_s11 }
  0x25   :  { %117 = dma.hbm_to_vmem [thread:$0]  %s110_s17, 4096, %s112_s3, [#allocation12], %s4230_s26, %s4230_s26, %s4231_s27  }
  0x26   :  { %s155_s6 = sshll.u32 %s4770_s10, 4  ;;  %s4247_s28 = smov [#allocation16]   ;;  %s156_s6 = int_to_ptr.hbm [resolvable:$true] %s155_s6 }
  0x27   :  { %s136_s25 = sshll.u32 %s4247_s28, 4  ;;  %s4248_s29 = smov [#allocation19]   ;;  %s137_s25 = int_to_ptr.vmem [resolvable:$true] %s136_s25 }
  0x28   :  { %139 = dma.hbm_to_vmem [thread:$0]  %s135_s11, 64, %s137_s25, [#allocation15]  }
  0x29   :  { %s157_s2 = sshll.u32 %s4248_s29, 4  ;;  %s179_s8 = sshll.u32 %s4772_s12, 4  ;;  %s158_s2 = int_to_ptr.vmem [resolvable:$true] %s157_s2  ;;  %s180_s8 = int_to_ptr.hbm [resolvable:$true] %s179_s8 }
  0x2a   :  { %163 = dma.hbm_to_vmem [thread:$0]  %s156_s6, 16384, %s158_s2, [#allocation18], %s4241_s0, %s4241_s0, %s4242_s5  }
  0x2b   :  { %s193_s10 = sshll.u32 %s4773_s13, 4  ;;  %s4249_s17 = smov [#allocation22]   ;;  %s194_s10 = int_to_ptr.hbm [resolvable:$true] %s193_s10 }
  0x2c   :  { %s181_s18 = sshll.u32 %s4249_s17, 4  ;;  %s4250_s19 = smov [#allocation23]   ;;  %s182_s18 = int_to_ptr.vmem [resolvable:$true] %s181_s18 }
  0x2d   :  { %187 = dma.hbm_to_vmem [thread:$0]  %s180_s8, 57344, %s182_s18, [#allocation21], %s4238_s22, %s4238_s22, %s4239_s23  }
  0x2e   :  { %s195_s12 = sshll.u32 %s4250_s19, 4  ;;  %s196_s12 = int_to_ptr.vmem [resolvable:$true] %s195_s12 }
  0x2f   :  { %198 = dma.hbm_to_vmem [thread:$0]  %s194_s10, 112, %s196_s12, [#allocation24]  }
  0x30   :  { %4209 = dma.done.wait [#allocation3], 1792  }
  0x31   :  { %4210 = vsyncadd [#allocation3], 4294965504 }
  0x32   :  { %4211 = dma.done.wait [#allocation6], 57600  }
  0x33   :  { %4212 = vsyncadd [#allocation6], 4294909696 }
  0x34   :  { %4213 = dma.done.wait [#allocation9], 16448  }
  0x35   :  { %4214 = vsyncadd [#allocation9], 4294950848 }
  0x36   :  { %4215 = dma.done.wait [#allocation12], 4128  }
  0x37   :  { %4216 = vsyncadd [#allocation12], 4294963168 }
  0x38   :  { %4217 = dma.done.wait [#allocation15], 80  }
  0x39   :  { %4218 = vsyncadd [#allocation15], 4294967216 }
  0x3a   :  { %4219 = dma.done.wait [#allocation18], 16416  }
  0x3b   :  { %4220 = vsyncadd [#allocation18], 4294950880 }
  0x3c   :  { %4221 = dma.done.wait [#allocation21], 57408  }
  0x3d   :  { %4222 = vsyncadd [#allocation21], 4294909888 }
  0x3e   :  { %4223 = dma.done.wait [#allocation24], 112  }
  0x3f   :  { %4224 = vsyncadd [#allocation24], 4294967184  ;;  %v329_v0 = vld [vmem:[#allocation7 + $0x1e0] sm:$0xff]  ;;  %s4251_s13 = smov 2   ;;  %s4252_s0 = smov 126  }
  0x40   :  { %v393_v1 = vld [vmem:[#allocation7 + $0x3e0] sm:$0xff]  ;;  %727 = vmatpush.msra.mxu0 %v329_v0  ;;  %s4255_s5 = smov [#allocation26]   ;;  %s3649_s20 = sshll.u32 %s4775_s15, 4  ;;  %s3650_s20 = int_to_ptr.hbm [resolvable:$true] %s3649_s20 }
  0x41   :  { %v457_v2 = vld [vmem:[#allocation7 + $0x5e0] sm:$0xff]  ;;  %750 = vmatpush.msra.mxu1 %v393_v1  ;;  %s3647_s9 = sshll.u32 %s4255_s5, 4  ;;  %s4256_s15 = smov [#allocation25]   ;;  %s3648_s9 = int_to_ptr.vmem [resolvable:$true] %s3647_s9 }
  0x42   :  { %v325_v3 = vld [vmem:[#allocation7 + $0x1c0] sm:$0xff]  ;;  %773 = vmatpush.msra.mxu2 %v457_v2  ;;  %s3636_s4 = sshll.u32 %s4774_s14, 4  ;;  %s3637_s4 = int_to_ptr.hbm [resolvable:$true] %s3636_s4 }
  0x43   :  { %v389_v4 = vld [vmem:[#allocation7 + $0x3c0] sm:$0xff]  ;;  %728 = vmatpush.msra.mxu0 %v325_v3 }
  0x44   :  { %v453_v5 = vld [vmem:[#allocation7 + $0x5c0] sm:$0xff]  ;;  %751 = vmatpush.msra.mxu1 %v389_v4 }
  0x45   :  { %v521_v6 = vld [vmem:[#allocation7 + $0x7e0] sm:$0xff]  ;;  %774 = vmatpush.msra.mxu2 %v453_v5 }
  0x46   :  { %v321_v7 = vld [vmem:[#allocation7 + $0x1a0] sm:$0xff]  ;;  %796 = vmatpush.msra.mxu3 %v521_v6  ;;  %v330_v6 = vld [vmem:[#allocation7 + $0x1e8] sm:$0xff] }
  0x47   :  { %v385_v8 = vld [vmem:[#allocation7 + $0x3a0] sm:$0xff]  ;;  %729 = vmatpush.msra.mxu0 %v321_v7 }
  0x48   :  { %v449_v9 = vld [vmem:[#allocation7 + $0x5a0] sm:$0xff]  ;;  %752 = vmatpush.msra.mxu1 %v385_v8 }
  0x49   :  { %v517_v10 = vld [vmem:[#allocation7 + $0x7c0] sm:$0xff]  ;;  %775 = vmatpush.msra.mxu2 %v449_v9 }
  0x4a   :  { %v317_v11 = vld [vmem:[#allocation7 + $0x180] sm:$0xff]  ;;  %797 = vmatpush.msra.mxu3 %v517_v10  ;;  %v326_v10 = vld [vmem:[#allocation7 + $0x1c8] sm:$0xff] }
  0x4b   :  { %v381_v12 = vld [vmem:[#allocation7 + $0x380] sm:$0xff]  ;;  %730 = vmatpush.msra.mxu0 %v317_v11 }
  0x4c   :  { %v445_v13 = vld [vmem:[#allocation7 + $0x580] sm:$0xff]  ;;  %753 = vmatpush.msra.mxu1 %v381_v12 }
  0x4d   :  { %v513_v14 = vld [vmem:[#allocation7 + $0x7a0] sm:$0xff]  ;;  %776 = vmatpush.msra.mxu2 %v445_v13 }
  0x4e   :  { %v313_v15 = vld [vmem:[#allocation7 + $0x160] sm:$0xff]  ;;  %798 = vmatpush.msra.mxu3 %v513_v14  ;;  %v322_v14 = vld [vmem:[#allocation7 + $0x1a8] sm:$0xff] }
  0x4f   :  { %v377_v16 = vld [vmem:[#allocation7 + $0x360] sm:$0xff]  ;;  %731 = vmatpush.msra.mxu0 %v313_v15 }
  0x50   :  { %v441_v17 = vld [vmem:[#allocation7 + $0x560] sm:$0xff]  ;;  %754 = vmatpush.msra.mxu1 %v377_v16 }
  0x51   :  { %v509_v18 = vld [vmem:[#allocation7 + $0x780] sm:$0xff]  ;;  %777 = vmatpush.msra.mxu2 %v441_v17 }
  0x52   :  { %v309_v19 = vld [vmem:[#allocation7 + $0x140] sm:$0xff]  ;;  %799 = vmatpush.msra.mxu3 %v509_v18  ;;  %v318_v18 = vld [vmem:[#allocation7 + $0x188] sm:$0xff] }
  0x53   :  { %v373_v20 = vld [vmem:[#allocation7 + $0x340] sm:$0xff]  ;;  %732 = vmatpush.msra.mxu0 %v309_v19 }
  0x54   :  { %v437_v21 = vld [vmem:[#allocation7 + $0x540] sm:$0xff]  ;;  %755 = vmatpush.msra.mxu1 %v373_v20 }
  0x55   :  { %v505_v22 = vld [vmem:[#allocation7 + $0x760] sm:$0xff]  ;;  %778 = vmatpush.msra.mxu2 %v437_v21 }
  0x56   :  { %v305_v23 = vld [vmem:[#allocation7 + $0x120] sm:$0xff]  ;;  %800 = vmatpush.msra.mxu3 %v505_v22  ;;  %v314_v22 = vld [vmem:[#allocation7 + $0x168] sm:$0xff] }
  0x57   :  { %v369_v24 = vld [vmem:[#allocation7 + $0x320] sm:$0xff]  ;;  %733 = vmatpush.msra.mxu0 %v305_v23 }
  0x58   :  { %v433_v25 = vld [vmem:[#allocation7 + $0x520] sm:$0xff]  ;;  %756 = vmatpush.msra.mxu1 %v369_v24 }
  0x59   :  { %v501_v26 = vld [vmem:[#allocation7 + $0x740] sm:$0xff]  ;;  %779 = vmatpush.msra.mxu2 %v433_v25 }
  0x5a   :  { %v301_v27 = vld [vmem:[#allocation7 + $0x100] sm:$0xff]  ;;  %801 = vmatpush.msra.mxu3 %v501_v26  ;;  %v310_v26 = vld [vmem:[#allocation7 + $0x148] sm:$0xff] }
  0x5b   :  { %v365_v28 = vld [vmem:[#allocation7 + $0x300] sm:$0xff]  ;;  %734 = vmatpush.msra.mxu0 %v301_v27 }
  0x5c   :  { %v429_v29 = vld [vmem:[#allocation7 + $0x500] sm:$0xff]  ;;  %757 = vmatpush.msra.mxu1 %v365_v28 }
  0x5d   :  { %v497_v30 = vld [vmem:[#allocation7 + $0x720] sm:$0xff]  ;;  %780 = vmatpush.msra.mxu2 %v429_v29 }
  0x5e   :  { %v297_v31 = vld [vmem:[#allocation7 + $0xe0] sm:$0xff]  ;;  %802 = vmatpush.msra.mxu3 %v497_v30  ;;  %v306_v30 = vld [vmem:[#allocation7 + $0x128] sm:$0xff] }
  0x5f   :  { %v361_v32 = vld [vmem:[#allocation7 + $0x2e0] sm:$0xff]  ;;  %735 = vmatpush.msra.mxu0 %v297_v31 }
  0x60   :  { %v425_v33 = vld [vmem:[#allocation7 + $0x4e0] sm:$0xff]  ;;  %758 = vmatpush.msra.mxu1 %v361_v32 }
  0x61   :  { %v493_v34 = vld [vmem:[#allocation7 + $0x700] sm:$0xff]  ;;  %781 = vmatpush.msra.mxu2 %v425_v33 }
  0x62   :  { %v293_v35 = vld [vmem:[#allocation7 + $0xc0] sm:$0xff]  ;;  %803 = vmatpush.msra.mxu3 %v493_v34  ;;  %v302_v34 = vld [vmem:[#allocation7 + $0x108] sm:$0xff] }
  0x63   :  { %v357_v36 = vld [vmem:[#allocation7 + $0x2c0] sm:$0xff]  ;;  %736 = vmatpush.msra.mxu0 %v293_v35 }
  0x64   :  { %v421_v37 = vld [vmem:[#allocation7 + $0x4c0] sm:$0xff]  ;;  %759 = vmatpush.msra.mxu1 %v357_v36 }
  0x65   :  { %v489_v38 = vld [vmem:[#allocation7 + $0x6e0] sm:$0xff]  ;;  %782 = vmatpush.msra.mxu2 %v421_v37 }
  0x66   :  { %v289_v39 = vld [vmem:[#allocation7 + $0xa0] sm:$0xff]  ;;  %804 = vmatpush.msra.mxu3 %v489_v38  ;;  %v298_v38 = vld [vmem:[#allocation7 + $0xe8] sm:$0xff] }
  0x67   :  { %v353_v40 = vld [vmem:[#allocation7 + $0x2a0] sm:$0xff]  ;;  %737 = vmatpush.msra.mxu0 %v289_v39 }
  0x68   :  { %v417_v41 = vld [vmem:[#allocation7 + $0x4a0] sm:$0xff]  ;;  %760 = vmatpush.msra.mxu1 %v353_v40 }
  0x69   :  { %v485_v42 = vld [vmem:[#allocation7 + $0x6c0] sm:$0xff]  ;;  %783 = vmatpush.msra.mxu2 %v417_v41 }
  0x6a   :  { %v285_v43 = vld [vmem:[#allocation7 + $0x80] sm:$0xff]  ;;  %805 = vmatpush.msra.mxu3 %v485_v42  ;;  %v294_v42 = vld [vmem:[#allocation7 + $0xc8] sm:$0xff] }
  0x6b   :  { %v349_v44 = vld [vmem:[#allocation7 + $0x280] sm:$0xff]  ;;  %738 = vmatpush.msra.mxu0 %v285_v43  ;;  %v4397_v43 = vld [vmem:[#allocation2 + $0x10] sm:$0xff] }
  0x6c   :  { %v413_v45 = vld [vmem:[#allocation7 + $0x480] sm:$0xff]  ;;  %761 = vmatpush.msra.mxu1 %v349_v44 }
  0x6d   :  { %v481_v46 = vld [vmem:[#allocation7 + $0x6a0] sm:$0xff]  ;;  %784 = vmatpush.msra.mxu2 %v413_v45 }
  0x6e   :  { %v281_v47 = vld [vmem:[#allocation7 + $0x60] sm:$0xff]  ;;  %806 = vmatpush.msra.mxu3 %v481_v46 }
  0x6f   :  { %v345_v48 = vld [vmem:[#allocation7 + $0x260] sm:$0xff]  ;;  %739 = vmatpush.msra.mxu0 %v281_v47  ;;  %v290_v47 = vld [vmem:[#allocation7 + $0xa8] sm:$0xff] }
  0x70   :  { %v409_v49 = vld [vmem:[#allocation7 + $0x460] sm:$0xff]  ;;  %762 = vmatpush.msra.mxu1 %v345_v48 }
  0x71   :  { %v477_v50 = vld [vmem:[#allocation7 + $0x680] sm:$0xff]  ;;  %785 = vmatpush.msra.mxu2 %v409_v49 }
  0x72   :  { %v277_v51 = vld [vmem:[#allocation7 + $0x40] sm:$0xff]  ;;  %807 = vmatpush.msra.mxu3 %v477_v50 }
  0x73   :  { %v341_v52 = vld [vmem:[#allocation7 + $0x240] sm:$0xff]  ;;  %740 = vmatpush.msra.mxu0 %v277_v51 }
  0x74   :  { %v405_v53 = vld [vmem:[#allocation7 + $0x440] sm:$0xff]  ;;  %763 = vmatpush.msra.mxu1 %v341_v52  ;;  %v286_v52 = vld [vmem:[#allocation7 + $0x88] sm:$0xff] }
  0x75   :  { %v473_v54 = vld [vmem:[#allocation7 + $0x660] sm:$0xff]  ;;  %786 = vmatpush.msra.mxu2 %v405_v53  ;;  %v4403_v53 = vld [vmem:[#allocation2 + $0x8] sm:$0xff] }
  0x76   :  { %v273_v55 = vld [vmem:[#allocation7 + $0x20] sm:$0xff]  ;;  %808 = vmatpush.msra.mxu3 %v473_v54 }
  0x77   :  { %v337_v56 = vld [vmem:[#allocation7 + $0x220] sm:$0xff]  ;;  %741 = vmatpush.msra.mxu0 %v273_v55 }
  0x78   :  { %v401_v57 = vld [vmem:[#allocation7 + $0x420] sm:$0xff]  ;;  %764 = vmatpush.msra.mxu1 %v337_v56 }
  0x79   :  { %v469_v58 = vld [vmem:[#allocation7 + $0x640] sm:$0xff]  ;;  %787 = vmatpush.msra.mxu2 %v401_v57  ;;  %v282_v57 = vld [vmem:[#allocation7 + $0x68] sm:$0xff] }
  0x7a   :  { %v269_v59 = vld [vmem:[#allocation7] sm:$0xff]  ;;  %809 = vmatpush.msra.mxu3 %v469_v58 }
  0x7b   :  { %v333_v60 = vld [vmem:[#allocation7 + $0x200] sm:$0xff]  ;;  %742 = vmatpush.msra.mxu0 %v269_v59 }
  0x7c   :  { %v397_v61 = vld [vmem:[#allocation7 + $0x400] sm:$0xff]  ;;  %765 = vmatpush.msra.mxu1 %v333_v60 }
  0x7d   :  { %v465_v62 = vld [vmem:[#allocation7 + $0x620] sm:$0xff]  ;;  %788 = vmatpush.msra.mxu2 %v397_v61  ;;  %766 = vmatmul.f32.vlgmr.msra.gmra.mxu1 %v4403_v53  ;;  %v278_v61 = vld [vmem:[#allocation7 + $0x48] sm:$0xff] }
  0x7e   :  { %v585_v63 = vld [vmem:[#allocation7 + $0x9e0] sm:$0xff]  ;;  %810 = vmatpush.msra.mxu3 %v465_v62  ;;  %789 = vmatmul.f32.vlgmr.msra.gmra.mxu2 %v4397_v43  ;;  %v4406_v62 = vld [vmem:[#allocation2 + $0x48] sm:$0xff] }
  0x7f   :  { %v649_v0 = vld [vmem:[#allocation7 + $0xbe0] sm:$0xff]  ;;  %819 = vmatpush.msrb.mxu0 %v585_v63 }
  0x80   :  { %v713_v1 = vld [vmem:[#allocation7 + $0xde0] sm:$0xff]  ;;  %842 = vmatpush.msrb.mxu1 %v649_v0 }
  0x81   :  { %v461_v2 = vld [vmem:[#allocation7 + $0x600] sm:$0xff]  ;;  %865 = vmatpush.msrb.mxu2 %v713_v1 }
  0x82   :  { %v581_v3 = vld [vmem:[#allocation7 + $0x9c0] sm:$0xff]  ;;  %811 = vmatpush.msra.mxu3 %v461_v2  ;;  %v274_v2 = vld [vmem:[#allocation7 + $0x28] sm:$0xff] }
  0x83   :  { %v645_v4 = vld [vmem:[#allocation7 + $0xbc0] sm:$0xff]  ;;  %820 = vmatpush.msrb.mxu0 %v581_v3  ;;  %v4409_v3 = vld [vmem:[#allocation2 + $0x38] sm:$0xff] }
  0x84   :  { %v709_v5 = vld [vmem:[#allocation7 + $0xdc0] sm:$0xff]  ;;  %843 = vmatpush.msrb.mxu1 %v645_v4  ;;  %888 = vmatpush.msrb.mxu3 %v330_v6  ;;  %v4411_v4 = vld [vmem:[#allocation2 + $0x18] sm:$0xff]  ;;  %v458_v6 = vld [vmem:[#allocation7 + $0x5e8] sm:$0xff] }
  0x85   :  { %v577_v7 = vld [vmem:[#allocation7 + $0x9a0] sm:$0xff]  ;;  %866 = vmatpush.msrb.mxu2 %v709_v5  ;;  %v394_v5 = vld [vmem:[#allocation7 + $0x3e8] sm:$0xff]  ;;  %812 = vmatmul.f32.vlgmr.msra.gmra.mxu3 %v4411_v4 }
  0x86   :  { %v641_v8 = vld [vmem:[#allocation7 + $0xba0] sm:$0xff]  ;;  %821 = vmatpush.msrb.mxu0 %v577_v7  ;;  %889 = vmatpush.msrb.mxu3 %v326_v10  ;;  %v522_v7 = vld [vmem:[#allocation7 + $0x7e8] sm:$0xff] }
  0x87   :  { %v705_v9 = vld [vmem:[#allocation7 + $0xda0] sm:$0xff]  ;;  %844 = vmatpush.msrb.mxu1 %v641_v8  ;;  %792 = vmatmul.f32.gmra.mxu2 %v4406_v62  ;;  %v270_v8 = vld [vmem:[#allocation7 + $0x8] sm:$0xff] }
  0x88   :  { %v573_v11 = vld [vmem:[#allocation7 + $0x980] sm:$0xff]  ;;  %867 = vmatpush.msrb.mxu2 %v705_v9  ;;  %890 = vmatpush.msrb.mxu3 %v322_v14  ;;  %v390_v10 = vld [vmem:[#allocation7 + $0x3c8] sm:$0xff] }
  0x89   :  { %v637_v12 = vld [vmem:[#allocation7 + $0xb80] sm:$0xff]  ;;  %822 = vmatpush.msrb.mxu0 %v573_v11  ;;  %v454_v11 = vld [vmem:[#allocation7 + $0x5c8] sm:$0xff] }
  0x8a   :  { %v701_v13 = vld [vmem:[#allocation7 + $0xd80] sm:$0xff]  ;;  %845 = vmatpush.msrb.mxu1 %v637_v12  ;;  %891 = vmatpush.msrb.mxu3 %v318_v18  ;;  %v518_v12 = vld [vmem:[#allocation7 + $0x7c8] sm:$0xff]  ;;  %v4418_v18 = vld [vmem:[#allocation2 + $0x30] sm:$0xff] }
  0x8b   :  { %v569_v15 = vld [vmem:[#allocation7 + $0x960] sm:$0xff]  ;;  %868 = vmatpush.msrb.mxu2 %v701_v13  ;;  %v586_v13 = vld [vmem:[#allocation7 + $0x9e8] sm:$0xff] }
  0x8c   :  { %v633_v16 = vld [vmem:[#allocation7 + $0xb60] sm:$0xff]  ;;  %823 = vmatpush.msrb.mxu0 %v569_v15  ;;  %892 = vmatpush.msrb.mxu3 %v314_v22  ;;  %v386_v14 = vld [vmem:[#allocation7 + $0x3a8] sm:$0xff] }
  0x8d   :  { %v697_v17 = vld [vmem:[#allocation7 + $0xd60] sm:$0xff]  ;;  %846 = vmatpush.msrb.mxu1 %v633_v16  ;;  %v450_v15 = vld [vmem:[#allocation7 + $0x5a8] sm:$0xff] }
  0x8e   :  { %v565_v19 = vld [vmem:[#allocation7 + $0x940] sm:$0xff]  ;;  %869 = vmatpush.msrb.mxu2 %v697_v17  ;;  %893 = vmatpush.msrb.mxu3 %v310_v26  ;;  %v514_v16 = vld [vmem:[#allocation7 + $0x7a8] sm:$0xff] }
  0x8f   :  { %v629_v20 = vld [vmem:[#allocation7 + $0xb40] sm:$0xff]  ;;  %824 = vmatpush.msrb.mxu0 %v565_v19  ;;  %v582_v17 = vld [vmem:[#allocation7 + $0x9c8] sm:$0xff] }
  0x90   :  { %v693_v21 = vld [vmem:[#allocation7 + $0xd40] sm:$0xff]  ;;  %847 = vmatpush.msrb.mxu1 %v629_v20  ;;  %894 = vmatpush.msrb.mxu3 %v306_v30  ;;  %v382_v19 = vld [vmem:[#allocation7 + $0x388] sm:$0xff] }
  0x91   :  { %v561_v23 = vld [vmem:[#allocation7 + $0x920] sm:$0xff]  ;;  %870 = vmatpush.msrb.mxu2 %v693_v21  ;;  %v446_v20 = vld [vmem:[#allocation7 + $0x588] sm:$0xff] }
  0x92   :  { %v625_v24 = vld [vmem:[#allocation7 + $0xb20] sm:$0xff]  ;;  %825 = vmatpush.msrb.mxu0 %v561_v23  ;;  %895 = vmatpush.msrb.mxu3 %v302_v34  ;;  %v510_v21 = vld [vmem:[#allocation7 + $0x788] sm:$0xff] }
  0x93   :  { %v689_v25 = vld [vmem:[#allocation7 + $0xd20] sm:$0xff]  ;;  %848 = vmatpush.msrb.mxu1 %v625_v24  ;;  %v578_v22 = vld [vmem:[#allocation7 + $0x9a8] sm:$0xff] }
  0x94   :  { %v557_v27 = vld [vmem:[#allocation7 + $0x900] sm:$0xff]  ;;  %871 = vmatpush.msrb.mxu2 %v689_v25  ;;  %896 = vmatpush.msrb.mxu3 %v298_v38  ;;  %v442_v24 = vld [vmem:[#allocation7 + $0x568] sm:$0xff] }
  0x95   :  { %v621_v28 = vld [vmem:[#allocation7 + $0xb00] sm:$0xff]  ;;  %826 = vmatpush.msrb.mxu0 %v557_v27  ;;  %v378_v25 = vld [vmem:[#allocation7 + $0x368] sm:$0xff] }
  0x96   :  { %v685_v29 = vld [vmem:[#allocation7 + $0xd00] sm:$0xff]  ;;  %849 = vmatpush.msrb.mxu1 %v621_v28  ;;  %897 = vmatpush.msrb.mxu3 %v294_v42  ;;  %v506_v26 = vld [vmem:[#allocation7 + $0x768] sm:$0xff] }
  0x97   :  { %v553_v31 = vld [vmem:[#allocation7 + $0x8e0] sm:$0xff]  ;;  %872 = vmatpush.msrb.mxu2 %v685_v29  ;;  %v574_v27 = vld [vmem:[#allocation7 + $0x988] sm:$0xff] }
  0x98   :  { %v617_v32 = vld [vmem:[#allocation7 + $0xae0] sm:$0xff]  ;;  %827 = vmatpush.msrb.mxu0 %v553_v31  ;;  %898 = vmatpush.msrb.mxu3 %v290_v47  ;;  %v4423_v28 = vld [vmem:[#allocation2 + $0x28] sm:$0xff] }
  0x99   :  { %v681_v33 = vld [vmem:[#allocation7 + $0xce0] sm:$0xff]  ;;  %850 = vmatpush.msrb.mxu1 %v617_v32  ;;  %v374_v29 = vld [vmem:[#allocation7 + $0x348] sm:$0xff] }
  0x9a   :  { %v549_v35 = vld [vmem:[#allocation7 + $0x8c0] sm:$0xff]  ;;  %873 = vmatpush.msrb.mxu2 %v681_v33  ;;  %899 = vmatpush.msrb.mxu3 %v286_v52  ;;  %v438_v30 = vld [vmem:[#allocation7 + $0x548] sm:$0xff] }
  0x9b   :  { %v613_v36 = vld [vmem:[#allocation7 + $0xac0] sm:$0xff]  ;;  %828 = vmatpush.msrb.mxu0 %v549_v35  ;;  %v502_v31 = vld [vmem:[#allocation7 + $0x748] sm:$0xff] }
  0x9c   :  { %v677_v37 = vld [vmem:[#allocation7 + $0xcc0] sm:$0xff]  ;;  %851 = vmatpush.msrb.mxu1 %v613_v36  ;;  %900 = vmatpush.msrb.mxu3 %v282_v57  ;;  %v570_v32 = vld [vmem:[#allocation7 + $0x968] sm:$0xff] }
  0x9d   :  { %v545_v39 = vld [vmem:[#allocation7 + $0x8a0] sm:$0xff]  ;;  %874 = vmatpush.msrb.mxu2 %v677_v37  ;;  %v370_v33 = vld [vmem:[#allocation7 + $0x328] sm:$0xff] }
  0x9e   :  { %v609_v40 = vld [vmem:[#allocation7 + $0xaa0] sm:$0xff]  ;;  %829 = vmatpush.msrb.mxu0 %v545_v39  ;;  %901 = vmatpush.msrb.mxu3 %v278_v61  ;;  %v434_v34 = vld [vmem:[#allocation7 + $0x528] sm:$0xff] }
  0x9f   :  { %v673_v41 = vld [vmem:[#allocation7 + $0xca0] sm:$0xff]  ;;  %852 = vmatpush.msrb.mxu1 %v609_v40  ;;  %v498_v35 = vld [vmem:[#allocation7 + $0x728] sm:$0xff] }
  0xa0   :  { %v541_v44 = vld [vmem:[#allocation7 + $0x880] sm:$0xff]  ;;  %875 = vmatpush.msrb.mxu2 %v673_v41  ;;  %902 = vmatpush.msrb.mxu3 %v274_v2  ;;  %v566_v36 = vld [vmem:[#allocation7 + $0x948] sm:$0xff] }
  0xa1   :  { %v605_v45 = vld [vmem:[#allocation7 + $0xa80] sm:$0xff]  ;;  %830 = vmatpush.msrb.mxu0 %v541_v44  ;;  %v366_v37 = vld [vmem:[#allocation7 + $0x308] sm:$0xff] }
  0xa2   :  { %v669_v46 = vld [vmem:[#allocation7 + $0xc80] sm:$0xff]  ;;  %853 = vmatpush.msrb.mxu1 %v605_v45  ;;  %903 = vmatpush.msrb.mxu3 %v270_v8  ;;  %v430_v38 = vld [vmem:[#allocation7 + $0x508] sm:$0xff] }
  0xa3   :  { %v4399_v48 = vld [vmem:[#allocation2] sm:$0xff]  ;;  %876 = vmatpush.msrb.mxu2 %v669_v46  ;;  %v494_v39 = vld [vmem:[#allocation7 + $0x708] sm:$0xff]  ;;  %v4427_v46 = vld [vmem:[#allocation2 + $0x50] sm:$0xff] }
  0xa4   :  { %v537_v49 = vld [vmem:[#allocation7 + $0x860] sm:$0xff]  ;;  %743 = vmatmul.f32.vlgmr.msra.gmra.mxu0 %v4399_v48  ;;  %980 = vmatpush.msra.mxu3 %v586_v13  ;;  %v562_v40 = vld [vmem:[#allocation7 + $0x928] sm:$0xff] }
  0xa5   :  { %v601_v50 = vld [vmem:[#allocation7 + $0xa60] sm:$0xff]  ;;  %831 = vmatpush.msrb.mxu0 %v537_v49  ;;  %v362_v41 = vld [vmem:[#allocation7 + $0x2e8] sm:$0xff]  ;;  %815 = vmatmul.f32.gmra.mxu3 %v4427_v46 }
  0xa6   :  { %v665_v51 = vld [vmem:[#allocation7 + $0xc60] sm:$0xff]  ;;  %854 = vmatpush.msrb.mxu1 %v601_v50  ;;  %981 = vmatpush.msra.mxu3 %v582_v17  ;;  %v426_v42 = vld [vmem:[#allocation7 + $0x4e8] sm:$0xff] }
  0xa7   :  { %v533_v54 = vld [vmem:[#allocation7 + $0x840] sm:$0xff]  ;;  %877 = vmatpush.msrb.mxu2 %v665_v51  ;;  %v490_v44 = vld [vmem:[#allocation7 + $0x6e8] sm:$0xff] }
  0xa8   :  { %v597_v55 = vld [vmem:[#allocation7 + $0xa40] sm:$0xff]  ;;  %832 = vmatpush.msrb.mxu0 %v533_v54  ;;  %982 = vmatpush.msra.mxu3 %v578_v22  ;;  %v558_v45 = vld [vmem:[#allocation7 + $0x908] sm:$0xff]  ;;  %v331_v22 = vld [vmem:[#allocation7 + $0x1f0] sm:$0xff] }
  0xa9   :  { %v661_v56 = vld [vmem:[#allocation7 + $0xc40] sm:$0xff]  ;;  %855 = vmatpush.msrb.mxu1 %v597_v55  ;;  %v358_v47 = vld [vmem:[#allocation7 + $0x2c8] sm:$0xff] }
  0xaa   :  { %v529_v58 = vld [vmem:[#allocation7 + $0x820] sm:$0xff]  ;;  %878 = vmatpush.msrb.mxu2 %v661_v56  ;;  %983 = vmatpush.msra.mxu3 %v574_v27  ;;  %v422_v49 = vld [vmem:[#allocation7 + $0x4c8] sm:$0xff] }
  0xab   :  { %v593_v59 = vld [vmem:[#allocation7 + $0xa20] sm:$0xff]  ;;  %833 = vmatpush.msrb.mxu0 %v529_v58  ;;  %v486_v50 = vld [vmem:[#allocation7 + $0x6c8] sm:$0xff] }
  0xac   :  { %v657_v60 = vld [vmem:[#allocation7 + $0xc20] sm:$0xff]  ;;  %856 = vmatpush.msrb.mxu1 %v593_v59  ;;  %746 = vmatmul.f32.gmra.mxu0 %v4409_v3  ;;  %v554_v51 = vld [vmem:[#allocation7 + $0x8e8] sm:$0xff] }
  0xad   :  { %v525_v63 = vld [vmem:[#allocation7 + $0x800] sm:$0xff]  ;;  %879 = vmatpush.msrb.mxu2 %v657_v60  ;;  %984 = vmatpush.msra.mxu3 %v570_v32  ;;  %v354_v52 = vld [vmem:[#allocation7 + $0x2a8] sm:$0xff] }
  0xae   :  { %v589_v0 = vld [vmem:[#allocation7 + $0xa00] sm:$0xff]  ;;  %834 = vmatpush.msrb.mxu0 %v525_v63  ;;  %v418_v54 = vld [vmem:[#allocation7 + $0x4a8] sm:$0xff]  ;;  %904 = vmatmul.f32.vlgmr.msrb.gmra.mxu3 %v4399_v48 }
  0xaf   :  { %v653_v1 = vld [vmem:[#allocation7 + $0xc00] sm:$0xff]  ;;  %857 = vmatpush.msrb.mxu1 %v589_v0  ;;  %985 = vmatpush.msra.mxu3 %v566_v36  ;;  %v482_v55 = vld [vmem:[#allocation7 + $0x6a8] sm:$0xff] }
  0xb0   :  { %880 = vmatpush.msrb.mxu2 %v653_v1  ;;  %v4415_v9 = vld [vmem:[#allocation2 + $0x40] sm:$0xff]  ;;  %911 = vmatpush.msra.mxu0 %v394_v5  ;;  %v550_v56 = vld [vmem:[#allocation7 + $0x8c8] sm:$0xff] }
  0xb1   :  { %934 = vmatpush.msra.mxu1 %v458_v6  ;;  %881 = vmatmul.f32.vlgmr.msrb.gmra.mxu2 %v4418_v18  ;;  %v4421_v23 = vld [vmem:[#allocation2 + $0x20] sm:$0xff]  ;;  %v350_v57 = vld [vmem:[#allocation7 + $0x288] sm:$0xff] }
  0xb2   :  { %957 = vmatpush.msra.mxu2 %v522_v7  ;;  %769 = vmatmul.f32.gmra.mxu1 %v4415_v9  ;;  %v414_v58 = vld [vmem:[#allocation7 + $0x488] sm:$0xff] }
  0xb3   :  { %912 = vmatpush.msra.mxu0 %v390_v10  ;;  %935 = vmatpush.msra.mxu1 %v454_v11  ;;  %v478_v59 = vld [vmem:[#allocation7 + $0x688] sm:$0xff] }
  0xb4   :  { %958 = vmatpush.msra.mxu2 %v518_v12  ;;  %835 = vmatmul.f32.vlgmr.msrb.gmra.mxu0 %v4421_v23  ;;  %v546_v60 = vld [vmem:[#allocation7 + $0x8a8] sm:$0xff] }
  0xb5   :  { %913 = vmatpush.msra.mxu0 %v386_v14  ;;  %936 = vmatpush.msra.mxu1 %v450_v15  ;;  %v346_v61 = vld [vmem:[#allocation7 + $0x268] sm:$0xff] }
  0xb6   :  { %959 = vmatpush.msra.mxu2 %v514_v16  ;;  %986 = vmatpush.msra.mxu3 %v562_v40  ;;  %v410_v63 = vld [vmem:[#allocation7 + $0x468] sm:$0xff] }
  0xb7   :  { %914 = vmatpush.msra.mxu0 %v382_v19  ;;  %937 = vmatpush.msra.mxu1 %v446_v20  ;;  %v474_v0 = vld [vmem:[#allocation7 + $0x668] sm:$0xff]  ;;  %v4433_v19 = vld [vmem:[#allocation2 + $0x58] sm:$0xff] }
  0xb8   :  { %960 = vmatpush.msra.mxu2 %v510_v21  ;;  %987 = vmatpush.msra.mxu3 %v558_v45  ;;  %v542_v1 = vld [vmem:[#allocation7 + $0x888] sm:$0xff] }
  0xb9   :  { %938 = vmatpush.msra.mxu1 %v442_v24  ;;  %915 = vmatpush.msra.mxu0 %v378_v25  ;;  %v342_v2 = vld [vmem:[#allocation7 + $0x248] sm:$0xff]  ;;  %v4437_v25 = vld [vmem:[#allocation2 + $0x60] sm:$0xff] }
  0xba   :  { %961 = vmatpush.msra.mxu2 %v506_v26  ;;  %858 = vmatmul.f32.vlgmr.msrb.gmra.mxu1 %v4423_v28  ;;  %v406_v5 = vld [vmem:[#allocation7 + $0x448] sm:$0xff] }
  0xbb   :  { %916 = vmatpush.msra.mxu0 %v374_v29  ;;  %939 = vmatpush.msra.mxu1 %v438_v30  ;;  %v470_v6 = vld [vmem:[#allocation7 + $0x648] sm:$0xff]  ;;  %v327_v29 = vld [vmem:[#allocation7 + $0x1d0] sm:$0xff] }
  0xbc   :  { %962 = vmatpush.msra.mxu2 %v502_v31  ;;  %988 = vmatpush.msra.mxu3 %v554_v51  ;;  %v538_v7 = vld [vmem:[#allocation7 + $0x868] sm:$0xff]  ;;  %v395_v30 = vld [vmem:[#allocation7 + $0x3f0] sm:$0xff] }
  0xbd   :  { %917 = vmatpush.msra.mxu0 %v370_v33  ;;  %940 = vmatpush.msra.mxu1 %v434_v34  ;;  %v338_v8 = vld [vmem:[#allocation7 + $0x228] sm:$0xff]  ;;  %v323_v33 = vld [vmem:[#allocation7 + $0x1b0] sm:$0xff] }
  0xbe   :  { %963 = vmatpush.msra.mxu2 %v498_v35  ;;  %989 = vmatpush.msra.mxu3 %v550_v56  ;;  %v402_v10 = vld [vmem:[#allocation7 + $0x428] sm:$0xff]  ;;  %v391_v34 = vld [vmem:[#allocation7 + $0x3d0] sm:$0xff] }
  0xbf   :  { %918 = vmatpush.msra.mxu0 %v366_v37  ;;  %941 = vmatpush.msra.mxu1 %v430_v38  ;;  %v466_v11 = vld [vmem:[#allocation7 + $0x628] sm:$0xff]  ;;  %v319_v37 = vld [vmem:[#allocation7 + $0x190] sm:$0xff] }
  0xc0   :  { %964 = vmatpush.msra.mxu2 %v494_v39  ;;  %990 = vmatpush.msra.mxu3 %v546_v60  ;;  %v534_v12 = vld [vmem:[#allocation7 + $0x848] sm:$0xff]  ;;  %v387_v38 = vld [vmem:[#allocation7 + $0x3b0] sm:$0xff] }
  0xc1   :  { %919 = vmatpush.msra.mxu0 %v362_v41  ;;  %942 = vmatpush.msra.mxu1 %v426_v42  ;;  %v4431_v13 = vld [vmem:[#allocation2 + $0x68] sm:$0xff]  ;;  %v315_v41 = vld [vmem:[#allocation7 + $0x170] sm:$0xff] }
  0xc2   :  { %965 = vmatpush.msra.mxu2 %v490_v44  ;;  %991 = vmatpush.msra.mxu3 %v542_v1  ;;  %v334_v14 = vld [vmem:[#allocation7 + $0x208] sm:$0xff]  ;;  %v383_v42 = vld [vmem:[#allocation7 + $0x390] sm:$0xff] }
  0xc3   :  { %920 = vmatpush.msra.mxu0 %v358_v47  ;;  %943 = vmatpush.msra.mxu1 %v422_v49  ;;  %v398_v15 = vld [vmem:[#allocation7 + $0x408] sm:$0xff]  ;;  %v311_v47 = vld [vmem:[#allocation7 + $0x150] sm:$0xff] }
  0xc4   :  { %966 = vmatpush.msra.mxu2 %v486_v50  ;;  %992 = vmatpush.msra.mxu3 %v538_v7  ;;  %v462_v16 = vld [vmem:[#allocation7 + $0x608] sm:$0xff]  ;;  %v379_v49 = vld [vmem:[#allocation7 + $0x370] sm:$0xff] }
  0xc5   :  { %921 = vmatpush.msra.mxu0 %v354_v52  ;;  %944 = vmatpush.msra.mxu1 %v418_v54  ;;  %v530_v17 = vld [vmem:[#allocation7 + $0x828] sm:$0xff]  ;;  %v307_v52 = vld [vmem:[#allocation7 + $0x130] sm:$0xff] }
  0xc6   :  { %967 = vmatpush.msra.mxu2 %v482_v55  ;;  %993 = vmatpush.msra.mxu3 %v534_v12  ;;  %v650_v20 = vld [vmem:[#allocation7 + $0xbe8] sm:$0xff]  ;;  %v375_v54 = vld [vmem:[#allocation7 + $0x350] sm:$0xff] }
  0xc7   :  { %922 = vmatpush.msra.mxu0 %v350_v57  ;;  %945 = vmatpush.msra.mxu1 %v414_v58  ;;  %v714_v21 = vld [vmem:[#allocation7 + $0xde8] sm:$0xff]  ;;  %v303_v57 = vld [vmem:[#allocation7 + $0x110] sm:$0xff] }
  0xc8   :  { %968 = vmatpush.msra.mxu2 %v478_v59  ;;  %v526_v24 = vld [vmem:[#allocation7 + $0x808] sm:$0xff]  ;;  %994 = vmatpush.msra.mxu3 %v530_v17  ;;  %v371_v58 = vld [vmem:[#allocation7 + $0x330] sm:$0xff] }
  0xc9   :  { %923 = vmatpush.msra.mxu0 %v346_v61  ;;  %946 = vmatpush.msra.mxu1 %v410_v63  ;;  %v646_v26 = vld [vmem:[#allocation7 + $0xbc8] sm:$0xff]  ;;  %v299_v61 = vld [vmem:[#allocation7 + $0xf0] sm:$0xff] }
  0xca   :  { %969 = vmatpush.msra.mxu2 %v474_v0  ;;  %838 = vmatmul.f32.gmra.mxu0 %v4433_v19  ;;  %v710_v27 = vld [vmem:[#allocation7 + $0xdc8] sm:$0xff]  ;;  %v367_v63 = vld [vmem:[#allocation7 + $0x310] sm:$0xff] }
  0xcb   :  { %924 = vmatpush.msra.mxu0 %v342_v2  ;;  %947 = vmatpush.msra.mxu1 %v406_v5  ;;  %v642_v31 = vld [vmem:[#allocation7 + $0xba8] sm:$0xff]  ;;  %v363_v2 = vld [vmem:[#allocation7 + $0x2f0] sm:$0xff] }
  0xcc   :  { %970 = vmatpush.msra.mxu2 %v470_v6  ;;  %995 = vmatpush.msra.mxu3 %v526_v24  ;;  %v706_v32 = vld [vmem:[#allocation7 + $0xda8] sm:$0xff]  ;;  %v291_v7 = vld [vmem:[#allocation7 + $0xb0] sm:$0xff] }
  0xcd   :  { %925 = vmatpush.msra.mxu0 %v338_v8  ;;  %948 = vmatpush.msra.mxu1 %v402_v10  ;;  %v638_v35 = vld [vmem:[#allocation7 + $0xb88] sm:$0xff]  ;;  %v359_v8 = vld [vmem:[#allocation7 + $0x2d0] sm:$0xff] }
  0xce   :  { %971 = vmatpush.msra.mxu2 %v466_v11  ;;  %861 = vmatmul.f32.gmra.mxu1 %v4437_v25  ;;  %v702_v36 = vld [vmem:[#allocation7 + $0xd88] sm:$0xff]  ;;  %v287_v12 = vld [vmem:[#allocation7 + $0x90] sm:$0xff] }
  0xcf   :  { %884 = vmatmul.f32.gmra.mxu2 %v4431_v13  ;;  %926 = vmatpush.msra.mxu0 %v334_v14  ;;  %v634_v39 = vld [vmem:[#allocation7 + $0xb68] sm:$0xff]  ;;  %v355_v14 = vld [vmem:[#allocation7 + $0x2b0] sm:$0xff] }
  0xd0   :  { %949 = vmatpush.msra.mxu1 %v398_v15  ;;  %972 = vmatpush.msra.mxu2 %v462_v16  ;;  %v698_v40 = vld [vmem:[#allocation7 + $0xd68] sm:$0xff]  ;;  %v283_v17 = vld [vmem:[#allocation7 + $0x70] sm:$0xff] }
  0xd1   :  { %1003 = vmatpush.msrb.mxu0 %v650_v20  ;;  %907 = vmatmul.f32.gmra.mxu3 %v4409_v3  ;;  %v630_v44 = vld [vmem:[#allocation7 + $0xb48] sm:$0xff]  ;;  %v351_v20 = vld [vmem:[#allocation7 + $0x290] sm:$0xff] }
  0xd2   :  { %1026 = vmatpush.msrb.mxu1 %v714_v21  ;;  %1049 = vmatpush.msrb.mxu2 %v331_v22  ;;  %v694_v45 = vld [vmem:[#allocation7 + $0xd48] sm:$0xff]  ;;  %v279_v24 = vld [vmem:[#allocation7 + $0x50] sm:$0xff] }
  0xd3   :  { %1004 = vmatpush.msrb.mxu0 %v646_v26  ;;  %1072 = vmatpush.msrb.mxu3 %v395_v30  ;;  %v626_v50 = vld [vmem:[#allocation7 + $0xb28] sm:$0xff]  ;;  %v347_v26 = vld [vmem:[#allocation7 + $0x270] sm:$0xff] }
  0xd4   :  { %1027 = vmatpush.msrb.mxu1 %v710_v27  ;;  %1050 = vmatpush.msrb.mxu2 %v327_v29  ;;  %v690_v51 = vld [vmem:[#allocation7 + $0xd28] sm:$0xff]  ;;  %v275_v30 = vld [vmem:[#allocation7 + $0x30] sm:$0xff] }
  0xd5   :  { %1005 = vmatpush.msrb.mxu0 %v642_v31  ;;  %1073 = vmatpush.msrb.mxu3 %v391_v34  ;;  %v622_v55 = vld [vmem:[#allocation7 + $0xb08] sm:$0xff]  ;;  %v343_v31 = vld [vmem:[#allocation7 + $0x250] sm:$0xff] }
  0xd6   :  { %1028 = vmatpush.msrb.mxu1 %v706_v32  ;;  %1051 = vmatpush.msrb.mxu2 %v323_v33  ;;  %v686_v56 = vld [vmem:[#allocation7 + $0xd08] sm:$0xff]  ;;  %v271_v34 = vld [vmem:[#allocation7 + $0x10] sm:$0xff] }
  0xd7   :  { %1006 = vmatpush.msrb.mxu0 %v638_v35  ;;  %1074 = vmatpush.msrb.mxu3 %v387_v38  ;;  %v618_v59 = vld [vmem:[#allocation7 + $0xae8] sm:$0xff]  ;;  %v339_v35 = vld [vmem:[#allocation7 + $0x230] sm:$0xff] }
  0xd8   :  { %1029 = vmatpush.msrb.mxu1 %v702_v36  ;;  %1052 = vmatpush.msrb.mxu2 %v319_v37  ;;  %v682_v60 = vld [vmem:[#allocation7 + $0xce8] sm:$0xff]  ;;  %v523_v36 = vld [vmem:[#allocation7 + $0x7f0] sm:$0xff] }
  0xd9   :  { %973 = vmatmul.f32.vlgmr.msra.gmra.mxu2 %v4411_v4  ;;  %1007 = vmatpush.msrb.mxu0 %v634_v39  ;;  %v614_v0 = vld [vmem:[#allocation7 + $0xac8] sm:$0xff]  ;;  %v587_v37 = vld [vmem:[#allocation7 + $0x9f0] sm:$0xff] }
  0xda   :  { %1030 = vmatpush.msrb.mxu1 %v698_v40  ;;  %1053 = vmatpush.msrb.mxu2 %v315_v41  ;;  %v678_v1 = vld [vmem:[#allocation7 + $0xcc8] sm:$0xff]  ;;  %v335_v38 = vld [vmem:[#allocation7 + $0x210] sm:$0xff] }
  0xdb   :  { %1075 = vmatpush.msrb.mxu3 %v383_v42  ;;  %927 = vmatmul.f32.vlgmr.msra.gmra.mxu0 %v4403_v53  ;;  %v610_v5 = vld [vmem:[#allocation7 + $0xaa8] sm:$0xff]  ;;  %v455_v39 = vld [vmem:[#allocation7 + $0x5d0] sm:$0xff] }
  0xdc   :  { %996 = vmatmul.f32.vlgmr.msra.gmra.mxu3 %v4421_v23  ;;  %1008 = vmatpush.msrb.mxu0 %v630_v44  ;;  %v674_v6 = vld [vmem:[#allocation7 + $0xca8] sm:$0xff]  ;;  %v519_v40 = vld [vmem:[#allocation7 + $0x7d0] sm:$0xff] }
  0xdd   :  { %1031 = vmatpush.msrb.mxu1 %v694_v45  ;;  %1054 = vmatpush.msrb.mxu2 %v311_v47  ;;  %v606_v10 = vld [vmem:[#allocation7 + $0xa88] sm:$0xff]  ;;  %v583_v41 = vld [vmem:[#allocation7 + $0x9d0] sm:$0xff] }
  0xde   :  { %1076 = vmatpush.msrb.mxu3 %v379_v49  ;;  %950 = vmatmul.f32.vlgmr.msra.gmra.mxu1 %v4397_v43  ;;  %v295_v43 = vld [vmem:[#allocation7 + $0xd0] sm:$0xff]  ;;  %v670_v11 = vld [vmem:[#allocation7 + $0xc88] sm:$0xff] }
  0xdf   :  { %1009 = vmatpush.msrb.mxu0 %v626_v50  ;;  %1032 = vmatpush.msrb.mxu1 %v690_v51  ;;  %v666_v15 = vld [vmem:[#allocation7 + $0xc68] sm:$0xff]  ;;  %v651_v42 = vld [vmem:[#allocation7 + $0xbf0] sm:$0xff] }
  0xe0   :  { %1055 = vmatpush.msrb.mxu2 %v307_v52  ;;  %1077 = vmatpush.msrb.mxu3 %v375_v54  ;;  %v602_v16 = vld [vmem:[#allocation7 + $0xa68] sm:$0xff]  ;;  %v451_v44 = vld [vmem:[#allocation7 + $0x5b0] sm:$0xff] }
  0xe1   :  { %1010 = vmatpush.msrb.mxu0 %v622_v55  ;;  %1033 = vmatpush.msrb.mxu1 %v686_v56  ;;  %v598_v21 = vld [vmem:[#allocation7 + $0xa48] sm:$0xff]  ;;  %v515_v45 = vld [vmem:[#allocation7 + $0x7b0] sm:$0xff] }
  0xe2   :  { %1056 = vmatpush.msrb.mxu2 %v303_v57  ;;  %1078 = vmatpush.msrb.mxu3 %v371_v58  ;;  %v662_v22 = vld [vmem:[#allocation7 + $0xc48] sm:$0xff]  ;;  %v579_v47 = vld [vmem:[#allocation7 + $0x9b0] sm:$0xff] }
  0xe3   :  { %1011 = vmatpush.msrb.mxu0 %v618_v59  ;;  %1034 = vmatpush.msrb.mxu1 %v682_v60  ;;  %v594_v27 = vld [vmem:[#allocation7 + $0xa28] sm:$0xff]  ;;  %v647_v49 = vld [vmem:[#allocation7 + $0xbd0] sm:$0xff] }
  0xe4   :  { %1057 = vmatpush.msrb.mxu2 %v299_v61  ;;  %1079 = vmatpush.msrb.mxu3 %v367_v63  ;;  %v658_v29 = vld [vmem:[#allocation7 + $0xc28] sm:$0xff]  ;;  %v447_v50 = vld [vmem:[#allocation7 + $0x590] sm:$0xff] }
  0xe5   :  { %1012 = vmatpush.msrb.mxu0 %v614_v0  ;;  %1035 = vmatpush.msrb.mxu1 %v678_v1  ;;  %v590_v32 = vld [vmem:[#allocation7 + $0xa08] sm:$0xff]  ;;  %v511_v51 = vld [vmem:[#allocation7 + $0x790] sm:$0xff] }
  0xe6   :  { %1058 = vmatpush.msrb.mxu2 %v295_v43  ;;  %1080 = vmatpush.msrb.mxu3 %v363_v2  ;;  %v654_v33 = vld [vmem:[#allocation7 + $0xc08] sm:$0xff]  ;;  %v575_v52 = vld [vmem:[#allocation7 + $0x990] sm:$0xff] }
  0xe7   :  { %1013 = vmatpush.msrb.mxu0 %v610_v5  ;;  %1036 = vmatpush.msrb.mxu1 %v674_v6  ;;  %v643_v54 = vld [vmem:[#allocation7 + $0xbb0] sm:$0xff] }
  0xe8   :  { %1059 = vmatpush.msrb.mxu2 %v291_v7  ;;  %1081 = vmatpush.msrb.mxu3 %v359_v8  ;;  %v507_v55 = vld [vmem:[#allocation7 + $0x770] sm:$0xff] }
  0xe9   :  { %1014 = vmatpush.msrb.mxu0 %v606_v10  ;;  %1037 = vmatpush.msrb.mxu1 %v670_v11  ;;  %v571_v56 = vld [vmem:[#allocation7 + $0x970] sm:$0xff] }
  0xea   :  { %1060 = vmatpush.msrb.mxu2 %v287_v12  ;;  %1082 = vmatpush.msrb.mxu3 %v355_v14  ;;  %v639_v57 = vld [vmem:[#allocation7 + $0xb90] sm:$0xff] }
  0xeb   :  { %930 = vmatmul.f32.gmra.mxu0 %v4415_v9  ;;  %1038 = vmatpush.msrb.mxu1 %v666_v15  ;;  %v439_v58 = vld [vmem:[#allocation7 + $0x550] sm:$0xff] }
  0xec   :  { %1015 = vmatpush.msrb.mxu0 %v602_v16  ;;  %1061 = vmatpush.msrb.mxu2 %v283_v17  ;;  %v503_v59 = vld [vmem:[#allocation7 + $0x750] sm:$0xff] }
  0xed   :  { %1083 = vmatpush.msrb.mxu3 %v351_v20  ;;  %953 = vmatmul.f32.gmra.mxu1 %v4406_v62  ;;  %v459_v62 = vld [vmem:[#allocation7 + $0x5f0] sm:$0xff] }
  0xee   :  { %1016 = vmatpush.msrb.mxu0 %v598_v21  ;;  %1039 = vmatpush.msrb.mxu1 %v662_v22  ;;  %v567_v60 = vld [vmem:[#allocation7 + $0x950] sm:$0xff] }
  0xef   :  { %1062 = vmatpush.msrb.mxu2 %v279_v24  ;;  %1084 = vmatpush.msrb.mxu3 %v347_v26  ;;  %v635_v61 = vld [vmem:[#allocation7 + $0xb70] sm:$0xff] }
  0xf0   :  { %1017 = vmatpush.msrb.mxu0 %v594_v27  ;;  %1040 = vmatpush.msrb.mxu1 %v658_v29  ;;  %v435_v63 = vld [vmem:[#allocation7 + $0x530] sm:$0xff] }
  0xf1   :  { %1063 = vmatpush.msrb.mxu2 %v275_v30  ;;  %1085 = vmatpush.msrb.mxu3 %v343_v31  ;;  %v499_v0 = vld [vmem:[#allocation7 + $0x730] sm:$0xff] }
  0xf2   :  { %976 = vmatmul.f32.gmra.mxu2 %v4427_v46  ;;  %1018 = vmatpush.msrb.mxu0 %v590_v32  ;;  %v563_v1 = vld [vmem:[#allocation7 + $0x930] sm:$0xff] }
  0xf3   :  { %1041 = vmatpush.msrb.mxu1 %v654_v33  ;;  %1064 = vmatpush.msrb.mxu2 %v271_v34  ;;  %v631_v43 = vld [vmem:[#allocation7 + $0xb50] sm:$0xff] }
  0xf4   :  { %1086 = vmatpush.msrb.mxu3 %v339_v35  ;;  %1019 = vmatmul.f32.vlgmr.msrb.gmra.mxu0 %v4423_v28  ;;  %v431_v2 = vld [vmem:[#allocation7 + $0x510] sm:$0xff] }
  0xf5   :  { %999 = vmatmul.f32.gmra.mxu3 %v4433_v19  ;;  %1095 = vmatpush.msra.mxu0 %v459_v62  ;;  %v495_v5 = vld [vmem:[#allocation7 + $0x710] sm:$0xff] }
  0xf6   :  { %1118 = vmatpush.msra.mxu1 %v523_v36  ;;  %1141 = vmatpush.msra.mxu2 %v587_v37  ;;  %v559_v6 = vld [vmem:[#allocation7 + $0x910] sm:$0xff] }
  0xf7   :  { %1087 = vmatpush.msrb.mxu3 %v335_v38  ;;  %1042 = vmatmul.f32.vlgmr.msrb.gmra.mxu1 %v4418_v18  ;;  %v443_v18 = vld [vmem:[#allocation7 + $0x570] sm:$0xff] }
  0xf8   :  { %1096 = vmatpush.msra.mxu0 %v455_v39  ;;  %1119 = vmatpush.msra.mxu1 %v519_v40  ;;  %v627_v7 = vld [vmem:[#allocation7 + $0xb30] sm:$0xff] }
  0xf9   :  { %1142 = vmatpush.msra.mxu2 %v583_v41  ;;  %1164 = vmatpush.msra.mxu3 %v651_v42  ;;  %v427_v8 = vld [vmem:[#allocation7 + $0x4f0] sm:$0xff] }
  0xfa   :  { %1097 = vmatpush.msra.mxu0 %v451_v44  ;;  %1120 = vmatpush.msra.mxu1 %v515_v45  ;;  %v491_v10 = vld [vmem:[#allocation7 + $0x6f0] sm:$0xff] }
  0xfb   :  { %1143 = vmatpush.msra.mxu2 %v579_v47  ;;  %1165 = vmatpush.msra.mxu3 %v647_v49  ;;  %v555_v11 = vld [vmem:[#allocation7 + $0x8f0] sm:$0xff]  ;;  %v332_v49 = vld [vmem:[#allocation7 + $0x1f8] sm:$0xff] }
  0xfc   :  { %1098 = vmatpush.msra.mxu0 %v447_v50  ;;  %1121 = vmatpush.msra.mxu1 %v511_v51  ;;  %v623_v12 = vld [vmem:[#allocation7 + $0xb10] sm:$0xff]  ;;  %v396_v50 = vld [vmem:[#allocation7 + $0x3f8] sm:$0xff] }
  0xfd   :  { %1144 = vmatpush.msra.mxu2 %v575_v52  ;;  %1166 = vmatpush.msra.mxu3 %v643_v54  ;;  %v423_v14 = vld [vmem:[#allocation7 + $0x4d0] sm:$0xff]  ;;  %v328_v52 = vld [vmem:[#allocation7 + $0x1d8] sm:$0xff] }
  0xfe   :  { %1022 = vmatmul.f32.gmra.mxu0 %v4437_v25  ;;  %1122 = vmatpush.msra.mxu1 %v507_v55  ;;  %v487_v15 = vld [vmem:[#allocation7 + $0x6d0] sm:$0xff]  ;;  %v392_v54 = vld [vmem:[#allocation7 + $0x3d8] sm:$0xff] }
  0xff   :  { %1099 = vmatpush.msra.mxu0 %v443_v18  ;;  %1145 = vmatpush.msra.mxu2 %v571_v56  ;;  %v551_v16 = vld [vmem:[#allocation7 + $0x8d0] sm:$0xff]  ;;  %v460_v55 = vld [vmem:[#allocation7 + $0x5f8] sm:$0xff] }
 0x100   :  { %1167 = vmatpush.msra.mxu3 %v639_v57  ;;  %1045 = vmatmul.f32.gmra.mxu1 %v4431_v13  ;;  %v619_v17 = vld [vmem:[#allocation7 + $0xaf0] sm:$0xff]  ;;  %v324_v56 = vld [vmem:[#allocation7 + $0x1b8] sm:$0xff] }
 0x101   :  { %1100 = vmatpush.msra.mxu0 %v439_v58  ;;  %1123 = vmatpush.msra.mxu1 %v503_v59  ;;  %v419_v20 = vld [vmem:[#allocation7 + $0x4b0] sm:$0xff]  ;;  %v388_v57 = vld [vmem:[#allocation7 + $0x3b8] sm:$0xff] }
 0x102   :  { %1146 = vmatpush.msra.mxu2 %v567_v60  ;;  %1168 = vmatpush.msra.mxu3 %v635_v61  ;;  %v483_v21 = vld [vmem:[#allocation7 + $0x6b0] sm:$0xff]  ;;  %v456_v58 = vld [vmem:[#allocation7 + $0x5d8] sm:$0xff] }
 0x103   :  { %1101 = vmatpush.msra.mxu0 %v435_v63  ;;  %1124 = vmatpush.msra.mxu1 %v499_v0  ;;  %v547_v22 = vld [vmem:[#allocation7 + $0x8b0] sm:$0xff]  ;;  %v320_v60 = vld [vmem:[#allocation7 + $0x198] sm:$0xff] }
 0x104   :  { %1147 = vmatpush.msra.mxu2 %v563_v1  ;;  %1169 = vmatpush.msra.mxu3 %v631_v43  ;;  %v615_v24 = vld [vmem:[#allocation7 + $0xad0] sm:$0xff]  ;;  %v452_v61 = vld [vmem:[#allocation7 + $0x5b8] sm:$0xff] }
 0x105   :  { %1102 = vmatpush.msra.mxu0 %v431_v2  ;;  %1125 = vmatpush.msra.mxu1 %v495_v5  ;;  %v415_v26 = vld [vmem:[#allocation7 + $0x490] sm:$0xff]  ;;  %v316_v0 = vld [vmem:[#allocation7 + $0x178] sm:$0xff] }
 0x106   :  { %1148 = vmatpush.msra.mxu2 %v559_v6  ;;  %1170 = vmatpush.msra.mxu3 %v627_v7  ;;  %v479_v27 = vld [vmem:[#allocation7 + $0x690] sm:$0xff]  ;;  %v380_v1 = vld [vmem:[#allocation7 + $0x378] sm:$0xff] }
 0x107   :  { %1103 = vmatpush.msra.mxu0 %v427_v8  ;;  %1126 = vmatpush.msra.mxu1 %v491_v10  ;;  %v543_v29 = vld [vmem:[#allocation7 + $0x890] sm:$0xff]  ;;  %v312_v2 = vld [vmem:[#allocation7 + $0x158] sm:$0xff] }
 0x108   :  { %1149 = vmatpush.msra.mxu2 %v555_v11  ;;  %1171 = vmatpush.msra.mxu3 %v623_v12  ;;  %v611_v30 = vld [vmem:[#allocation7 + $0xab0] sm:$0xff]  ;;  %v376_v5 = vld [vmem:[#allocation7 + $0x358] sm:$0xff] }
 0x109   :  { %1104 = vmatpush.msra.mxu0 %v423_v14  ;;  %1127 = vmatpush.msra.mxu1 %v487_v15  ;;  %v411_v31 = vld [vmem:[#allocation7 + $0x470] sm:$0xff]  ;;  %v444_v7 = vld [vmem:[#allocation7 + $0x578] sm:$0xff] }
 0x10a   :  { %1150 = vmatpush.msra.mxu2 %v551_v16  ;;  %1172 = vmatpush.msra.mxu3 %v619_v17  ;;  %v475_v32 = vld [vmem:[#allocation7 + $0x670] sm:$0xff]  ;;  %v308_v10 = vld [vmem:[#allocation7 + $0x138] sm:$0xff] }
 0x10b   :  { %1105 = vmatpush.msra.mxu0 %v419_v20  ;;  %1128 = vmatpush.msra.mxu1 %v483_v21  ;;  %v539_v33 = vld [vmem:[#allocation7 + $0x870] sm:$0xff]  ;;  %v440_v11 = vld [vmem:[#allocation7 + $0x558] sm:$0xff] }
 0x10c   :  { %1151 = vmatpush.msra.mxu2 %v547_v22  ;;  %1173 = vmatpush.msra.mxu3 %v615_v24  ;;  %v607_v34 = vld [vmem:[#allocation7 + $0xa90] sm:$0xff]  ;;  %v304_v14 = vld [vmem:[#allocation7 + $0x118] sm:$0xff] }
 0x10d   :  { %1106 = vmatpush.msra.mxu0 %v415_v26  ;;  %1129 = vmatpush.msra.mxu1 %v479_v27  ;;  %v407_v35 = vld [vmem:[#allocation7 + $0x450] sm:$0xff]  ;;  %v368_v15 = vld [vmem:[#allocation7 + $0x318] sm:$0xff] }
 0x10e   :  { %1152 = vmatpush.msra.mxu2 %v543_v29  ;;  %1174 = vmatpush.msra.mxu3 %v611_v30  ;;  %v471_v62 = vld [vmem:[#allocation7 + $0x650] sm:$0xff]  ;;  %v436_v16 = vld [vmem:[#allocation7 + $0x538] sm:$0xff] }
 0x10f   :  { %1065 = vmatmul.f32.vlgmr.msrb.gmra.mxu2 %v4399_v48  ;;  %1107 = vmatpush.msra.mxu0 %v411_v31  ;;  %v535_v36 = vld [vmem:[#allocation7 + $0x850] sm:$0xff]  ;;  %v364_v20 = vld [vmem:[#allocation7 + $0x2f8] sm:$0xff] }
 0x110   :  { %1130 = vmatpush.msra.mxu1 %v475_v32  ;;  %1153 = vmatpush.msra.mxu2 %v539_v33  ;;  %v603_v37 = vld [vmem:[#allocation7 + $0xa70] sm:$0xff]  ;;  %v432_v21 = vld [vmem:[#allocation7 + $0x518] sm:$0xff] }
 0x111   :  { %1175 = vmatpush.msra.mxu3 %v607_v34  ;;  %1108 = vmatpush.msra.mxu0 %v407_v35  ;;  %v403_v38 = vld [vmem:[#allocation7 + $0x430] sm:$0xff]  ;;  %v296_v24 = vld [vmem:[#allocation7 + $0xd8] sm:$0xff] }
 0x112   :  { %v467_v39 = vld [vmem:[#allocation7 + $0x630] sm:$0xff]  ;;  %1088 = vmatmul.f32.vlgmr.msrb.gmra.mxu3 %v4403_v53  ;;  %1131 = vmatpush.msra.mxu1 %v471_v62  ;;  %v428_v26 = vld [vmem:[#allocation7 + $0x4f8] sm:$0xff] }
 0x113   :  { %v531_v40 = vld [vmem:[#allocation7 + $0x830] sm:$0xff]  ;;  %1154 = vmatpush.msra.mxu2 %v535_v36  ;;  %1176 = vmatpush.msra.mxu3 %v603_v37  ;;  %v292_v29 = vld [vmem:[#allocation7 + $0xb8] sm:$0xff] }
 0x114   :  { %v599_v41 = vld [vmem:[#allocation7 + $0xa50] sm:$0xff]  ;;  %1109 = vmatpush.msra.mxu0 %v403_v38  ;;  %1132 = vmatpush.msra.mxu1 %v467_v39  ;;  %v356_v30 = vld [vmem:[#allocation7 + $0x2b8] sm:$0xff] }
 0x115   :  { %v399_v42 = vld [vmem:[#allocation7 + $0x410] sm:$0xff]  ;;  %1155 = vmatpush.msra.mxu2 %v531_v40  ;;  %1177 = vmatpush.msra.mxu3 %v599_v41  ;;  %v424_v31 = vld [vmem:[#allocation7 + $0x4d8] sm:$0xff]  ;;  %v4463_v40 = vld [vmem:[#allocation2 + $0x48] sm:$0xff] }
 0x116   :  { %v463_v44 = vld [vmem:[#allocation7 + $0x610] sm:$0xff]  ;;  %1110 = vmatpush.msra.mxu0 %v399_v42  ;;  %v288_v33 = vld [vmem:[#allocation7 + $0x98] sm:$0xff] }
 0x117   :  { %v527_v48 = vld [vmem:[#allocation7 + $0x810] sm:$0xff]  ;;  %1133 = vmatpush.msra.mxu1 %v463_v44  ;;  %1068 = vmatmul.f32.gmra.mxu2 %v4409_v3  ;;  %v384_v3 = vld [vmem:[#allocation7 + $0x398] sm:$0xff] }
 0x118   :  { %v595_v45 = vld [vmem:[#allocation7 + $0xa30] sm:$0xff]  ;;  %1156 = vmatpush.msra.mxu2 %v527_v48  ;;  %1134 = vmatmul.f32.vlgmr.msra.gmra.mxu1 %v4411_v4  ;;  %v360_v4 = vld [vmem:[#allocation7 + $0x2d8] sm:$0xff] }
 0x119   :  { %v715_v47 = vld [vmem:[#allocation7 + $0xdf0] sm:$0xff]  ;;  %1178 = vmatpush.msra.mxu3 %v595_v45  ;;  %1210 = vmatpush.msrb.mxu1 %v332_v49  ;;  %v352_v34 = vld [vmem:[#allocation7 + $0x298] sm:$0xff] }
 0x11a   :  { %v591_v53 = vld [vmem:[#allocation7 + $0xa10] sm:$0xff]  ;;  %1187 = vmatpush.msrb.mxu0 %v715_v47  ;;  %1233 = vmatpush.msrb.mxu2 %v396_v50  ;;  %v420_v35 = vld [vmem:[#allocation7 + $0x4b8] sm:$0xff] }
 0x11b   :  { %v711_v51 = vld [vmem:[#allocation7 + $0xdd0] sm:$0xff]  ;;  %1179 = vmatpush.msra.mxu3 %v591_v53  ;;  %1211 = vmatpush.msrb.mxu1 %v328_v52  ;;  %v284_v62 = vld [vmem:[#allocation7 + $0x78] sm:$0xff] }
 0x11c   :  { %1188 = vmatpush.msrb.mxu0 %v711_v51  ;;  %v707_v18 = vld [vmem:[#allocation7 + $0xdb0] sm:$0xff]  ;;  %1091 = vmatmul.f32.gmra.mxu3 %v4415_v9  ;;  %v448_v9 = vld [vmem:[#allocation7 + $0x598] sm:$0xff] }
 0x11d   :  { %1234 = vmatpush.msrb.mxu2 %v392_v54  ;;  %1256 = vmatpush.msrb.mxu3 %v460_v55  ;;  %v703_v59 = vld [vmem:[#allocation7 + $0xd90] sm:$0xff]  ;;  %v348_v37 = vld [vmem:[#allocation7 + $0x278] sm:$0xff] }
 0x11e   :  { %1189 = vmatpush.msrb.mxu0 %v707_v18  ;;  %1212 = vmatpush.msrb.mxu1 %v324_v56  ;;  %v699_v63 = vld [vmem:[#allocation7 + $0xd70] sm:$0xff]  ;;  %v416_v38 = vld [vmem:[#allocation7 + $0x498] sm:$0xff] }
 0x11f   :  { %1235 = vmatpush.msrb.mxu2 %v388_v57  ;;  %1257 = vmatpush.msrb.mxu3 %v456_v58  ;;  %v695_v43 = vld [vmem:[#allocation7 + $0xd50] sm:$0xff]  ;;  %v280_v39 = vld [vmem:[#allocation7 + $0x58] sm:$0xff] }
 0x120   :  { %1190 = vmatpush.msrb.mxu0 %v703_v59  ;;  %1213 = vmatpush.msrb.mxu1 %v320_v60  ;;  %v4458_v6 = vld [vmem:[#allocation2 + $0x10] sm:$0xff]  ;;  %v344_v42 = vld [vmem:[#allocation7 + $0x258] sm:$0xff] }
 0x121   :  { %1236 = vmatpush.msrb.mxu2 %v384_v3  ;;  %1258 = vmatpush.msrb.mxu3 %v452_v61  ;;  %v691_v8 = vld [vmem:[#allocation7 + $0xd30] sm:$0xff]  ;;  %v412_v44 = vld [vmem:[#allocation7 + $0x478] sm:$0xff]  ;;  %v4467_v57 = vpop.f32.mrf.mxu0  ;;  %v4473_v3 = vpop.f32.mrf.mxu1 }
 0x122   :  { %1157 = vmatmul.f32.vlgmr.msra.gmra.mxu2 %v4421_v23  ;;  %1191 = vmatpush.msrb.mxu0 %v699_v63  ;;  %v372_v23 = vld [vmem:[#allocation7 + $0x338] sm:$0xff]  ;;  %v687_v12 = vld [vmem:[#allocation7 + $0xd10] sm:$0xff] }
 0x123   :  { %1214 = vmatpush.msrb.mxu1 %v316_v0  ;;  %1237 = vmatpush.msrb.mxu2 %v380_v1  ;;  %v683_v17 = vld [vmem:[#allocation7 + $0xcf0] sm:$0xff]  ;;  %v276_v48 = vld [vmem:[#allocation7 + $0x38] sm:$0xff] }
 0x124   :  { %1259 = vmatpush.msrb.mxu3 %v448_v9  ;;  %1111 = vmatmul.f32.vlgmr.msra.gmra.mxu0 %v4458_v6  ;;  %v679_v22 = vld [vmem:[#allocation7 + $0xcd0] sm:$0xff]  ;;  %v340_v47 = vld [vmem:[#allocation7 + $0x238] sm:$0xff] }
 0x125   :  { %1180 = vmatmul.f32.vlgmr.msra.gmra.mxu3 %v4423_v28  ;;  %1192 = vmatpush.msrb.mxu0 %v695_v43  ;;  %v300_v28 = vld [vmem:[#allocation7 + $0xf8] sm:$0xff]  ;;  %v675_v27 = vld [vmem:[#allocation7 + $0xcb0] sm:$0xff] }
 0x126   :  { %1215 = vmatpush.msrb.mxu1 %v312_v2  ;;  %1238 = vmatpush.msrb.mxu2 %v376_v5  ;;  %v671_v32 = vld [vmem:[#allocation7 + $0xc90] sm:$0xff]  ;;  %v408_v49 = vld [vmem:[#allocation7 + $0x458] sm:$0xff] }
 0x127   :  { %1260 = vmatpush.msrb.mxu3 %v444_v7  ;;  %1193 = vmatpush.msrb.mxu0 %v691_v8  ;;  %v667_v36 = vld [vmem:[#allocation7 + $0xc70] sm:$0xff]  ;;  %v272_v53 = vld [vmem:[#allocation7 + $0x18] sm:$0xff] }
 0x128   :  { %1216 = vmatpush.msrb.mxu1 %v308_v10  ;;  %1239 = vmatpush.msrb.mxu2 %v372_v23  ;;  %v663_v41 = vld [vmem:[#allocation7 + $0xc50] sm:$0xff]  ;;  %v336_v51 = vld [vmem:[#allocation7 + $0x218] sm:$0xff] }
 0x129   :  { %1261 = vmatpush.msrb.mxu3 %v440_v11  ;;  %1194 = vmatpush.msrb.mxu0 %v687_v12  ;;  %v659_v45 = vld [vmem:[#allocation7 + $0xc30] sm:$0xff]  ;;  %v404_v52 = vld [vmem:[#allocation7 + $0x438] sm:$0xff]  ;;  %v4477_v12 = vpop.f32.mrf.mxu0 }
 0x12a   :  { %1217 = vmatpush.msrb.mxu1 %v304_v14  ;;  %1240 = vmatpush.msrb.mxu2 %v368_v15  ;;  %v655_v50 = vld [vmem:[#allocation7 + $0xc10] sm:$0xff]  ;;  %v524_v54 = vld [vmem:[#allocation7 + $0x7f8] sm:$0xff] }
 0x12b   :  { %1262 = vmatpush.msrb.mxu3 %v436_v16  ;;  %1195 = vmatpush.msrb.mxu0 %v683_v17  ;;  %v588_v55 = vld [vmem:[#allocation7 + $0x9f8] sm:$0xff]  ;;  %v4470_v58 = vld [vmem:[#allocation2 + $0x30] sm:$0xff]  ;;  %v4479_v16 = vpop.f32.mrf.mxu2 }
 0x12c   :  { %1218 = vmatpush.msrb.mxu1 %v300_v28  ;;  %1241 = vmatpush.msrb.mxu2 %v364_v20  ;;  %v652_v18 = vld [vmem:[#allocation7 + $0xbf8] sm:$0xff] }
 0x12d   :  { %1263 = vmatpush.msrb.mxu3 %v432_v21  ;;  %1196 = vmatpush.msrb.mxu0 %v679_v22  ;;  %v400_v56 = vld [vmem:[#allocation7 + $0x418] sm:$0xff]  ;;  %v4483_v22 = vpop.f32.mrf.mxu3 }
 0x12e   :  { %1219 = vmatpush.msrb.mxu1 %v296_v24  ;;  %1242 = vmatpush.msrb.mxu2 %v360_v4  ;;  %v520_v59 = vld [vmem:[#allocation7 + $0x7d8] sm:$0xff] }
 0x12f   :  { %1264 = vmatpush.msrb.mxu3 %v428_v26  ;;  %1197 = vmatpush.msrb.mxu0 %v675_v27  ;;  %v648_v60 = vld [vmem:[#allocation7 + $0xbd8] sm:$0xff]  ;;  %v4481_v20 = vpop.f32.mrf.mxu1 }
 0x130   :  { %1220 = vmatpush.msrb.mxu1 %v292_v29  ;;  %1243 = vmatpush.msrb.mxu2 %v356_v30  ;;  %v716_v61 = vld [vmem:[#allocation7 + $0xdf8] sm:$0xff] }
 0x131   :  { %1265 = vmatpush.msrb.mxu3 %v424_v31  ;;  %1198 = vmatpush.msrb.mxu0 %v671_v32  ;;  %v516_v63 = vld [vmem:[#allocation7 + $0x7b8] sm:$0xff] }
 0x132   :  { %1221 = vmatpush.msrb.mxu1 %v288_v33  ;;  %1244 = vmatpush.msrb.mxu2 %v352_v34  ;;  %v580_v0 = vld [vmem:[#allocation7 + $0x9b8] sm:$0xff]  ;;  %v3813_v33 = vld [vmem:[#allocation2 + $0x8] sm:$0xff] }
 0x133   :  { %1266 = vmatpush.msrb.mxu3 %v420_v35  ;;  %1114 = vmatmul.f32.gmra.mxu0 %v4463_v40  ;;  %v712_v1 = vld [vmem:[#allocation7 + $0xdd8] sm:$0xff] }
 0x134   :  { %1222 = vmatpush.msrb.mxu1 %v284_v62  ;;  %1199 = vmatpush.msrb.mxu0 %v667_v36  ;;  %v512_v9 = vld [vmem:[#allocation7 + $0x798] sm:$0xff]  ;;  %v4485_v36 = vpop.f32.mrf.mxu0 }
 0x135   :  { %1245 = vmatpush.msrb.mxu2 %v348_v37  ;;  %1267 = vmatpush.msrb.mxu3 %v416_v38  ;;  %v576_v43 = vld [vmem:[#allocation7 + $0x998] sm:$0xff]  ;;  %v3814_v37 = vld [vmem:[#allocation2] sm:$0xff] }
 0x136   :  { %1223 = vmatpush.msrb.mxu1 %v280_v39  ;;  %1200 = vmatpush.msrb.mxu0 %v663_v41  ;;  %v640_v2 = vld [vmem:[#allocation7 + $0xb98] sm:$0xff]  ;;  %v4487_v41 = vpop.f32.mrf.mxu2 }
 0x137   :  { %1246 = vmatpush.msrb.mxu2 %v344_v42  ;;  %1268 = vmatpush.msrb.mxu3 %v412_v44  ;;  %v708_v5 = vld [vmem:[#allocation7 + $0xdb8] sm:$0xff] }
 0x138   :  { %1224 = vmatpush.msrb.mxu1 %v276_v48  ;;  %1201 = vmatpush.msrb.mxu0 %v659_v45  ;;  %v508_v7 = vld [vmem:[#allocation7 + $0x778] sm:$0xff]  ;;  %v4490_v48 = vpop.f32.mrf.mxu3  ;;  %v4492_v45 = vpop.f32.mrf.mxu1 }
 0x139   :  { %1247 = vmatpush.msrb.mxu2 %v340_v47  ;;  %1269 = vmatpush.msrb.mxu3 %v408_v49  ;;  %v572_v8 = vld [vmem:[#allocation7 + $0x978] sm:$0xff] }
 0x13a   :  { %1160 = vmatmul.f32.gmra.mxu2 %v4433_v19  ;;  %1202 = vmatpush.msrb.mxu0 %v655_v50  ;;  %v584_v19 = vld [vmem:[#allocation7 + $0x9d8] sm:$0xff] }
 0x13b   :  { %1225 = vmatpush.msrb.mxu1 %v272_v53  ;;  %1248 = vmatpush.msrb.mxu2 %v336_v51  ;;  %v704_v10 = vld [vmem:[#allocation7 + $0xd98] sm:$0xff] }
 0x13c   :  { %1270 = vmatpush.msrb.mxu3 %v404_v52  ;;  %1203 = vmatmul.f32.vlgmr.msrb.gmra.mxu0 %v4470_v58  ;;  %v504_v23 = vld [vmem:[#allocation7 + $0x758] sm:$0xff] }
 0x13d   :  { %1183 = vmatmul.f32.gmra.mxu3 %v4437_v25  ;;  %1279 = vmatpush.msra.mxu0 %v524_v54  ;;  %v644_v25 = vld [vmem:[#allocation7 + $0xbb8] sm:$0xff] }
 0x13e   :  { %1302 = vmatpush.msra.mxu1 %v588_v55  ;;  %1325 = vmatpush.msra.mxu2 %v652_v18  ;;  %v568_v11 = vld [vmem:[#allocation7 + $0x958] sm:$0xff]  ;;  %v3815_v18 = vld [vmem:[#allocation2 + $0x40] sm:$0xff] }
 0x13f   :  { %1271 = vmatpush.msrb.mxu3 %v400_v56  ;;  %1137 = vmatmul.f32.gmra.mxu1 %v4427_v46  ;;  %v636_v46 = vld [vmem:[#allocation7 + $0xb78] sm:$0xff] }
 0x140   :  { %1280 = vmatpush.msra.mxu0 %v520_v59  ;;  %1303 = vmatpush.msra.mxu1 %v584_v19  ;;  %v632_v14 = vld [vmem:[#allocation7 + $0xb58] sm:$0xff] }
 0x141   :  { %1326 = vmatpush.msra.mxu2 %v648_v60  ;;  %1348 = vmatpush.msra.mxu3 %v716_v61  ;;  %v700_v15 = vld [vmem:[#allocation7 + $0xd78] sm:$0xff] }
 0x142   :  { %1281 = vmatpush.msra.mxu0 %v516_v63  ;;  %1304 = vmatpush.msra.mxu1 %v580_v0  ;;  %v500_v17 = vld [vmem:[#allocation7 + $0x738] sm:$0xff]  ;;  %v4496_v63 = vld [vmem:[#allocation8] sm:$0xf] }
 0x143   :  { %1327 = vmatpush.msra.mxu2 %v644_v25  ;;  %1349 = vmatpush.msra.mxu3 %v712_v1  ;;  %v564_v28 = vld [vmem:[#allocation7 + $0x938] sm:$0xff] }
 0x144   :  { %1282 = vmatpush.msra.mxu0 %v512_v9  ;;  %1305 = vmatpush.msra.mxu1 %v576_v43  ;;  %v628_v21 = vld [vmem:[#allocation7 + $0xb38] sm:$0xff]  ;;  %v4501_v43 = vpop.f32.mrf.mxu2 }
 0x145   :  { %1328 = vmatpush.msra.mxu2 %v640_v2  ;;  %1350 = vmatpush.msra.mxu3 %v708_v5  ;;  %v496_v24 = vld [vmem:[#allocation7 + $0x718] sm:$0xff] }
 0x146   :  { %1206 = vmatmul.f32.gmra.mxu0 %v4431_v13  ;;  %1306 = vmatpush.msra.mxu1 %v572_v8  ;;  %v696_v13 = vld [vmem:[#allocation7 + $0xd58] sm:$0xff] }
 0x147   :  { %1283 = vmatpush.msra.mxu0 %v508_v7  ;;  %1329 = vmatpush.msra.mxu2 %v636_v46  ;;  %v560_v4 = vld [vmem:[#allocation7 + $0x918] sm:$0xff]  ;;  %v4494_v19 = vpop.f32.mrf.mxu0  ;;  %v905_v7 = vpop.f32.mrf.mxu3 }
 0x148   :  { %1351 = vmatpush.msra.mxu3 %v704_v10  ;;  %1307 = vmatpush.msra.mxu1 %v568_v11  ;;  %v624_v26 = vld [vmem:[#allocation7 + $0xb18] sm:$0xff]  ;;  %v719_v10 = vperm.slane %v4496_v63, 0  ;;  %v720_v11 = vperm.slane %v4496_v63, 1 }
 0x149   :  { %1284 = vmatpush.msra.mxu0 %v504_v23  ;;  %1330 = vmatpush.msra.mxu2 %v632_v14  ;;  %v692_v27 = vld [vmem:[#allocation7 + $0xd38] sm:$0xff] }
 0x14a   :  { %1352 = vmatpush.msra.mxu3 %v700_v15  ;;  %1308 = vmatpush.msra.mxu1 %v564_v28  ;;  %v492_v29 = vld [vmem:[#allocation7 + $0x6f8] sm:$0xff] }
 0x14b   :  { %1285 = vmatpush.msra.mxu0 %v500_v17  ;;  %1331 = vmatpush.msra.mxu2 %v628_v21  ;;  %v556_v30 = vld [vmem:[#allocation7 + $0x8f8] sm:$0xff]  ;;  %v4499_v9 = vpop.f32.mrf.mxu1  ;;  %v745_v21 = vadd.f32 %v4467_v57, %v719_v10 }
 0x14c   :  { %1353 = vmatpush.msra.mxu3 %v696_v13  ;;  %1309 = vmatpush.msra.mxu1 %v560_v4  ;;  %v620_v31 = vld [vmem:[#allocation7 + $0xaf8] sm:$0xff]  ;;  %v1423_v4 = vld [vmem:[#allocation10 + $0xe0] sm:$0xff] }
 0x14d   :  { %1286 = vmatpush.msra.mxu0 %v496_v24  ;;  %1332 = vmatpush.msra.mxu2 %v624_v26  ;;  %v688_v32 = vld [vmem:[#allocation7 + $0xd18] sm:$0xff]  ;;  %v3818_v24 = vld [vmem:[#allocation2 + $0x28] sm:$0xff]  ;;  %v906_v26 = vadd.f32 %v905_v7, %v720_v11 }
 0x14e   :  { %1354 = vmatpush.msra.mxu3 %v692_v27  ;;  %1249 = vmatmul.f32.vlgmr.msrb.gmra.mxu2 %v3813_v33  ;;  %v488_v34 = vld [vmem:[#allocation7 + $0x6d8] sm:$0xff]  ;;  %v1455_v27 = vld [vmem:[#allocation10 + $0x1e0] sm:$0xff]  ;;  %v768_v33 = vadd.f32 %v4473_v3, %v745_v21 }
 0x14f   :  { %1287 = vmatpush.msra.mxu0 %v492_v29  ;;  %1310 = vmatpush.msra.mxu1 %v556_v30  ;;  %v552_v35 = vld [vmem:[#allocation7 + $0x8d8] sm:$0xff]  ;;  %v3819_v30 = vld [vmem:[#allocation2 + $0x20] sm:$0xff] }
 0x150   :  { %1333 = vmatpush.msra.mxu2 %v620_v31  ;;  %v616_v62 = vld [vmem:[#allocation7 + $0xad8] sm:$0xff]  ;;  %1355 = vmatpush.msra.mxu3 %v688_v32 }
 0x151   :  { %1226 = vmatmul.f32.vlgmr.msrb.gmra.mxu1 %v3814_v37  ;;  %v684_v38 = vld [vmem:[#allocation7 + $0xcf8] sm:$0xff]  ;;  %1272 = vmatmul.f32.vlgmr.msrb.gmra.mxu3 %v4458_v6 }
 0x152   :  { %v484_v39 = vld [vmem:[#allocation7 + $0x6b8] sm:$0xff]  ;;  %1288 = vmatpush.msra.mxu0 %v488_v34  ;;  %1311 = vmatpush.msra.mxu1 %v552_v35  ;;  %v4506_v32 = vpop.f32.mrf.mxu2  ;;  %v1419_v34 = vld [vmem:[#allocation10 + $0xc0] sm:$0xff] }
 0x153   :  { %v548_v42 = vld [vmem:[#allocation7 + $0x8b8] sm:$0xff]  ;;  %1334 = vmatpush.msra.mxu2 %v616_v62  ;;  %1356 = vmatpush.msra.mxu3 %v684_v38  ;;  %v1451_v62 = vld [vmem:[#allocation10 + $0x1c0] sm:$0xff] }
 0x154   :  { %v612_v44 = vld [vmem:[#allocation7 + $0xab8] sm:$0xff]  ;;  %1289 = vmatpush.msra.mxu0 %v484_v39  ;;  %1312 = vmatpush.msra.mxu1 %v548_v42  ;;  %v908_v35 = vpop.f32.mrf.mxu3 }
 0x155   :  { %v680_v47 = vld [vmem:[#allocation7 + $0xcd8] sm:$0xff]  ;;  %1335 = vmatpush.msra.mxu2 %v612_v44  ;;  %v791_v44 = vadd.f32 %v4479_v16, %v768_v33  ;;  %v909_v3 = vadd.f32 %v908_v35, %v720_v11  ;;  %v1487_v33 = vld [vmem:[#allocation10 + $0x2e0] sm:$0xff] }
 0x156   :  { %v480_v49 = vld [vmem:[#allocation7 + $0x698] sm:$0xff]  ;;  %1357 = vmatpush.msra.mxu3 %v680_v47  ;;  %1252 = vmatmul.f32.gmra.mxu2 %v3815_v18  ;;  %v748_v47 = vadd.f32 %v4477_v12, %v719_v10 }
 0x157   :  { %v544_v50 = vld [vmem:[#allocation7 + $0x898] sm:$0xff]  ;;  %1290 = vmatpush.msra.mxu0 %v480_v49  ;;  %v3821_v49 = vld [vmem:[#allocation2 + $0x60] sm:$0xff] }
 0x158   :  { %v608_v53 = vld [vmem:[#allocation7 + $0xa98] sm:$0xff]  ;;  %1313 = vmatpush.msra.mxu1 %v544_v50  ;;  %v928_v28 = vpop.f32.mrf.mxu0  ;;  %v1415_v50 = vld [vmem:[#allocation10 + $0xa0] sm:$0xff]  ;;  %v771_v12 = vadd.f32 %v4481_v20, %v748_v47 }
 0x159   :  { %v676_v51 = vld [vmem:[#allocation7 + $0xcb8] sm:$0xff]  ;;  %1336 = vmatpush.msra.mxu2 %v608_v53  ;;  %1275 = vmatmul.f32.gmra.mxu3 %v4463_v40  ;;  %v929_v37 = vadd.f32 %v928_v28, %v906_v26  ;;  %v1447_v53 = vld [vmem:[#allocation10 + $0x1a0] sm:$0xff] }
 0x15a   :  { %v476_v6 = vld [vmem:[#allocation7 + $0x678] sm:$0xff]  ;;  %1358 = vmatpush.msra.mxu3 %v676_v51  ;;  %v1435_v28 = vld [vmem:[#allocation10 + $0x140] sm:$0xff] }
 0x15b   :  { %v540_v52 = vld [vmem:[#allocation7 + $0x878] sm:$0xff]  ;;  %1291 = vmatpush.msra.mxu0 %v476_v6  ;;  %v951_v29 = vpop.f32.mrf.mxu1 }
 0x15c   :  { %v604_v54 = vld [vmem:[#allocation7 + $0xa78] sm:$0xff]  ;;  %1314 = vmatpush.msra.mxu1 %v540_v52  ;;  %v952_v51 = vadd.f32 %v951_v29, %v929_v37  ;;  %v974_v52 = vpop.f32.mrf.mxu2 }
 0x15d   :  { %v672_v55 = vld [vmem:[#allocation7 + $0xc98] sm:$0xff]  ;;  %1337 = vmatpush.msra.mxu2 %v604_v54 }
 0x15e   :  { %v472_v56 = vld [vmem:[#allocation7 + $0x658] sm:$0xff]  ;;  %1359 = vmatpush.msra.mxu3 %v672_v55  ;;  %v3823_v55 = vld [vmem:[#allocation2 + $0x68] sm:$0xff] }
 0x15f   :  { %v536_v59 = vld [vmem:[#allocation7 + $0x858] sm:$0xff]  ;;  %1292 = vmatpush.msra.mxu0 %v472_v56  ;;  %v814_v56 = vadd.f32 %v4483_v22, %v791_v44  ;;  %v1407_v22 = vld [vmem:[#allocation10 + $0x60] sm:$0xff] }
 0x160   :  { %v600_v60 = vld [vmem:[#allocation7 + $0xa58] sm:$0xff]  ;;  %1315 = vmatpush.msra.mxu1 %v536_v59  ;;  %v1411_v59 = vld [vmem:[#allocation10 + $0x80] sm:$0xff] }
 0x161   :  { %v668_v61 = vld [vmem:[#allocation7 + $0xc78] sm:$0xff]  ;;  %1338 = vmatpush.msra.mxu2 %v600_v60  ;;  %v1443_v60 = vld [vmem:[#allocation10 + $0x180] sm:$0xff]  ;;  %v837_v7 = vadd.f32 %v4485_v36, %v814_v56 }
 0x162   :  { %v3816_v0 = vld [vmem:[#allocation2 + $0x38] sm:$0xff]  ;;  %1360 = vmatpush.msra.mxu3 %v668_v61  ;;  %v975_v61 = vadd.f32 %v974_v52, %v952_v51  ;;  %v1427_v44 = vld [vmem:[#allocation10 + $0x100] sm:$0xff]  ;;  %v1456_v51 = vld [vmem:[#allocation10 + $0x1e8] sm:$0xff] }
 0x163   :  { %1229 = vmatmul.f32.gmra.mxu1 %v3816_v0  ;;  %v468_v25 = vld [vmem:[#allocation7 + $0x638] sm:$0xff]  ;;  %v1424_v52 = vld [vmem:[#allocation10 + $0xe8] sm:$0xff] }
 0x164   :  { %v532_v1 = vld [vmem:[#allocation7 + $0x838] sm:$0xff]  ;;  %1293 = vmatpush.msra.mxu0 %v468_v25  ;;  %v997_v25 = vpop.f32.mrf.mxu3 }
 0x165   :  { %v596_v2 = vld [vmem:[#allocation7 + $0xa38] sm:$0xff]  ;;  %1316 = vmatpush.msra.mxu1 %v532_v1 }
 0x166   :  { %v664_v5 = vld [vmem:[#allocation7 + $0xc58] sm:$0xff]  ;;  %1339 = vmatpush.msra.mxu2 %v596_v2 }
 0x167   :  { %v464_v8 = vld [vmem:[#allocation7 + $0x618] sm:$0xff]  ;;  %1361 = vmatpush.msra.mxu3 %v664_v5  ;;  %v794_v5 = vadd.f32 %v4487_v41, %v771_v12  ;;  %v1403_v41 = vld [vmem:[#allocation10 + $0x40] sm:$0xff] }
 0x168   :  { %v528_v46 = vld [vmem:[#allocation7 + $0x818] sm:$0xff]  ;;  %1294 = vmatpush.msra.mxu0 %v464_v8  ;;  %v931_v42 = vpop.f32.mrf.mxu0  ;;  %v998_v8 = vadd.f32 %v997_v25, %v975_v61 }
 0x169   :  { %v592_v40 = vld [vmem:[#allocation7 + $0xa18] sm:$0xff]  ;;  %1317 = vmatpush.msra.mxu1 %v528_v46  ;;  %v932_v0 = vadd.f32 %v931_v42, %v909_v3  ;;  %v1439_v46 = vld [vmem:[#allocation10 + $0x160] sm:$0xff] }
 0x16a   :  { %v660_v23 = vld [vmem:[#allocation7 + $0xc38] sm:$0xff]  ;;  %1340 = vmatpush.msra.mxu2 %v592_v40  ;;  %v954_v6 = vpop.f32.mrf.mxu1  ;;  %v1395_v42 = vld [vmem:[#allocation10] sm:$0xff] }
 0x16b   :  { %v1425_v14 = vld [vmem:[#allocation10 + $0xf0] sm:$0xff]  ;;  %1362 = vmatpush.msra.mxu3 %v660_v23  ;;  %1341 = vmatmul.f32.vlgmr.msra.gmra.mxu2 %v3818_v24  ;;  %v955_v10 = vadd.f32 %v954_v6, %v932_v0  ;;  %v1458_v47 = vld [vmem:[#allocation10 + $0x1f8] sm:$0xff] }
 0x16c   :  { %v1457_v15 = vld [vmem:[#allocation10 + $0x1f0] sm:$0xff]  ;;  %1529 = vmatpush.msrb.mxu0 %v1425_v14  ;;  %1318 = vmatmul.f32.vlgmr.msra.gmra.mxu1 %v3819_v30  ;;  %v1399_v30 = vld [vmem:[#allocation10 + $0x20] sm:$0xff]  ;;  %v1418_v61 = vld [vmem:[#allocation10 + $0xb8] sm:$0xff] }
 0x16d   :  { %v656_v17 = vld [vmem:[#allocation7 + $0xc18] sm:$0xff]  ;;  %1552 = vmatpush.msrb.mxu1 %v1457_v15  ;;  %v860_v15 = vadd.f32 %v4492_v45, %v837_v7 }
 0x16e   :  { %v3817_v13 = vld [vmem:[#allocation2 + $0x18] sm:$0xff]  ;;  %1363 = vmatpush.msra.mxu3 %v656_v17  ;;  %1530 = vmatpush.msrb.mxu0 %v1423_v4  ;;  %v817_v17 = vadd.f32 %v4490_v48, %v794_v5  ;;  %v1416_v5 = vld [vmem:[#allocation10 + $0xa8] sm:$0xff] }
 0x16f   :  { %1295 = vmatmul.f32.vlgmr.msra.gmra.mxu0 %v3817_v13  ;;  %v1421_v31 = vld [vmem:[#allocation10 + $0xd0] sm:$0xff]  ;;  %1364 = vmatmul.f32.vlgmr.msra.gmra.mxu3 %v4470_v58  ;;  %v1446_v7 = vld [vmem:[#allocation10 + $0x198] sm:$0xff] }
 0x170   :  { %v1453_v57 = vld [vmem:[#allocation10 + $0x1d0] sm:$0xff]  ;;  %1553 = vmatpush.msrb.mxu1 %v1455_v27  ;;  %1531 = vmatpush.msrb.mxu0 %v1421_v31  ;;  %v883_v27 = vadd.f32 %v4501_v43, %v860_v15  ;;  %v840_v29 = vadd.f32 %v4494_v19, %v817_v17  ;;  %v1431_v31 = vld [vmem:[#allocation10 + $0x120] sm:$0xff]  ;;  %v1408_v17 = vld [vmem:[#allocation10 + $0x68] sm:$0xff] }
 0x171   :  { %v1417_v38 = vld [vmem:[#allocation10 + $0xb0] sm:$0xff]  ;;  %v1020_v20 = vpop.f32.mrf.mxu0  ;;  %v1467_v15 = vld [vmem:[#allocation10 + $0x240] sm:$0xff] }
 0x172   :  { %1554 = vmatpush.msrb.mxu1 %v1453_v57  ;;  %1532 = vmatpush.msrb.mxu0 %v1419_v34  ;;  %v1449_v39 = vld [vmem:[#allocation10 + $0x1b0] sm:$0xff]  ;;  %v1021_v11 = vadd.f32 %v1020_v20, %v998_v8  ;;  %v863_v43 = vadd.f32 %v4499_v9, %v840_v29  ;;  %vm1371_vm1 = vcmp.gt.f32.partialorder %v883_v27, 0.0  ;;  %v1414_v8 = vld [vmem:[#allocation10 + $0x98] sm:$0xff] }
 0x173   :  { %v3820_v58 = vld [vmem:[#allocation2 + $0x50] sm:$0xff]  ;;  %1344 = vmatmul.f32.gmra.mxu2 %v3821_v49  ;;  %v3822_v54 = vld [vmem:[#allocation2 + $0x58] sm:$0xff] }
 0x174   :  { %1555 = vmatpush.msrb.mxu1 %v1451_v62  ;;  %1533 = vmatpush.msrb.mxu0 %v1417_v38  ;;  %v1413_v16 = vld [vmem:[#allocation10 + $0x90] sm:$0xff]  ;;  %v1043_v14 = vpop.f32.mrf.mxu1  ;;  %v1379_v38 = vmul.f32 0.2, %v883_v27  ;;  %v1426_v49 = vld [vmem:[#allocation10 + $0xf8] sm:$0xff]  ;;  %v886_v9 = vadd.f32 %v4506_v32, %v863_v43  ;;  %v1452_v32 = vld [vmem:[#allocation10 + $0x1c8] sm:$0xff] }
 0x175   :  { %1321 = vmatmul.f32.gmra.mxu1 %v3822_v54  ;;  %v1445_v18 = vld [vmem:[#allocation10 + $0x190] sm:$0xff]  ;;  %v977_v36 = vpop.f32.mrf.mxu2  ;;  %v1044_v4 = vadd.f32 %v1043_v14, %v1021_v11  ;;  %v1454_v54 = vld [vmem:[#allocation10 + $0x1d8] sm:$0xff]  ;;  %v1440_v14 = vld [vmem:[#allocation10 + $0x168] sm:$0xff] }
 0x176   :  { %1556 = vmatpush.msrb.mxu1 %v1449_v39  ;;  %1534 = vmatpush.msrb.mxu0 %v1415_v50  ;;  %v1409_v1 = vld [vmem:[#allocation10 + $0x70] sm:$0xff]  ;;  %v978_v21 = vadd.f32 %v977_v36, %v955_v10  ;;  %v1383_v12 = vmul.f32 0.2, %v886_v9  ;;  %vm1375_vm3 = vcmp.gt.f32.partialorder %v886_v9, 0.0  ;;  %v1412_v10 = vld [vmem:[#allocation10 + $0x88] sm:$0xff]  ;;  %v1410_v11 = vld [vmem:[#allocation10 + $0x78] sm:$0xff] }
 0x177   :  { %1298 = vmatmul.f32.gmra.mxu0 %v3820_v58  ;;  %1367 = vmatmul.f32.gmra.mxu3 %v3823_v55  ;;  %v1441_v2 = vld [vmem:[#allocation10 + $0x170] sm:$0xff]  ;;  %v1380_v62 = vmul.f32 0.2, %v1044_v4  ;;  %vm1372_vm0 = vcmp.gt.f32.partialorder %v1044_v4, 0.0  ;;  %v1483_v58 = vld [vmem:[#allocation10 + $0x2c0] sm:$0xff]  ;;  %v1402_v29 = vld [vmem:[#allocation10 + $0x38] sm:$0xff] }
 0x178   :  { %1557 = vmatpush.msrb.mxu1 %v1447_v53  ;;  %1535 = vmatpush.msrb.mxu0 %v1413_v16  ;;  %v1405_v40 = vld [vmem:[#allocation10 + $0x50] sm:$0xff]  ;;  %v1000_v26 = vpop.f32.mrf.mxu3  ;;  %v4524_v53 = vsel %vm1371_vm1, %v883_v27, %v1379_v38  ;;  %v1479_v55 = vld [vmem:[#allocation10 + $0x2a0] sm:$0xff]  ;;  %v1422_v16 = vld [vmem:[#allocation10 + $0xd8] sm:$0xff]  ;;  %v4530_v25 = vsel %vm1375_vm3, %v886_v9, %v1383_v12 }
 0x179   :  { %v1437_v23 = vld [vmem:[#allocation10 + $0x150] sm:$0xff]  ;;  %v1001_v45 = vadd.f32 %v1000_v26, %v978_v21  ;;  %v4521_v3 = vsel %vm1372_vm0, %v1044_v4, %v1380_v62  ;;  %v1406_v21 = vld [vmem:[#allocation10 + $0x58] sm:$0xff]  ;;  %v1404_v4 = vld [vmem:[#allocation10 + $0x48] sm:$0xff] }
 0x17a   :  { %1558 = vmatpush.msrb.mxu1 %v1445_v18  ;;  %1536 = vmatpush.msrb.mxu0 %v1411_v59  ;;  %v1401_v13 = vld [vmem:[#allocation10 + $0x30] sm:$0xff]  ;;  %v1420_v59 = vld [vmem:[#allocation10 + $0xc8] sm:$0xff]  ;;  %v1434_v26 = vld [vmem:[#allocation10 + $0x138] sm:$0xff] }
 0x17b   :  { %v1433_v24 = vld [vmem:[#allocation10 + $0x130] sm:$0xff]  ;;  %v1023_v57 = vpop.f32.mrf.mxu0  ;;  %v1396_v43 = vld [vmem:[#allocation10 + $0x8] sm:$0xff]  ;;  %v1511_v9 = vld [vmem:[#allocation10 + $0x3a0] sm:$0xff] }
 0x17c   :  { %1559 = vmatpush.msrb.mxu1 %v1443_v60  ;;  %1537 = vmatpush.msrb.mxu0 %v1409_v1  ;;  %v1489_v48 = vld [vmem:[#allocation10 + $0x2f0] sm:$0xff]  ;;  %v1024_v37 = vadd.f32 %v1023_v57, %v1001_v45  ;;  %v1450_v60 = vld [vmem:[#allocation10 + $0x1b8] sm:$0xff]  ;;  %v1448_v1 = vld [vmem:[#allocation10 + $0x1a8] sm:$0xff] }
 0x17d   :  { %1575 = vmatpush.msrb.mxu2 %v1489_v48  ;;  %v1397_v34 = vld [vmem:[#allocation10 + $0x10] sm:$0xff]  ;;  %v1046_v19 = vpop.f32.mrf.mxu1  ;;  %v1432_v45 = vld [vmem:[#allocation10 + $0x128] sm:$0xff]  ;;  %v1459_v48 = vld [vmem:[#allocation10 + $0x200] sm:$0xff] }
 0x17e   :  { %1560 = vmatpush.msrb.mxu1 %v1441_v2  ;;  %1538 = vmatpush.msrb.mxu0 %v1407_v22  ;;  %v1429_v35 = vld [vmem:[#allocation10 + $0x110] sm:$0xff]  ;;  %v1047_v50 = vadd.f32 %v1046_v19, %v1024_v37  ;;  %v1475_v2 = vld [vmem:[#allocation10 + $0x280] sm:$0xff]  ;;  %v1444_v22 = vld [vmem:[#allocation10 + $0x188] sm:$0xff] }
 0x17f   :  { %1576 = vmatpush.msrb.mxu2 %v1487_v33  ;;  %v1485_v39 = vld [vmem:[#allocation10 + $0x2d0] sm:$0xff]  ;;  %v1430_v57 = vld [vmem:[#allocation10 + $0x118] sm:$0xff]  ;;  %v1428_v37 = vld [vmem:[#allocation10 + $0x108] sm:$0xff] }
 0x180   :  { %1561 = vmatpush.msrb.mxu1 %v1439_v46  ;;  %1539 = vmatpush.msrb.mxu0 %v1405_v40  ;;  %v1481_v6 = vld [vmem:[#allocation10 + $0x2b0] sm:$0xff]  ;;  %v1384_v18 = vmul.f32 0.2, %v1047_v50  ;;  %vm1376_vm2 = vcmp.gt.f32.partialorder %v1047_v50, 0.0  ;;  %v1471_v46 = vld [vmem:[#allocation10 + $0x260] sm:$0xff]  ;;  %v1442_v40 = vld [vmem:[#allocation10 + $0x178] sm:$0xff] }
 0x181   :  { %1577 = vmatpush.msrb.mxu2 %v1485_v39  ;;  %v1477_v56 = vld [vmem:[#allocation10 + $0x290] sm:$0xff]  ;;  %v1398_v33 = vld [vmem:[#allocation10 + $0x18] sm:$0xff]  ;;  %v721_v39 = vperm.slane %v4496_v63, 2 }
 0x182   :  { %1562 = vmatpush.msrb.mxu1 %v1437_v23  ;;  %1540 = vmatpush.msrb.mxu0 %v1403_v41  ;;  %v4528_v0 = vsel %vm1376_vm2, %v1047_v50, %v1384_v18  ;;  %v1473_v20 = vld [vmem:[#allocation10 + $0x270] sm:$0xff]  ;;  %v1438_v41 = vld [vmem:[#allocation10 + $0x158] sm:$0xff] }
 0x183   :  { %1578 = vmatpush.msrb.mxu2 %v1483_v58  ;;  %v1469_v23 = vld [vmem:[#allocation10 + $0x250] sm:$0xff]  ;;  %v1486_v19 = vld [vmem:[#allocation10 + $0x2d8] sm:$0xff] }
 0x184   :  { %1563 = vmatpush.msrb.mxu1 %v1435_v28  ;;  %1541 = vmatpush.msrb.mxu0 %v1401_v13  ;;  %v1521_v36 = vld [vmem:[#allocation10 + $0x3f0] sm:$0xff]  ;;  %v1436_v13 = vld [vmem:[#allocation10 + $0x148] sm:$0xff]  ;;  %v1474_v12 = vld [vmem:[#allocation10 + $0x278] sm:$0xff] }
 0x185   :  { %1579 = vmatpush.msrb.mxu2 %v1481_v6  ;;  %v1465_v28 = vld [vmem:[#allocation10 + $0x230] sm:$0xff]  ;;  %1598 = vmatpush.msrb.mxu3 %v1521_v36 }
 0x186   :  { %1564 = vmatpush.msrb.mxu1 %v1433_v24  ;;  %1542 = vmatpush.msrb.mxu0 %v1399_v30  ;;  %v1463_v24 = vld [vmem:[#allocation10 + $0x220] sm:$0xff]  ;;  %v1461_v27 = vld [vmem:[#allocation10 + $0x210] sm:$0xff]  ;;  %v1400_v30 = vld [vmem:[#allocation10 + $0x28] sm:$0xff] }
 0x187   :  { %1580 = vmatpush.msrb.mxu2 %v1479_v55  ;;  %v1517_v38 = vld [vmem:[#allocation10 + $0x3d0] sm:$0xff] }
 0x188   :  { %1565 = vmatpush.msrb.mxu1 %v1431_v31  ;;  %1543 = vmatpush.msrb.mxu0 %v1397_v34  ;;  %v1490_v31 = vld [vmem:[#allocation10 + $0x2f8] sm:$0xff]  ;;  %v1488_v34 = vld [vmem:[#allocation10 + $0x2e8] sm:$0xff]  ;;  %v1513_v58 = vld [vmem:[#allocation10 + $0x3b0] sm:$0xff] }
 0x189   :  { %1581 = vmatpush.msrb.mxu2 %v1477_v56  ;;  %v1509_v6 = vld [vmem:[#allocation10 + $0x390] sm:$0xff] }
 0x18a   :  { %1566 = vmatpush.msrb.mxu1 %v1429_v35  ;;  %1544 = vmatpush.msrb.mxu0 %v1395_v42  ;;  %v1519_v35 = vld [vmem:[#allocation10 + $0x3e0] sm:$0xff]  ;;  %v1505_v18 = vld [vmem:[#allocation10 + $0x370] sm:$0xff] }
 0x18b   :  { %1545 = vmatmul.f32.vlgmr.msrb.gmra.mxu0 %v4524_v53  ;;  %1582 = vmatpush.msrb.mxu2 %v1475_v2  ;;  %v1515_v42 = vld [vmem:[#allocation10 + $0x3c0] sm:$0xff]  ;;  %v1470_v2 = vld [vmem:[#allocation10 + $0x258] sm:$0xff]  ;;  %v1493_v36 = vld [vmem:[#allocation10 + $0x310] sm:$0xff] }
 0x18c   :  { %1567 = vmatpush.msrb.mxu1 %v1427_v44  ;;  %1621 = vmatpush.msra.mxu0 %v1426_v49  ;;  %v1482_v49 = vld [vmem:[#allocation10 + $0x2b8] sm:$0xff] }
 0x18d   :  { %1568 = vmatmul.f32.vlgmr.msrb.gmra.mxu1 %v4521_v3  ;;  %1583 = vmatpush.msrb.mxu2 %v1473_v20  ;;  %v1468_v20 = vld [vmem:[#allocation10 + $0x248] sm:$0xff] }
 0x18e   :  { %1644 = vmatpush.msra.mxu1 %v1458_v47  ;;  %1622 = vmatpush.msra.mxu0 %v1424_v52  ;;  %v1484_v47 = vld [vmem:[#allocation10 + $0x2c8] sm:$0xff] }
 0x18f   :  { %1584 = vmatpush.msrb.mxu2 %v1471_v46  ;;  %1599 = vmatpush.msrb.mxu3 %v1519_v35  ;;  %v1516_v35 = vld [vmem:[#allocation10 + $0x3c8] sm:$0xff] }
 0x190   :  { %1645 = vmatpush.msra.mxu1 %v1456_v51  ;;  %1623 = vmatpush.msra.mxu0 %v1422_v16  ;;  %v1480_v51 = vld [vmem:[#allocation10 + $0x2a8] sm:$0xff]  ;;  %v1507_v16 = vld [vmem:[#allocation10 + $0x380] sm:$0xff] }
 0x191   :  { %1585 = vmatpush.msrb.mxu2 %v1469_v23  ;;  %1600 = vmatpush.msrb.mxu3 %v1517_v38  ;;  %v1464_v23 = vld [vmem:[#allocation10 + $0x228] sm:$0xff] }
 0x192   :  { %1646 = vmatpush.msra.mxu1 %v1454_v54  ;;  %1624 = vmatpush.msra.mxu0 %v1420_v59  ;;  %v1066_v62 = vpop.f32.mrf.mxu2  ;;  %v1478_v54 = vld [vmem:[#allocation10 + $0x298] sm:$0xff] }
 0x193   :  { %1548 = vmatmul.f32.gmra.mxu0 %v4530_v25  ;;  %1586 = vmatpush.msrb.mxu2 %v1467_v15  ;;  %v1067_v50 = vadd.f32 %v1066_v62, %v721_v39 }
 0x194   :  { %1647 = vmatpush.msra.mxu1 %v1452_v32  ;;  %1625 = vmatpush.msra.mxu0 %v1418_v61  ;;  %v1503_v61 = vld [vmem:[#allocation10 + $0x360] sm:$0xff] }
 0x195   :  { %1571 = vmatmul.f32.gmra.mxu1 %v4528_v0  ;;  %1587 = vmatpush.msrb.mxu2 %v1465_v28  ;;  %v1089_v44 = vpop.f32.mrf.mxu3  ;;  %v1135_v59 = vpop.f32.mrf.mxu1 }
 0x196   :  { %1648 = vmatpush.msra.mxu1 %v1450_v60  ;;  %1626 = vmatpush.msra.mxu0 %v1416_v5  ;;  %v1090_v55 = vadd.f32 %v1089_v44, %v1067_v50  ;;  %v1472_v60 = vld [vmem:[#allocation10 + $0x268] sm:$0xff]  ;;  %v722_v50 = vperm.slane %v4496_v63, 3 }
 0x197   :  { %1588 = vmatpush.msrb.mxu2 %v1463_v24  ;;  %1601 = vmatpush.msrb.mxu3 %v1515_v42  ;;  %v1491_v24 = vld [vmem:[#allocation10 + $0x300] sm:$0xff]  ;;  %v1510_v42 = vld [vmem:[#allocation10 + $0x398] sm:$0xff]  ;;  %v1508_v44 = vld [vmem:[#allocation10 + $0x388] sm:$0xff] }
 0x198   :  { %1649 = vmatpush.msra.mxu1 %v1448_v1  ;;  %1627 = vmatpush.msra.mxu0 %v1414_v8  ;;  %v1501_v1 = vld [vmem:[#allocation10 + $0x350] sm:$0xff]  ;;  %v1499_v8 = vld [vmem:[#allocation10 + $0x340] sm:$0xff] }
 0x199   :  { %1589 = vmatpush.msrb.mxu2 %v1461_v27  ;;  %1602 = vmatpush.msrb.mxu3 %v1513_v58  ;;  %v1506_v58 = vld [vmem:[#allocation10 + $0x378] sm:$0xff] }
 0x19a   :  { %1650 = vmatpush.msra.mxu1 %v1446_v7  ;;  %1628 = vmatpush.msra.mxu0 %v1412_v10  ;;  %v1069_v52 = vpop.f32.mrf.mxu2 }
 0x19b   :  { %1590 = vmatpush.msrb.mxu2 %v1459_v48  ;;  %1603 = vmatpush.msrb.mxu3 %v1511_v9  ;;  %v1070_v7 = vadd.f32 %v1069_v52, %v721_v39  ;;  %v1512_v39 = vld [vmem:[#allocation10 + $0x3a8] sm:$0xff] }
 0x19c   :  { %1651 = vmatpush.msra.mxu1 %v1444_v22  ;;  %1629 = vmatpush.msra.mxu0 %v1410_v11  ;;  %v1466_v22 = vld [vmem:[#allocation10 + $0x238] sm:$0xff]  ;;  %v1497_v11 = vld [vmem:[#allocation10 + $0x330] sm:$0xff] }
 0x19d   :  { %1667 = vmatpush.msra.mxu2 %v1490_v31  ;;  %1604 = vmatpush.msrb.mxu3 %v1509_v6  ;;  %v1500_v6 = vld [vmem:[#allocation10 + $0x348] sm:$0xff] }
 0x19e   :  { %1652 = vmatpush.msra.mxu1 %v1442_v40  ;;  %1630 = vmatpush.msra.mxu0 %v1408_v17  ;;  %v1495_v17 = vld [vmem:[#allocation10 + $0x320] sm:$0xff] }
 0x19f   :  { %1668 = vmatpush.msra.mxu2 %v1488_v34  ;;  %v1092_v32 = vpop.f32.mrf.mxu3  ;;  %1605 = vmatpush.msrb.mxu3 %v1507_v16  ;;  %v1518_v34 = vld [vmem:[#allocation10 + $0x3d8] sm:$0xff]  ;;  %v1496_v16 = vld [vmem:[#allocation10 + $0x328] sm:$0xff] }
 0x1a0   :  { %1653 = vmatpush.msra.mxu1 %v1440_v14  ;;  %1631 = vmatpush.msra.mxu0 %v1406_v21  ;;  %v1093_v10 = vadd.f32 %v1092_v32, %v1070_v7  ;;  %v1462_v14 = vld [vmem:[#allocation10 + $0x218] sm:$0xff]  ;;  %v1460_v21 = vld [vmem:[#allocation10 + $0x208] sm:$0xff] }
 0x1a1   :  { %1669 = vmatpush.msra.mxu2 %v1486_v19  ;;  %1606 = vmatpush.msrb.mxu3 %v1505_v18  ;;  %v1494_v18 = vld [vmem:[#allocation10 + $0x318] sm:$0xff] }
 0x1a2   :  { %1654 = vmatpush.msra.mxu1 %v1438_v41  ;;  %1632 = vmatpush.msra.mxu0 %v1404_v4  ;;  %v1522_v4 = vld [vmem:[#allocation10 + $0x3f8] sm:$0xff] }
 0x1a3   :  { %1670 = vmatpush.msra.mxu2 %v1484_v47  ;;  %1607 = vmatpush.msrb.mxu3 %v1503_v61 }
 0x1a4   :  { %1655 = vmatpush.msra.mxu1 %v1436_v13  ;;  %1633 = vmatpush.msra.mxu0 %v1402_v29 }
 0x1a5   :  { %1671 = vmatpush.msra.mxu2 %v1482_v49  ;;  %1608 = vmatpush.msrb.mxu3 %v1501_v1  ;;  %v1504_v49 = vld [vmem:[#allocation10 + $0x368] sm:$0xff] }
 0x1a6   :  { %1656 = vmatpush.msra.mxu1 %v1434_v26  ;;  %1634 = vmatpush.msra.mxu0 %v1400_v30 }
 0x1a7   :  { %1672 = vmatpush.msra.mxu2 %v1480_v51  ;;  %1609 = vmatpush.msrb.mxu3 %v1499_v8  ;;  %v1502_v51 = vld [vmem:[#allocation10 + $0x358] sm:$0xff] }
 0x1a8   :  { %1657 = vmatpush.msra.mxu1 %v1432_v45  ;;  %1635 = vmatpush.msra.mxu0 %v1398_v33  ;;  %v1181_v40 = vpop.f32.mrf.mxu3 }
 0x1a9   :  { %1673 = vmatpush.msra.mxu2 %v1478_v54  ;;  %1610 = vmatpush.msrb.mxu3 %v1497_v11 }
 0x1aa   :  { %1658 = vmatpush.msra.mxu1 %v1430_v57  ;;  %1636 = vmatpush.msra.mxu0 %v1396_v43  ;;  %v1520_v57 = vld [vmem:[#allocation10 + $0x3e8] sm:$0xff]  ;;  %v1514_v43 = vld [vmem:[#allocation10 + $0x3b8] sm:$0xff] }
 0x1ab   :  { %1637 = vmatmul.f32.vlgmr.msra.gmra.mxu0 %v4524_v53  ;;  %v1476_v53 = vld [vmem:[#allocation10 + $0x288] sm:$0xff]  ;;  %1611 = vmatpush.msrb.mxu3 %v1495_v17 }
 0x1ac   :  { %1659 = vmatpush.msra.mxu1 %v1428_v37  ;;  %1674 = vmatpush.msra.mxu2 %v1476_v53 }
 0x1ad   :  { %1660 = vmatmul.f32.vlgmr.msra.gmra.mxu1 %v4521_v3  ;;  %v1112_v3 = vpop.f32.mrf.mxu0  ;;  %1612 = vmatpush.msrb.mxu3 %v1493_v36 }
 0x1ae   :  { %v1113_v56 = vadd.f32 %v1112_v3, %v1090_v55  ;;  %1675 = vmatpush.msra.mxu2 %v1474_v12  ;;  %v1498_v55 = vld [vmem:[#allocation10 + $0x338] sm:$0xff]  ;;  %v1492_v12 = vld [vmem:[#allocation10 + $0x308] sm:$0xff] }
 0x1af   :  { %1613 = vmatpush.msrb.mxu3 %v1491_v24  ;;  %v1738_v24 = vld [vmem:[#allocation13 + $0x68] sm:$0xff] }
 0x1b0   :  { %1676 = vmatpush.msra.mxu2 %v1472_v60 }
 0x1b1   :  { %1690 = vmatpush.msra.mxu3 %v1522_v4  ;;  %v1737_v4 = vld [vmem:[#allocation13 + $0x60] sm:$0xff] }
 0x1b2   :  { %1677 = vmatpush.msra.mxu2 %v1470_v2 }
 0x1b3   :  { %1640 = vmatmul.f32.gmra.mxu0 %v4530_v25  ;;  %v1158_v25 = vpop.f32.mrf.mxu2  ;;  %1691 = vmatpush.msra.mxu3 %v1520_v57  ;;  %v1732_v57 = vld [vmem:[#allocation13 + $0x38] sm:$0xff] }
 0x1b4   :  { %1678 = vmatpush.msra.mxu2 %v1468_v20 }
 0x1b5   :  { %1663 = vmatmul.f32.gmra.mxu1 %v4528_v0  ;;  %v1136_v0 = vadd.f32 %v1135_v59, %v1113_v56  ;;  %v1115_v5 = vpop.f32.mrf.mxu0  ;;  %1692 = vmatpush.msra.mxu3 %v1518_v34  ;;  %v1731_v34 = vld [vmem:[#allocation13 + $0x30] sm:$0xff] }
 0x1b6   :  { %1679 = vmatpush.msra.mxu2 %v1466_v22  ;;  %v1116_v41 = vadd.f32 %v1115_v5, %v1093_v10 }
 0x1b7   :  { %v1159_v46 = vadd.f32 %v1158_v25, %v1136_v0  ;;  %1693 = vmatpush.msra.mxu3 %v1516_v35  ;;  %v1752_v35 = vld [vmem:[#allocation13 + $0xd8] sm:$0xff] }
 0x1b8   :  { %1680 = vmatpush.msra.mxu2 %v1464_v23 }
 0x1b9   :  { %v1182_v15 = vadd.f32 %v1181_v40, %v1159_v46  ;;  %1694 = vmatpush.msra.mxu3 %v1514_v43  ;;  %v1727_v43 = vld [vmem:[#allocation13 + $0x10] sm:$0xff] }
 0x1ba   :  { %1681 = vmatpush.msra.mxu2 %v1462_v14 }
 0x1bb   :  { %1695 = vmatpush.msra.mxu3 %v1512_v39  ;;  %v1726_v39 = vld [vmem:[#allocation13 + $0x8] sm:$0xff] }
 0x1bc   :  { %v1138_v27 = vpop.f32.mrf.mxu1  ;;  %1682 = vmatpush.msra.mxu2 %v1460_v21  ;;  %v1740_v21 = vld [vmem:[#allocation13 + $0x78] sm:$0xff] }
 0x1bd   :  { %v1204_v28 = vpop.f32.mrf.mxu0  ;;  %v1161_v29 = vpop.f32.mrf.mxu2  ;;  %v1139_v45 = vadd.f32 %v1138_v27, %v1116_v41  ;;  %1696 = vmatpush.msra.mxu3 %v1510_v42  ;;  %1761 = vmatpush.msrb.mxu0 %v1740_v21  ;;  %v1735_v27 = vld [vmem:[#allocation13 + $0x50] sm:$0xff]  ;;  %v1750_v42 = vld [vmem:[#allocation13 + $0xc8] sm:$0xff] }
 0x1be   :  { %v1205_v13 = vadd.f32 %v1204_v28, %v1182_v15 }
 0x1bf   :  { %v1162_v30 = vadd.f32 %v1161_v29, %v1139_v45  ;;  %1697 = vmatpush.msra.mxu3 %v1508_v44  ;;  %v1734_v29 = vld [vmem:[#allocation13 + $0x48] sm:$0xff]  ;;  %v1756_v45 = vld [vmem:[#allocation13 + $0xf8] sm:$0xff]  ;;  %v1725_v44 = vld [vmem:[#allocation13] sm:$0xff] }
 0x1c0   :  { %v1381_v26 = vmul.f32 0.2, %v1205_v13  ;;  %vm1373_vm4 = vcmp.gt.f32.partialorder %v1205_v13, 0.0  ;;  %v1184_v31 = vpop.f32.mrf.mxu3  ;;  %1784 = vmatpush.msrb.mxu1 %v1756_v45 }
 0x1c1   :  { %v1185_v33 = vadd.f32 %v1184_v31, %v1162_v30  ;;  %1698 = vmatpush.msra.mxu3 %v1506_v58  ;;  %v1755_v30 = vld [vmem:[#allocation13 + $0xf0] sm:$0xff]  ;;  %v1754_v31 = vld [vmem:[#allocation13 + $0xe8] sm:$0xff]  ;;  %v1748_v58 = vld [vmem:[#allocation13 + $0xb8] sm:$0xff] }
 0x1c2   :  { %v1389_v48 = vsel %vm1373_vm4, %v1205_v13, %v1381_v26  ;;  %v1739_v13 = vld [vmem:[#allocation13 + $0x70] sm:$0xff]  ;;  %v1736_v26 = vld [vmem:[#allocation13 + $0x58] sm:$0xff]  ;;  %1785 = vmatpush.msrb.mxu1 %v1755_v30 }
 0x1c3   :  { %1591 = vmatmul.f32.vlgmr.msrb.gmra.mxu2 %v1389_v48  ;;  %1699 = vmatpush.msra.mxu3 %v1504_v49  ;;  %v1747_v49 = vld [vmem:[#allocation13 + $0xb0] sm:$0xff] }
 0x1c4   :  { %1762 = vmatpush.msrb.mxu0 %v1739_v13  ;;  %1786 = vmatpush.msrb.mxu1 %v1754_v31 }
 0x1c5   :  { %v1207_v62 = vpop.f32.mrf.mxu0  ;;  %1700 = vmatpush.msra.mxu3 %v1502_v51  ;;  %v1744_v51 = vld [vmem:[#allocation13 + $0x98] sm:$0xff] }
 0x1c6   :  { %v1208_v37 = vadd.f32 %v1207_v62, %v1185_v33  ;;  %1763 = vmatpush.msrb.mxu0 %v1738_v24  ;;  %v1753_v33 = vld [vmem:[#allocation13 + $0xe0] sm:$0xff]  ;;  %v1730_v62 = vld [vmem:[#allocation13 + $0x28] sm:$0xff] }
 0x1c7   :  { %1701 = vmatpush.msra.mxu3 %v1500_v6  ;;  %1787 = vmatpush.msrb.mxu1 %v1753_v33 }
 0x1c8   :  { %vm1377_vm5 = vcmp.gt.f32.partialorder %v1208_v37, 0.0  ;;  %v1385_v38 = vmul.f32 0.2, %v1208_v37  ;;  %1764 = vmatpush.msrb.mxu0 %v1737_v4 }
 0x1c9   :  { %1702 = vmatpush.msra.mxu3 %v1498_v55  ;;  %1788 = vmatpush.msrb.mxu1 %v1752_v35  ;;  %v1523_v55 = vld [vmem:[#allocation11] sm:$0x3]  ;;  %v3753_v35 = vld [vmem:[#allocation14] ss:$0 sm:$0xff] }
 0x1ca   :  { %v1393_v19 = vsel %vm1377_vm5, %v1208_v37, %v1385_v38  ;;  %1765 = vmatpush.msrb.mxu0 %v1736_v26  ;;  %v1729_v37 = vld [vmem:[#allocation13 + $0x20] sm:$0xff]  ;;  %v1728_v38 = vld [vmem:[#allocation13 + $0x18] sm:$0xff] }
 0x1cb   :  { %1594 = vmatmul.f32.gmra.mxu2 %v1393_v19  ;;  %1703 = vmatpush.msra.mxu3 %v1496_v16 }
 0x1cc   :  { %1766 = vmatpush.msrb.mxu0 %v1735_v27 }
 0x1cd   :  { %1704 = vmatpush.msra.mxu3 %v1494_v18 }
 0x1ce   :  { %v1227_v47 = vpop.f32.mrf.mxu1  ;;  %1767 = vmatpush.msrb.mxu0 %v1734_v29 }
 0x1cf   :  { %v1228_v54 = vadd.f32 %v1227_v47, %v722_v50  ;;  %1705 = vmatpush.msra.mxu3 %v1492_v12  ;;  %v1749_v47 = vld [vmem:[#allocation13 + $0xc0] sm:$0xff] }
 0x1d1   :  { %v1250_v9 = vpop.f32.mrf.mxu2 }
 0x1d2   :  { %v1251_v53 = vadd.f32 %v1250_v9, %v1228_v54  ;;  %v1745_v9 = vld [vmem:[#allocation13 + $0xa0] sm:$0xff]  ;;  %v1742_v54 = vld [vmem:[#allocation13 + $0x88] sm:$0xff] }
 0x1d3   :  { %1683 = vmatmul.f32.vlgmr.msra.gmra.mxu2 %v1389_v48  ;;  %v1733_v48 = vld [vmem:[#allocation13 + $0x40] sm:$0xff] }
 0x1d4   :  { %v1273_v52 = vpop.f32.mrf.mxu3  ;;  %1768 = vmatpush.msrb.mxu0 %v1733_v48 }
 0x1d5   :  { %v1274_v63 = vadd.f32 %v1273_v52, %v1251_v53  ;;  %v1743_v52 = vld [vmem:[#allocation13 + $0x90] sm:$0xff]  ;;  %v1525_v53 = vperm.slane %v1523_v55, 0 }
 0x1d6   :  { %1769 = vmatpush.msrb.mxu0 %v1732_v57 }
 0x1d8   :  { %1770 = vmatpush.msrb.mxu0 %v1731_v34 }
 0x1d9   :  { %v1253_v32 = vpop.f32.mrf.mxu2 }
 0x1da   :  { %1771 = vmatpush.msrb.mxu0 %v1730_v62 }
 0x1db   :  { %1686 = vmatmul.f32.gmra.mxu2 %v1393_v19  ;;  %v1751_v19 = vld [vmem:[#allocation13 + $0xd0] sm:$0xff] }
 0x1dc   :  { %v1276_v56 = vpop.f32.mrf.mxu3  ;;  %1772 = vmatpush.msrb.mxu0 %v1729_v37  ;;  %1789 = vmatpush.msrb.mxu1 %v1751_v19 }
 0x1de   :  { %1773 = vmatpush.msrb.mxu0 %v1728_v38  ;;  %1790 = vmatpush.msrb.mxu1 %v1750_v42 }
 0x1e0   :  { %v1230_v3 = vpop.f32.mrf.mxu1  ;;  %1774 = vmatpush.msrb.mxu0 %v1727_v43  ;;  %1791 = vmatpush.msrb.mxu1 %v1749_v47 }
 0x1e1   :  { %v1231_v59 = vadd.f32 %v1230_v3, %v722_v50  ;;  %v1746_v50 = vld [vmem:[#allocation13 + $0xa8] sm:$0xff]  ;;  %v1741_v3 = vld [vmem:[#allocation13 + $0x80] sm:$0xff] }
 0x1e2   :  { %1775 = vmatpush.msrb.mxu0 %v1726_v39  ;;  %1792 = vmatpush.msrb.mxu1 %v1748_v58 }
 0x1e3   :  { %v1254_v2 = vadd.f32 %v1253_v32, %v1231_v59 }
 0x1e4   :  { %1776 = vmatpush.msrb.mxu0 %v1725_v44  ;;  %1793 = vmatpush.msrb.mxu1 %v1747_v49 }
 0x1e5   :  { %v1277_v25 = vadd.f32 %v1276_v56, %v1254_v2  ;;  %v1807_v56 = vld [vmem:[#allocation5] sm:$0xff] }
 0x1e6   :  { %1794 = vmatpush.msrb.mxu1 %v1746_v50  ;;  %1811 = vrot.lane.b32.xlu0 %v1807_v56, %s4251_s13  ;;  %v4253_v50 = vmov 0   ;;  %v1942_v56 = vld [vmem:[#allocation19 + $0x180] sm:$0xff] }
 0x1e7   :  { %3748 = vset.pattern.permute.xlu2 %v4253_v50  ;;  %3750 = vset.pattern.permute.xlu0 %v4253_v50  ;;  %v1899_v50 = vld [vmem:[#allocation19 + $0x28] sm:$0xff] }
 0x1e8   :  { %1795 = vmatpush.msrb.mxu1 %v1745_v9  ;;  %v4254_v9 = vmov 1  }
 0x1e9   :  { %v1319_v1 = vpop.f32.mrf.mxu1  ;;  %3751 = vset.pattern.permute.xlu1 %v4254_v9 }
 0x1ea   :  { %1796 = vmatpush.msrb.mxu1 %v1744_v51  ;;  %v1954_v51 = vld [vmem:[#allocation19 + $0x1e0] sm:$0xff] }
 0x1eb   :  { %2032 = vmatpush.msrb.mxu2 %v1954_v51  ;;  %v1894_v51 = vld [vmem:[#allocation19] sm:$0xff] }
 0x1ec   :  { %v1296_v60 = vpop.f32.mrf.mxu0  ;;  %1797 = vmatpush.msrb.mxu1 %v1743_v52  ;;  %v1955_v52 = vld [vmem:[#allocation19 + $0x1e8] sm:$0xff] }
 0x1ed   :  { %v1297_v61 = vadd.f32 %v1296_v60, %v1274_v63  ;;  %2078 = vmatpush.msra.mxu0 %v1955_v52  ;;  %v1895_v52 = vld [vmem:[#allocation19 + $0x8] sm:$0xff] }
 0x1ee   :  { %v1342_v5 = vpop.f32.mrf.mxu2  ;;  %1798 = vmatpush.msrb.mxu1 %v1742_v54  ;;  %v2019_v54 = vld [vmem:[#allocation19 + $0x3e8] sm:$0xff] }
 0x1ef   :  { %v1320_v0 = vadd.f32 %v1319_v1, %v1297_v61 }
 0x1f0   :  { %1799 = vmatpush.msrb.mxu1 %v1741_v3  ;;  %v2014_v3 = vld [vmem:[#allocation19 + $0x3c0] sm:$0xff] }
 0x1f1   :  { %v1343_v7 = vadd.f32 %v1342_v5, %v1320_v0 }
 0x1f2   :  { %v1365_v8 = vpop.f32.mrf.mxu3  ;;  %v1322_v10 = vpop.f32.mrf.mxu1  ;;  %2101 = vmatpush.msra.mxu1 %v2019_v54  ;;  %v1959_v54 = vld [vmem:[#allocation19 + $0x208] sm:$0xff] }
 0x1f3   :  { %v1366_v46 = vadd.f32 %v1365_v8, %v1343_v7  ;;  %v1526_v8 = vperm.slane %v1523_v55, 1  ;;  %v1950_v55 = vld [vmem:[#allocation19 + $0x1c0] sm:$0xff] }
 0x1f4   :  { %v1299_v20 = vpop.f32.mrf.mxu0  ;;  %2033 = vmatpush.msrb.mxu2 %v1950_v55  ;;  %v1956_v55 = vld [vmem:[#allocation19 + $0x1f0] sm:$0xff] }
 0x1f5   :  { %v1300_v22 = vadd.f32 %v1299_v20, %v1277_v25  ;;  %v1382_v40 = vmul.f32 0.2, %v1366_v46  ;;  %vm1374_vm6 = vcmp.gt.f32.partialorder %v1366_v46, 0.0  ;;  %v1808_v25 = vld [vmem:[#allocation5 + $0x8] sm:$0xff] }
 0x1f6   :  { %v1345_v14 = vpop.f32.mrf.mxu2  ;;  %1813 = vrot.lane.b32.xlu0 %v1808_v25, %s4251_s13  ;;  %v1998_v25 = vld [vmem:[#allocation19 + $0x340] sm:$0xff] }
 0x1f7   :  { %v1323_v23 = vadd.f32 %v1322_v10, %v1300_v22  ;;  %v1390_v11 = vsel %vm1374_vm6, %v1366_v46, %v1382_v40 }
 0x1f8   :  { %1614 = vmatmul.f32.vlgmr.msrb.gmra.mxu3 %v1390_v11 }
 0x1f9   :  { %v1346_v15 = vadd.f32 %v1345_v14, %v1323_v23 }
 0x1fa   :  { %v1368_v17 = vpop.f32.mrf.mxu3 }
 0x1fb   :  { %v1369_v36 = vadd.f32 %v1368_v17, %v1346_v15 }
 0x1fd   :  { %vm1378_vm7 = vcmp.gt.f32.partialorder %v1369_v36, 0.0  ;;  %v1386_v41 = vmul.f32 0.2, %v1369_v36 }
 0x1ff   :  { %v1394_v28 = vsel %vm1378_vm7, %v1369_v36, %v1386_v41 }
 0x200   :  { %1617 = vmatmul.f32.gmra.mxu3 %v1394_v28 }
 0x208   :  { %1706 = vmatmul.f32.vlgmr.msra.gmra.mxu3 %v1390_v11  ;;  %v1546_v6 = vpop.f32.mrf.mxu0 }
 0x209   :  { %v1547_v32 = vadd.f32 %v1546_v6, %v1525_v53  ;;  %v2018_v6 = vld [vmem:[#allocation19 + $0x3e0] sm:$0xff] }
 0x20a   :  { %v1569_v18 = vpop.f32.mrf.mxu1  ;;  %2055 = vmatpush.msrb.mxu3 %v2018_v6  ;;  %v1958_v6 = vld [vmem:[#allocation19 + $0x200] sm:$0xff] }
 0x20b   :  { %v1570_v63 = vadd.f32 %v1569_v18, %v1547_v32  ;;  %v1946_v18 = vld [vmem:[#allocation19 + $0x1a0] sm:$0xff] }
 0x20c   :  { %2056 = vmatpush.msrb.mxu3 %v2014_v3  ;;  %v2010_v32 = vld [vmem:[#allocation19 + $0x3a0] sm:$0xff]  ;;  %2034 = vmatpush.msrb.mxu2 %v1946_v18  ;;  %v2020_v3 = vld [vmem:[#allocation19 + $0x3f0] sm:$0xff] }
 0x20d   :  { %v1952_v18 = vld [vmem:[#allocation19 + $0x1d0] sm:$0xff] }
 0x20e   :  { %2057 = vmatpush.msrb.mxu3 %v2010_v32  ;;  %2035 = vmatpush.msrb.mxu2 %v1942_v56  ;;  %v2016_v32 = vld [vmem:[#allocation19 + $0x3d0] sm:$0xff] }
 0x20f   :  { %v1948_v56 = vld [vmem:[#allocation19 + $0x1b0] sm:$0xff] }
 0x210   :  { %1709 = vmatmul.f32.gmra.mxu3 %v1394_v28  ;;  %v1549_v12 = vpop.f32.mrf.mxu0 }
 0x211   :  { %v1550_v0 = vadd.f32 %v1549_v12, %v1525_v53  ;;  %v2015_v53 = vld [vmem:[#allocation19 + $0x3c8] sm:$0xff] }
 0x212   :  { %v1572_v2 = vpop.f32.mrf.mxu1  ;;  %v1947_v12 = vld [vmem:[#allocation19 + $0x1a8] sm:$0xff]  ;;  %2102 = vmatpush.msra.mxu1 %v2015_v53  ;;  %v2021_v53 = vld [vmem:[#allocation19 + $0x3f8] sm:$0xff] }
 0x213   :  { %v1573_v20 = vadd.f32 %v1572_v2, %v1550_v0  ;;  %v2002_v2 = vld [vmem:[#allocation19 + $0x360] sm:$0xff]  ;;  %v1939_v0 = vld [vmem:[#allocation19 + $0x168] sm:$0xff] }
 0x228   :  { %v1638_v7 = vpop.f32.mrf.mxu0 }
 0x229   :  { %v1639_v40 = vadd.f32 %v1638_v7, %v1526_v8  ;;  %v1934_v7 = vld [vmem:[#allocation19 + $0x140] sm:$0xff] }
 0x22a   :  { %v1661_v11 = vpop.f32.mrf.mxu1 }
 0x22b   :  { %v1662_v17 = vadd.f32 %v1661_v11, %v1639_v40  ;;  %v1995_v40 = vld [vmem:[#allocation19 + $0x328] sm:$0xff] }
 0x230   :  { %v1641_v41 = vpop.f32.mrf.mxu0 }
 0x231   :  { %v1642_v13 = vadd.f32 %v1641_v41, %v1526_v8  ;;  %v1999_v8 = vld [vmem:[#allocation19 + $0x348] sm:$0xff] }
 0x232   :  { %v1664_v26 = vpop.f32.mrf.mxu1  ;;  %v1927_v41 = vld [vmem:[#allocation19 + $0x108] sm:$0xff] }
 0x233   :  { %v1665_v29 = vadd.f32 %v1664_v26, %v1642_v13  ;;  %v1986_v13 = vld [vmem:[#allocation19 + $0x2e0] sm:$0xff] }
 0x234   :  { %v1918_v26 = vld [vmem:[#allocation19 + $0xc0] sm:$0xff] }
 0x246   :  { %v1592_v16 = vpop.f32.mrf.mxu2 }
 0x247   :  { %v1593_v59 = vadd.f32 %v1592_v16, %v1570_v63  ;;  %v1951_v16 = vld [vmem:[#allocation19 + $0x1c8] sm:$0xff] }
 0x248   :  { %v2011_v63 = vld [vmem:[#allocation19 + $0x3a8] sm:$0xff]  ;;  %2079 = vmatpush.msra.mxu0 %v1951_v16  ;;  %v1957_v16 = vld [vmem:[#allocation19 + $0x1f8] sm:$0xff] }
 0x249   :  { %2103 = vmatpush.msra.mxu1 %v2011_v63  ;;  %v2017_v63 = vld [vmem:[#allocation19 + $0x3d8] sm:$0xff] }
 0x24a   :  { %2080 = vmatpush.msra.mxu0 %v1947_v12  ;;  %v1953_v12 = vld [vmem:[#allocation19 + $0x1d8] sm:$0xff] }
 0x24e   :  { %v1595_v60 = vpop.f32.mrf.mxu2 }
 0x24f   :  { %v1596_v46 = vadd.f32 %v1595_v60, %v1573_v20  ;;  %v1943_v60 = vld [vmem:[#allocation19 + $0x188] sm:$0xff] }
 0x250   :  { %2081 = vmatpush.msra.mxu0 %v1943_v60  ;;  %v1935_v20 = vld [vmem:[#allocation19 + $0x148] sm:$0xff]  ;;  %v1949_v60 = vld [vmem:[#allocation19 + $0x1b8] sm:$0xff] }
 0x252   :  { %2082 = vmatpush.msra.mxu0 %v1939_v0  ;;  %v1945_v0 = vld [vmem:[#allocation19 + $0x198] sm:$0xff] }
 0x254   :  { %2083 = vmatpush.msra.mxu0 %v1935_v20  ;;  %v1941_v20 = vld [vmem:[#allocation19 + $0x178] sm:$0xff] }
 0x256   :  { %v1684_v14 = vpop.f32.mrf.mxu2 }
 0x257   :  { %v1685_v28 = vadd.f32 %v1684_v14, %v1662_v17  ;;  %v1926_v17 = vld [vmem:[#allocation19 + $0x100] sm:$0xff] }
 0x258   :  { %v1812_v62 = vpop.permute.xlu0 %1811 }
 0x25e   :  { %v1687_v27 = vpop.f32.mrf.mxu2 }
 0x25f   :  { %v1688_v48 = vadd.f32 %v1687_v27, %v1665_v29  ;;  %v1982_v27 = vld [vmem:[#allocation19 + $0x2c0] sm:$0xff]  ;;  %v1919_v29 = vld [vmem:[#allocation19 + $0xc8] sm:$0xff] }
 0x268   :  { %v1814_v47 = vpop.permute.xlu0 %1813 }
 0x27b   :  { %v1615_v61 = vpop.f32.mrf.mxu3 }
 0x27c   :  { %v1616_v1 = vadd.f32 %v1615_v61, %v1593_v59  ;;  %v2006_v59 = vld [vmem:[#allocation19 + $0x380] sm:$0xff]  ;;  %v2007_v61 = vld [vmem:[#allocation19 + $0x388] sm:$0xff] }
 0x27d   :  { %2058 = vmatpush.msrb.mxu3 %v2006_v59  ;;  %2104 = vmatpush.msra.mxu1 %v2007_v61  ;;  %v2012_v59 = vld [vmem:[#allocation19 + $0x3b0] sm:$0xff]  ;;  %v2013_v61 = vld [vmem:[#allocation19 + $0x3b8] sm:$0xff] }
 0x27e   :  { %vm1713_vm8 = vcmp.gt.f32.partialorder %v1616_v1, 0.0  ;;  %v1717_v5 = vmul.f32 0.2, %v1616_v1 }
 0x27f   :  { %2059 = vmatpush.msrb.mxu3 %v2002_v2  ;;  %v2008_v2 = vld [vmem:[#allocation19 + $0x390] sm:$0xff] }
 0x280   :  { %v1721_v22 = vsel %vm1713_vm8, %v1616_v1, %v1717_v5  ;;  %v1938_v1 = vld [vmem:[#allocation19 + $0x160] sm:$0xff]  ;;  %v2003_v5 = vld [vmem:[#allocation19 + $0x368] sm:$0xff] }
 0x281   :  { %1777 = vmatmul.f32.vlgmr.msrb.gmra.mxu0 %v1721_v22  ;;  %2036 = vmatpush.msrb.mxu2 %v1938_v1  ;;  %v1930_v22 = vld [vmem:[#allocation19 + $0x120] sm:$0xff]  ;;  %v1944_v1 = vld [vmem:[#allocation19 + $0x190] sm:$0xff] }
 0x282   :  { %2105 = vmatpush.msra.mxu1 %v2003_v5  ;;  %2060 = vmatpush.msrb.mxu3 %v1998_v25  ;;  %v2009_v5 = vld [vmem:[#allocation19 + $0x398] sm:$0xff]  ;;  %v2004_v25 = vld [vmem:[#allocation19 + $0x370] sm:$0xff] }
 0x283   :  { %v1618_v10 = vpop.f32.mrf.mxu3  ;;  %2037 = vmatpush.msrb.mxu2 %v1934_v7  ;;  %v1940_v7 = vld [vmem:[#allocation19 + $0x170] sm:$0xff] }
 0x284   :  { %v1619_v23 = vadd.f32 %v1618_v10, %v1596_v46  ;;  %v1994_v46 = vld [vmem:[#allocation19 + $0x320] sm:$0xff]  ;;  %v1931_v10 = vld [vmem:[#allocation19 + $0x128] sm:$0xff]  ;;  %2106 = vmatpush.msra.mxu1 %v1999_v8  ;;  %v2005_v8 = vld [vmem:[#allocation19 + $0x378] sm:$0xff] }
 0x285   :  { %2038 = vmatpush.msrb.mxu2 %v1930_v22  ;;  %2061 = vmatpush.msrb.mxu3 %v1994_v46  ;;  %v1936_v22 = vld [vmem:[#allocation19 + $0x150] sm:$0xff] }
 0x286   :  { %vm1715_vm9 = vcmp.gt.f32.partialorder %v1619_v23, 0.0  ;;  %v1719_v15 = vmul.f32 0.2, %v1619_v23  ;;  %2084 = vmatpush.msra.mxu0 %v1931_v10  ;;  %2107 = vmatpush.msra.mxu1 %v1995_v40  ;;  %v2000_v46 = vld [vmem:[#allocation19 + $0x350] sm:$0xff]  ;;  %v1937_v10 = vld [vmem:[#allocation19 + $0x158] sm:$0xff] }
 0x287   :  { %2039 = vmatpush.msrb.mxu2 %v1926_v17  ;;  %v2001_v40 = vld [vmem:[#allocation19 + $0x358] sm:$0xff] }
 0x288   :  { %v1723_v36 = vsel %vm1715_vm9, %v1619_v23, %v1719_v15  ;;  %2085 = vmatpush.msra.mxu0 %v1927_v41  ;;  %v1997_v17 = vld [vmem:[#allocation19 + $0x338] sm:$0xff]  ;;  %v1928_v41 = vld [vmem:[#allocation19 + $0x110] sm:$0xff] }
 0x289   :  { %1780 = vmatmul.f32.gmra.mxu0 %v1723_v36  ;;  %v1990_v36 = vld [vmem:[#allocation19 + $0x300] sm:$0xff] }
 0x28a   :  { %2062 = vmatpush.msrb.mxu3 %v1990_v36  ;;  %v4553_v36 = vld [vmem:[#allocation16] ss:$2 sm:$0x3] }
 0x28b   :  { %v1707_v21 = vpop.f32.mrf.mxu3 }
 0x28c   :  { %v1708_v24 = vadd.f32 %v1707_v21, %v1685_v28  ;;  %v1991_v28 = vld [vmem:[#allocation19 + $0x308] sm:$0xff]  ;;  %v1922_v21 = vld [vmem:[#allocation19 + $0xe0] sm:$0xff]  ;;  %2063 = vmatpush.msrb.mxu3 %v1986_v13  ;;  %v4555_v13 = vld [vmem:[#allocation16 + $0x1] ss:$2 sm:$0x3] }
 0x28d   :  { %2108 = vmatpush.msra.mxu1 %v1991_v28  ;;  %2040 = vmatpush.msrb.mxu2 %v1922_v21  ;;  %v1992_v28 = vld [vmem:[#allocation19 + $0x310] sm:$0xff]  ;;  %v1929_v21 = vld [vmem:[#allocation19 + $0x118] sm:$0xff] }
 0x28e   :  { %vm1714_vm10 = vcmp.gt.f32.partialorder %v1708_v24, 0.0  ;;  %v1718_v4 = vmul.f32 0.2, %v1708_v24  ;;  %2064 = vmatpush.msrb.mxu3 %v1982_v27  ;;  %v1925_v27 = vld [vmem:[#allocation19 + $0xf8] sm:$0xff] }
 0x28f   :  { %2041 = vmatpush.msrb.mxu2 %v1918_v26  ;;  %v1988_v26 = vld [vmem:[#allocation19 + $0x2f0] sm:$0xff] }
 0x290   :  { %v1722_v45 = vsel %vm1714_vm10, %v1708_v24, %v1718_v4  ;;  %v1923_v24 = vld [vmem:[#allocation19 + $0xe8] sm:$0xff] }
 0x291   :  { %1800 = vmatmul.f32.vlgmr.msrb.gmra.mxu1 %v1722_v45  ;;  %v1987_v4 = vld [vmem:[#allocation19 + $0x2e8] sm:$0xff]  ;;  %2086 = vmatpush.msra.mxu0 %v1923_v24  ;;  %v1993_v24 = vld [vmem:[#allocation19 + $0x318] sm:$0xff] }
 0x292   :  { %v1983_v45 = vld [vmem:[#allocation19 + $0x2c8] sm:$0xff]  ;;  %2109 = vmatpush.msra.mxu1 %v1987_v4  ;;  %v1924_v4 = vld [vmem:[#allocation19 + $0xf0] sm:$0xff] }
 0x293   :  { %v1710_v30 = vpop.f32.mrf.mxu3  ;;  %2087 = vmatpush.msra.mxu0 %v1919_v29  ;;  %v1841_v29 = vperm.slane %v4553_v36, 0 }
 0x294   :  { %v1711_v31 = vadd.f32 %v1710_v30, %v1688_v48  ;;  %v1914_v48 = vld [vmem:[#allocation19 + $0xa0] sm:$0xff]  ;;  %2110 = vmatpush.msra.mxu1 %v1983_v45  ;;  %v4558_v45 = vld [vmem:[#allocation17] sm:$0x3] }
 0x295   :  { %v1978_v30 = vld [vmem:[#allocation19 + $0x2a0] sm:$0xff]  ;;  %2042 = vmatpush.msrb.mxu2 %v1914_v48  ;;  %v1989_v48 = vld [vmem:[#allocation19 + $0x2f8] sm:$0xff] }
 0x296   :  { %vm1716_vm11 = vcmp.gt.f32.partialorder %v1711_v31, 0.0  ;;  %v1720_v57 = vmul.f32 0.2, %v1711_v31  ;;  %2065 = vmatpush.msrb.mxu3 %v1978_v30  ;;  %v1842_v30 = vperm.slane %v4553_v36, 1  ;;  %v2674_v36 = vld [vmem:[#allocation22 + $0xd90] sm:$0xff] }
 0x298   :  { %v1724_v33 = vsel %vm1716_vm11, %v1711_v31, %v1720_v57  ;;  %v1915_v31 = vld [vmem:[#allocation19 + $0xa8] sm:$0xff] }
 0x299   :  { %1803 = vmatmul.f32.gmra.mxu1 %v1724_v33  ;;  %v1979_v57 = vld [vmem:[#allocation19 + $0x2a8] sm:$0xff]  ;;  %2088 = vmatpush.msra.mxu0 %v1915_v31  ;;  %v1910_v33 = vld [vmem:[#allocation19 + $0x80] sm:$0xff]  ;;  %v1860_v31 = vperm.slane %v4555_v13, 0 }
 0x29a   :  { %2111 = vmatpush.msra.mxu1 %v1979_v57  ;;  %2043 = vmatpush.msrb.mxu2 %v1910_v33  ;;  %v1861_v57 = vperm.slane %v4555_v13, 1  ;;  %v1920_v33 = vld [vmem:[#allocation19 + $0xd0] sm:$0xff] }
 0x29b   :  { %v2310_v13 = vld [vmem:[#allocation22 + $0x230] sm:$0xff] }
 0x2fe   :  { %v1778_v34 = vpop.f32.mrf.mxu0 }
 0x2ff   :  { %v1779_v37 = vadd.f32 %v3753_v35, %v1778_v34  ;;  %v1974_v34 = vld [vmem:[#allocation19 + $0x280] sm:$0xff] }
 0x300   :  { %2066 = vmatpush.msrb.mxu3 %v1974_v34  ;;  %v1984_v34 = vld [vmem:[#allocation19 + $0x2d0] sm:$0xff] }
 0x306   :  { %v1781_v39 = vpop.f32.mrf.mxu0 }
 0x307   :  { %v1782_v42 = vadd.f32 %v3753_v35, %v1781_v39  ;;  %v1911_v35 = vld [vmem:[#allocation19 + $0x88] sm:$0xff]  ;;  %v1902_v39 = vld [vmem:[#allocation19 + $0x40] sm:$0xff] }
 0x308   :  { %2089 = vmatpush.msra.mxu0 %v1911_v35  ;;  %v1921_v35 = vld [vmem:[#allocation19 + $0xd8] sm:$0xff] }
 0x30e   :  { %v1801_v38 = vpop.f32.mrf.mxu1 }
 0x30f   :  { %v4540_v43 = vadd.f32 %v1801_v38, %v1779_v37  ;;  %v1906_v37 = vld [vmem:[#allocation19 + $0x60] sm:$0xff] }
 0x310   :  { %v1970_v38 = vld [vmem:[#allocation19 + $0x260] sm:$0xff]  ;;  %2044 = vmatpush.msrb.mxu2 %v1906_v37  ;;  %v1916_v37 = vld [vmem:[#allocation19 + $0xb0] sm:$0xff] }
 0x311   :  { %3628 = vst [vmem:[#allocation26] sm:$0xff] %v4540_v43  ;;  %v1817_v19 = vmul.f32 %v1812_v62, %v4540_v43  ;;  %v1975_v62 = vld [vmem:[#allocation19 + $0x288] sm:$0xff]  ;;  %2067 = vmatpush.msrb.mxu3 %v1970_v38  ;;  %v1980_v38 = vld [vmem:[#allocation19 + $0x2b0] sm:$0xff] }
 0x312   :  { %2112 = vmatpush.msra.mxu1 %v1975_v62  ;;  %2045 = vmatpush.msrb.mxu2 %v1902_v39  ;;  %v1985_v62 = vld [vmem:[#allocation19 + $0x2d8] sm:$0xff] }
 0x313   :  { %1821 = vrot.lane.b32.xlu1 %v1817_v19, %s4252_s0  ;;  %v1971_v19 = vld [vmem:[#allocation19 + $0x268] sm:$0xff] }
 0x314   :  { %2113 = vmatpush.msra.mxu1 %v1971_v19  ;;  %v1981_v19 = vld [vmem:[#allocation19 + $0x2b8] sm:$0xff] }
 0x316   :  { %v1804_v44 = vpop.f32.mrf.mxu1 }
 0x317   :  { %v4544_v58 = vadd.f32 %v1804_v44, %v1782_v42  ;;  %v1966_v42 = vld [vmem:[#allocation19 + $0x240] sm:$0xff]  ;;  %v1903_v44 = vld [vmem:[#allocation19 + $0x48] sm:$0xff] }
 0x318   :  { %2068 = vmatpush.msrb.mxu3 %v1966_v42  ;;  %v1874_v42 = vperm.slane %v4558_v45, 0 }
 0x319   :  { %3629 = vst [vmem:[#allocation26 + $0x8] sm:$0xff] %v4544_v58  ;;  %v1818_v49 = vmul.f32 %v1814_v47, %v4544_v58  ;;  %v1967_v47 = vld [vmem:[#allocation19 + $0x248] sm:$0xff] }
 0x31a   :  { %2114 = vmatpush.msra.mxu1 %v1967_v47  ;;  %v1912_v47 = vld [vmem:[#allocation19 + $0x90] sm:$0xff]  ;;  %3655 = dma.vmem_to_hbm [thread:$0]  %s3648_s9, 256, %s3650_s20, [#allocation27], %s4230_s26, %s4230_s26, %s4231_s27  }
 0x31b   :  { %1823 = vrot.lane.b32.xlu1 %v1818_v49, %s4252_s0  ;;  %v1962_v49 = vld [vmem:[#allocation19 + $0x220] sm:$0xff]  ;;  %s3634_s26 = sshll.u32 %s4256_s15, 4  ;;  %s3635_s26 = int_to_ptr.vmem [resolvable:$true] %s3634_s26 }
 0x31c   :  { %2069 = vmatpush.msrb.mxu3 %v1962_v49 }
 0x31e   :  { %2070 = vmatpush.msrb.mxu3 %v1958_v6  ;;  %v1913_v6 = vld [vmem:[#allocation19 + $0x98] sm:$0xff] }
 0x320   :  { %2147 = vmatpush.msra.mxu3 %v2020_v3  ;;  %v1908_v3 = vld [vmem:[#allocation19 + $0x70] sm:$0xff] }
 0x322   :  { %2148 = vmatpush.msra.mxu3 %v2016_v32  ;;  %v1904_v32 = vld [vmem:[#allocation19 + $0x50] sm:$0xff] }
 0x324   :  { %2149 = vmatpush.msra.mxu3 %v2012_v59  ;;  %v1905_v59 = vld [vmem:[#allocation19 + $0x58] sm:$0xff] }
 0x326   :  { %2150 = vmatpush.msra.mxu3 %v2008_v2 }
 0x328   :  { %2151 = vmatpush.msra.mxu3 %v2004_v25  ;;  %v1901_v25 = vld [vmem:[#allocation19 + $0x38] sm:$0xff] }
 0x32a   :  { %2152 = vmatpush.msra.mxu3 %v2000_v46  ;;  %v1897_v46 = vld [vmem:[#allocation19 + $0x18] sm:$0xff] }
 0x385   :  { %v1822_v23 = vpop.permute.xlu1 %1821 }
 0x386   :  { %v1827_v11 = vadd.f32 %v1822_v23, %v4540_v43  ;;  %v1907_v43 = vld [vmem:[#allocation19 + $0x68] sm:$0xff]  ;;  %v1932_v23 = vld [vmem:[#allocation19 + $0x130] sm:$0xff] }
 0x387   :  { %2090 = vmatpush.msra.mxu0 %v1907_v43  ;;  %v1917_v43 = vld [vmem:[#allocation19 + $0xb8] sm:$0xff] }
 0x388   :  { %1832 = vperm.xlu2 %3748, %v1827_v11  }
 0x389   :  { %2091 = vmatpush.msra.mxu0 %v1903_v44 }
 0x38b   :  { %2092 = vmatpush.msra.mxu0 %v1899_v50  ;;  %v1875_v50 = vperm.slane %v4558_v45, 1  ;;  %v2408_v45 = vld [vmem:[#allocation22 + $0x540] sm:$0xff] }
 0x38d   :  { %v1824_v14 = vpop.permute.xlu1 %1823  ;;  %2093 = vmatpush.msra.mxu0 %v1895_v52  ;;  %v1977_v52 = vld [vmem:[#allocation19 + $0x298] sm:$0xff] }
 0x38e   :  { %v1828_v15 = vadd.f32 %v1824_v14, %v4544_v58  ;;  %v1898_v58 = vld [vmem:[#allocation19 + $0x20] sm:$0xff] }
 0x38f   :  { %2046 = vmatpush.msrb.mxu2 %v1898_v58  ;;  %2170 = vmatpush.msrb.mxu0 %v1957_v16  ;;  %v1976_v58 = vld [vmem:[#allocation19 + $0x290] sm:$0xff] }
 0x390   :  { %3749 = vset.pattern.permute.xlu2 %v4254_v9  ;;  %1856 = vperm.xlu1 %3751, %v1828_v15   ;;  %v1972_v16 = vld [vmem:[#allocation19 + $0x270] sm:$0xff] }
 0x391   :  { %1837 = vperm.xlu0 %3750, %v1828_v15   ;;  %1852 = vperm.xlu2 %3749, %v1827_v11   ;;  %v1996_v11 = vld [vmem:[#allocation19 + $0x330] sm:$0xff]  ;;  %v1933_v15 = vld [vmem:[#allocation19 + $0x138] sm:$0xff] }
 0x392   :  { %2047 = vmatpush.msrb.mxu2 %v1894_v51  ;;  %2171 = vmatpush.msrb.mxu0 %v1953_v12  ;;  %v1968_v12 = vld [vmem:[#allocation19 + $0x250] sm:$0xff] }
 0x393   :  { %2153 = vmatpush.msra.mxu3 %v1996_v11  ;;  %v2345_v11 = vld [vmem:[#allocation22 + $0x348] sm:$0xff] }
 0x394   :  { %2124 = vmatpush.msra.mxu2 %v1956_v55  ;;  %2172 = vmatpush.msrb.mxu0 %v1949_v60  ;;  %v1969_v60 = vld [vmem:[#allocation19 + $0x258] sm:$0xff] }
 0x395   :  { %2154 = vmatpush.msra.mxu3 %v1992_v28  ;;  %v2436_v28 = vld [vmem:[#allocation22 + $0x620] sm:$0xff] }
 0x396   :  { %2125 = vmatpush.msra.mxu2 %v1952_v18  ;;  %2173 = vmatpush.msrb.mxu0 %v1945_v0  ;;  %v1973_v18 = vld [vmem:[#allocation19 + $0x278] sm:$0xff] }
 0x397   :  { %2155 = vmatpush.msra.mxu3 %v1988_v26  ;;  %v2324_v26 = vld [vmem:[#allocation22 + $0x2a0] sm:$0xff] }
 0x398   :  { %2126 = vmatpush.msra.mxu2 %v1948_v56  ;;  %2174 = vmatpush.msrb.mxu0 %v1941_v20  ;;  %v1965_v20 = vld [vmem:[#allocation19 + $0x238] sm:$0xff] }
 0x399   :  { %3752 = vset.pattern.permute.xlu0 %v4254_v9  ;;  %v1963_v9 = vld [vmem:[#allocation19 + $0x228] sm:$0xff]  ;;  %2156 = vmatpush.msra.mxu3 %v1984_v34 }
 0x39a   :  { %2115 = vmatpush.msra.mxu1 %v1963_v9  ;;  %2127 = vmatpush.msra.mxu2 %v1944_v1  ;;  %v1964_v1 = vld [vmem:[#allocation19 + $0x230] sm:$0xff] }
 0x39b   :  { %2175 = vmatpush.msrb.mxu0 %v1937_v10  ;;  %2157 = vmatpush.msra.mxu3 %v1980_v38  ;;  %v1961_v10 = vld [vmem:[#allocation19 + $0x218] sm:$0xff]  ;;  %v2317_v34 = vld [vmem:[#allocation22 + $0x268] sm:$0xff] }
 0x39c   :  { %2116 = vmatpush.msra.mxu1 %v1959_v54  ;;  %2128 = vmatpush.msra.mxu2 %v1940_v7  ;;  %v2415_v38 = vld [vmem:[#allocation22 + $0x578] sm:$0xff] }
 0x39d   :  { %2176 = vmatpush.msrb.mxu0 %v1933_v15  ;;  %2158 = vmatpush.msra.mxu3 %v1976_v58  ;;  %v2443_v15 = vld [vmem:[#allocation22 + $0x658] sm:$0xff]  ;;  %v2569_v58 = vld [vmem:[#allocation22 + $0xa48] sm:$0xff] }
 0x39e   :  { %2193 = vmatpush.msrb.mxu1 %v2021_v53  ;;  %2129 = vmatpush.msra.mxu2 %v1936_v22  ;;  %v1909_v53 = vld [vmem:[#allocation19 + $0x78] sm:$0xff]  ;;  %v1960_v22 = vld [vmem:[#allocation19 + $0x210] sm:$0xff] }
 0x39f   :  { %2177 = vmatpush.msrb.mxu0 %v1929_v21  ;;  %2159 = vmatpush.msra.mxu3 %v1972_v16  ;;  %v2387_v16 = vld [vmem:[#allocation22 + $0x498] sm:$0xff] }
 0x3a0   :  { %2194 = vmatpush.msrb.mxu1 %v2017_v63  ;;  %2130 = vmatpush.msra.mxu2 %v1932_v23  ;;  %v2450_v23 = vld [vmem:[#allocation22 + $0x690] sm:$0xff] }
 0x3a1   :  { %2178 = vmatpush.msrb.mxu0 %v1925_v27  ;;  %2160 = vmatpush.msra.mxu3 %v1968_v12  ;;  %v2380_v12 = vld [vmem:[#allocation22 + $0x460] sm:$0xff] }
 0x3a2   :  { %2195 = vmatpush.msrb.mxu1 %v2013_v61  ;;  %2131 = vmatpush.msra.mxu2 %v1928_v41  ;;  %v1900_v61 = vld [vmem:[#allocation19 + $0x30] sm:$0xff] }
 0x3a3   :  { %2179 = vmatpush.msrb.mxu0 %v1921_v35  ;;  %2161 = vmatpush.msra.mxu3 %v1964_v1  ;;  %v2534_v1 = vld [vmem:[#allocation22 + $0x930] sm:$0xff] }
 0x3a4   :  { %2196 = vmatpush.msrb.mxu1 %v2009_v5  ;;  %2132 = vmatpush.msra.mxu2 %v1924_v4 }
 0x3a5   :  { %2180 = vmatpush.msrb.mxu0 %v1917_v43  ;;  %2162 = vmatpush.msra.mxu3 %v1960_v22  ;;  %v2667_v43 = vld [vmem:[#allocation22 + $0xd58] sm:$0xff]  ;;  %v2520_v22 = vld [vmem:[#allocation22 + $0x8c0] sm:$0xff] }
 0x3a6   :  { %2197 = vmatpush.msrb.mxu1 %v2005_v8  ;;  %2133 = vmatpush.msra.mxu2 %v1920_v33  ;;  %v1896_v8 = vld [vmem:[#allocation19 + $0x10] sm:$0xff] }
 0x3a7   :  { %2181 = vmatpush.msrb.mxu0 %v1913_v6  ;;  %v2429_v33 = vld [vmem:[#allocation22 + $0x5e8] sm:$0xff] }
 0x3a8   :  { %2198 = vmatpush.msrb.mxu1 %v2001_v40  ;;  %2134 = vmatpush.msra.mxu2 %v1916_v37  ;;  %v2457_v40 = vld [vmem:[#allocation22 + $0x6c8] sm:$0xff]  ;;  %v2422_v37 = vld [vmem:[#allocation22 + $0x5b0] sm:$0xff] }
 0x3a9   :  { %2182 = vmatpush.msrb.mxu0 %v1909_v53  ;;  %v2653_v6 = vld [vmem:[#allocation22 + $0xce8] sm:$0xff]  ;;  %v2275_v53 = vld [vmem:[#allocation22 + $0x118] sm:$0xff] }
 0x3aa   :  { %2199 = vmatpush.msrb.mxu1 %v1997_v17  ;;  %2135 = vmatpush.msra.mxu2 %v1912_v47  ;;  %v2331_v17 = vld [vmem:[#allocation22 + $0x2d8] sm:$0xff]  ;;  %v2296_v47 = vld [vmem:[#allocation22 + $0x1c0] sm:$0xff] }
 0x3ab   :  { %2183 = vmatpush.msrb.mxu0 %v1905_v59  ;;  %v2632_v59 = vld [vmem:[#allocation22 + $0xc40] sm:$0xff] }
 0x3ac   :  { %2200 = vmatpush.msrb.mxu1 %v1993_v24  ;;  %2136 = vmatpush.msra.mxu2 %v1908_v3  ;;  %v2646_v3 = vld [vmem:[#allocation22 + $0xcb0] sm:$0xff] }
 0x3ad   :  { %2184 = vmatpush.msrb.mxu0 %v1901_v25  ;;  %v2618_v25 = vld [vmem:[#allocation22 + $0xbd0] sm:$0xff] }
 0x3ae   :  { %2201 = vmatpush.msrb.mxu1 %v1989_v48  ;;  %2137 = vmatpush.msra.mxu2 %v1904_v32  ;;  %v2639_v32 = vld [vmem:[#allocation22 + $0xc78] sm:$0xff] }
 0x3af   :  { %2185 = vmatpush.msrb.mxu0 %v1897_v46  ;;  %v2611_v46 = vld [vmem:[#allocation22 + $0xb98] sm:$0xff] }
 0x3b0   :  { %2202 = vmatpush.msrb.mxu1 %v1985_v62  ;;  %2138 = vmatpush.msra.mxu2 %v1900_v61  ;;  %v2261_v61 = vld [vmem:[#allocation22 + $0xa8] sm:$0xff] }
 0x3b2   :  { %2203 = vmatpush.msrb.mxu1 %v1981_v19  ;;  %2139 = vmatpush.msra.mxu2 %v1896_v8  ;;  %v2247_v8 = vld [vmem:[#allocation22 + $0x38] sm:$0xff] }
 0x3b4   :  { %2204 = vmatpush.msrb.mxu1 %v1977_v52  ;;  %v2394_v52 = vld [vmem:[#allocation22 + $0x4d0] sm:$0xff] }
 0x3b6   :  { %2205 = vmatpush.msrb.mxu1 %v1973_v18  ;;  %v2548_v18 = vld [vmem:[#allocation22 + $0x9a0] sm:$0xff] }
 0x3b8   :  { %2206 = vmatpush.msrb.mxu1 %v1969_v60  ;;  %v2373_v60 = vld [vmem:[#allocation22 + $0x428] sm:$0xff] }
 0x3ba   :  { %2207 = vmatpush.msrb.mxu1 %v1965_v20  ;;  %v2359_v20 = vld [vmem:[#allocation22 + $0x3b8] sm:$0xff] }
 0x3bc   :  { %2208 = vmatpush.msrb.mxu1 %v1961_v10  ;;  %v2352_v10 = vld [vmem:[#allocation22 + $0x380] sm:$0xff] }
 0x3e2   :  { %v1833_v14 = vpop.permute.xlu2 %1832 }
 0x3e3   :  { %v1845_v39 = vmul.f32 %v1841_v29, %v1833_v14  ;;  %v1846_v49 = vmul.f32 %v1842_v30, %v1833_v14  ;;  %v2338_v14 = vld [vmem:[#allocation22 + $0x310] sm:$0xff] }
 0x3eb   :  { %v1853_v44 = vpop.permute.xlu2 %1852 }
 0x3ec   :  { %v1864_v9 = vmul.f32 %v1860_v31, %v1853_v44  ;;  %v1865_v51 = vmul.f32 %v1861_v57, %v1853_v44 }
 0x3ee   :  { %v1868_v54 = vadd.f32 %v1864_v9, %v1845_v39  ;;  %v1869_v55 = vadd.f32 %v1865_v51, %v1846_v49  ;;  %v2660_v49 = vld [vmem:[#allocation22 + $0xd20] sm:$0xff]  ;;  %v2289_v9 = vld [vmem:[#allocation22 + $0x188] sm:$0xff]  ;;  %v2562_v51 = vld [vmem:[#allocation22 + $0xa10] sm:$0xff] }
 0x3f0   :  { %v1878_v63 = vadd.f32 %v1874_v42, %v1868_v54  ;;  %v1879_v56 = vadd.f32 %v1875_v50, %v1869_v55  ;;  %v2282_v54 = vld [vmem:[#allocation22 + $0x150] sm:$0xff]  ;;  %v2555_v55 = vld [vmem:[#allocation22 + $0x9d8] sm:$0xff] }
 0x3f2   :  { %vm1882_vm12 = vcmp.gt.f32.partialorder %v1878_v63, 0.0  ;;  %v1886_v2 = vmul.f32 0.2, %v1878_v63  ;;  %vm1883_vm13 = vcmp.gt.f32.partialorder %v1879_v56, 0.0  ;;  %v1887_v0 = vmul.f32 0.2, %v1879_v56 }
 0x3f4   :  { %v4577_v5 = vsel %vm1882_vm12, %v1878_v63, %v1886_v2  ;;  %v4579_v7 = vsel %vm1883_vm13, %v1879_v56, %v1887_v0  ;;  %v2268_v63 = vld [vmem:[#allocation22 + $0xe0] sm:$0xff]  ;;  %v2541_v56 = vld [vmem:[#allocation22 + $0x968] sm:$0xff]  ;;  %v2366_v0 = vld [vmem:[#allocation22 + $0x3f0] sm:$0xff] }
 0x3f5   :  { %2048 = vmatmul.f32.vlgmr.msrb.gmra.mxu2 %v4577_v5  ;;  %2071 = vmatmul.f32.vlgmr.msrb.gmra.mxu3 %v4579_v7  ;;  %v2625_v2 = vld [vmem:[#allocation22 + $0xc08] sm:$0xff] }
 0x3f6   :  { %2094 = vmatmul.f32.vlgmr.msra.gmra.mxu0 %v4577_v5  ;;  %2117 = vmatmul.f32.vlgmr.msra.gmra.mxu1 %v4579_v7 }
 0x3f7   :  { %2727 = vmatpush.msrb.mxu3 %v2457_v40  ;;  %2704 = vmatpush.msrb.mxu2 %v2345_v11  ;;  %v2240_v40 = vld [vmem:[#allocation22] sm:$0xff]  ;;  %v2346_v11 = vld [vmem:[#allocation22 + $0x350] sm:$0xff] }
 0x3f8   :  { %2750 = vmatpush.msra.mxu0 %v2569_v58  ;;  %v2583_v58 = vld [vmem:[#allocation22 + $0xab8] sm:$0xff] }
 0x3f9   :  { %2728 = vmatpush.msrb.mxu3 %v2450_v23  ;;  %2705 = vmatpush.msrb.mxu2 %v2338_v14  ;;  %v2458_v23 = vld [vmem:[#allocation22 + $0x6d0] sm:$0xff]  ;;  %v2513_v14 = vld [vmem:[#allocation22 + $0x888] sm:$0xff] }
 0x3fa   :  { %2751 = vmatpush.msra.mxu0 %v2562_v51  ;;  %v2576_v51 = vld [vmem:[#allocation22 + $0xa80] sm:$0xff] }
 0x3fb   :  { %2729 = vmatpush.msrb.mxu3 %v2443_v15  ;;  %2706 = vmatpush.msrb.mxu2 %v2331_v17  ;;  %v2604_v15 = vld [vmem:[#allocation22 + $0xb60] sm:$0xff]  ;;  %v2451_v17 = vld [vmem:[#allocation22 + $0x698] sm:$0xff] }
 0x3fc   :  { %2752 = vmatpush.msra.mxu0 %v2555_v55  ;;  %v2478_v55 = vld [vmem:[#allocation22 + $0x770] sm:$0xff] }
 0x3fd   :  { %2730 = vmatpush.msrb.mxu3 %v2436_v28  ;;  %2707 = vmatpush.msrb.mxu2 %v2324_v26  ;;  %v2444_v28 = vld [vmem:[#allocation22 + $0x660] sm:$0xff]  ;;  %v2430_v26 = vld [vmem:[#allocation22 + $0x5f0] sm:$0xff] }
 0x3fe   :  { %2753 = vmatpush.msra.mxu0 %v2548_v18  ;;  %v2248_v18 = vld [vmem:[#allocation22 + $0x40] sm:$0xff] }
 0x3ff   :  { %2731 = vmatpush.msrb.mxu3 %v2429_v33  ;;  %2708 = vmatpush.msrb.mxu2 %v2317_v34  ;;  %v2311_v33 = vld [vmem:[#allocation22 + $0x238] sm:$0xff]  ;;  %v2416_v34 = vld [vmem:[#allocation22 + $0x580] sm:$0xff] }
 0x400   :  { %2754 = vmatpush.msra.mxu0 %v2541_v56  ;;  %v2570_v56 = vld [vmem:[#allocation22 + $0xa50] sm:$0xff] }
 0x401   :  { %2732 = vmatpush.msrb.mxu3 %v2422_v37  ;;  %2709 = vmatpush.msrb.mxu2 %v2310_v13  ;;  %v2297_v37 = vld [vmem:[#allocation22 + $0x1c8] sm:$0xff]  ;;  %v2402_v13 = vld [vmem:[#allocation22 + $0x510] sm:$0xff] }
 0x402   :  { %v1857_v41 = vpop.permute.xlu1 %1856  ;;  %2755 = vmatpush.msra.mxu0 %v2534_v1  ;;  %v2556_v1 = vld [vmem:[#allocation22 + $0x9e0] sm:$0xff] }
 0x403   :  { %v1866_v21 = vmul.f32 %v1860_v31, %v1857_v41  ;;  %v1867_v24 = vmul.f32 %v1861_v57, %v1857_v41  ;;  %v1838_v4 = vpop.permute.xlu0 %1837  ;;  %v2681_v31 = vld [vmem:[#allocation22 + $0xdc8] sm:$0xff]  ;;  %2733 = vmatpush.msrb.mxu3 %v2415_v38  ;;  %v2339_v41 = vld [vmem:[#allocation22 + $0x318] sm:$0xff] }
 0x404   :  { %v1847_v27 = vmul.f32 %v1841_v29, %v1838_v4  ;;  %v1848_v48 = vmul.f32 %v1842_v30, %v1838_v4  ;;  %2773 = vmatpush.msra.mxu1 %v2681_v31  ;;  %v2303_v30 = vld [vmem:[#allocation22 + $0x1f8] sm:$0xff]  ;;  %v2325_v4 = vld [vmem:[#allocation22 + $0x2a8] sm:$0xff]  ;;  %v2290_v31 = vld [vmem:[#allocation22 + $0x190] sm:$0xff] }
 0x405   :  { %2710 = vmatpush.msrb.mxu2 %v2303_v30  ;;  %2734 = vmatpush.msrb.mxu3 %v2408_v45  ;;  %v2381_v38 = vld [vmem:[#allocation22 + $0x468] sm:$0xff]  ;;  %v2367_v45 = vld [vmem:[#allocation22 + $0x3f8] sm:$0xff] }
 0x406   :  { %v1870_v35 = vadd.f32 %v1866_v21, %v1847_v27  ;;  %v1871_v62 = vadd.f32 %v1867_v24, %v1848_v48  ;;  %2774 = vmatpush.msra.mxu1 %v2674_v36  ;;  %v2332_v21 = vld [vmem:[#allocation22 + $0x2e0] sm:$0xff]  ;;  %v2437_v24 = vld [vmem:[#allocation22 + $0x628] sm:$0xff]  ;;  %v2318_v27 = vld [vmem:[#allocation22 + $0x270] sm:$0xff] }
 0x407   :  { %2711 = vmatpush.msrb.mxu2 %v2296_v47  ;;  %v2423_v48 = vld [vmem:[#allocation22 + $0x5b8] sm:$0xff]  ;;  %v2506_v36 = vld [vmem:[#allocation22 + $0x850] sm:$0xff]  ;;  %v2597_v30 = vld [vmem:[#allocation22 + $0xb28] sm:$0xff] }
 0x408   :  { %v1880_v57 = vadd.f32 %v1874_v42, %v1870_v35  ;;  %v1881_v29 = vadd.f32 %v1875_v50, %v1871_v62  ;;  %2775 = vmatpush.msra.mxu1 %v2667_v43  ;;  %v2401_v50 = vld [vmem:[#allocation22 + $0x508] sm:$0xff]  ;;  %v2304_v35 = vld [vmem:[#allocation22 + $0x200] sm:$0xff]  ;;  %v2283_v43 = vld [vmem:[#allocation22 + $0x158] sm:$0xff] }
 0x409   :  { %2735 = vmatpush.msrb.mxu3 %v2401_v50  ;;  %2712 = vmatpush.msrb.mxu2 %v2289_v9  ;;  %v2409_v62 = vld [vmem:[#allocation22 + $0x548] sm:$0xff]  ;;  %v2492_v47 = vld [vmem:[#allocation22 + $0x7e0] sm:$0xff] }
 0x40a   :  { %vm1884_vm14 = vcmp.gt.f32.partialorder %v1880_v57, 0.0  ;;  %v1888_v19 = vmul.f32 0.2, %v1880_v57  ;;  %vm1885_vm15 = vcmp.gt.f32.partialorder %v1881_v29, 0.0  ;;  %v1889_v39 = vmul.f32 0.2, %v1881_v29  ;;  %2776 = vmatpush.msra.mxu1 %v2660_v49 }
 0x40b   :  { %2736 = vmatpush.msrb.mxu3 %v2394_v52  ;;  %2713 = vmatpush.msrb.mxu2 %v2282_v54  ;;  %v2269_v49 = vld [vmem:[#allocation22 + $0xe8] sm:$0xff]  ;;  %v2360_v50 = vld [vmem:[#allocation22 + $0x3c0] sm:$0xff]  ;;  %v2682_v54 = vld [vmem:[#allocation22 + $0xdd0] sm:$0xff] }
 0x40c   :  { %v4597_v44 = vsel %vm1884_vm14, %v1880_v57, %v1888_v19  ;;  %v4599_v42 = vsel %vm1885_vm15, %v1881_v29, %v1889_v39  ;;  %2777 = vmatpush.msra.mxu1 %v2653_v6  ;;  %v2395_v57 = vld [vmem:[#allocation22 + $0x4d8] sm:$0xff]  ;;  %v2388_v29 = vld [vmem:[#allocation22 + $0x4a0] sm:$0xff]  ;;  %v2374_v19 = vld [vmem:[#allocation22 + $0x430] sm:$0xff] }
 0x40d   :  { %2051 = vmatmul.f32.gmra.mxu2 %v4597_v44  ;;  %2074 = vmatmul.f32.gmra.mxu3 %v4599_v42  ;;  %v2499_v39 = vld [vmem:[#allocation22 + $0x818] sm:$0xff]  ;;  %v2485_v9 = vld [vmem:[#allocation22 + $0x7a8] sm:$0xff]  ;;  %v2262_v6 = vld [vmem:[#allocation22 + $0xb0] sm:$0xff] }
 0x40e   :  { %2097 = vmatmul.f32.gmra.mxu0 %v4597_v44  ;;  %2120 = vmatmul.f32.gmra.mxu1 %v4599_v42  ;;  %v2353_v52 = vld [vmem:[#allocation22 + $0x388] sm:$0xff] }
 0x40f   :  { %2778 = vmatpush.msra.mxu1 %v2646_v3  ;;  %2737 = vmatpush.msrb.mxu3 %v2387_v16  ;;  %v2255_v3 = vld [vmem:[#allocation22 + $0x78] sm:$0xff] }
 0x410   :  { %2714 = vmatpush.msrb.mxu2 %v2275_v53  ;;  %v2675_v16 = vld [vmem:[#allocation22 + $0xd98] sm:$0xff] }
 0x411   :  { %2779 = vmatpush.msra.mxu1 %v2639_v32  ;;  %2738 = vmatpush.msrb.mxu3 %v2380_v12  ;;  %v2471_v53 = vld [vmem:[#allocation22 + $0x738] sm:$0xff]  ;;  %v2668_v32 = vld [vmem:[#allocation22 + $0xd60] sm:$0xff] }
 0x412   :  { %2715 = vmatpush.msrb.mxu2 %v2268_v63  ;;  %v2464_v12 = vld [vmem:[#allocation22 + $0x700] sm:$0xff]  ;;  %v2241_v63 = vld [vmem:[#allocation22 + $0x8] sm:$0xff] }
 0x413   :  { %2780 = vmatpush.msra.mxu1 %v2632_v59  ;;  %2739 = vmatpush.msrb.mxu3 %v2373_v60  ;;  %v2661_v59 = vld [vmem:[#allocation22 + $0xd28] sm:$0xff]  ;;  %v2563_v60 = vld [vmem:[#allocation22 + $0xa18] sm:$0xff] }
 0x414   :  { %2716 = vmatpush.msrb.mxu2 %v2261_v61  ;;  %v2654_v61 = vld [vmem:[#allocation22 + $0xcf0] sm:$0xff] }
 0x415   :  { %2140 = vmatmul.f32.vlgmr.msra.gmra.mxu2 %v4577_v5  ;;  %2163 = vmatmul.f32.vlgmr.msra.gmra.mxu3 %v4579_v7 }
 0x416   :  { %2186 = vmatmul.f32.vlgmr.msrb.gmra.mxu0 %v4577_v5  ;;  %2209 = vmatmul.f32.vlgmr.msrb.gmra.mxu1 %v4579_v7  ;;  %v2254_v5 = vld [vmem:[#allocation22 + $0x70] sm:$0xff]  ;;  %v2527_v7 = vld [vmem:[#allocation22 + $0x8f8] sm:$0xff] }
 0x417   :  { %2781 = vmatpush.msra.mxu1 %v2625_v2  ;;  %2740 = vmatpush.msrb.mxu3 %v2366_v0  ;;  %v2647_v2 = vld [vmem:[#allocation22 + $0xcb8] sm:$0xff]  ;;  %v2549_v0 = vld [vmem:[#allocation22 + $0x9a8] sm:$0xff] }
 0x418   :  { %2717 = vmatpush.msrb.mxu2 %v2254_v5  ;;  %2756 = vmatpush.msra.mxu0 %v2527_v7  ;;  %v2640_v5 = vld [vmem:[#allocation22 + $0xc80] sm:$0xff]  ;;  %v2542_v7 = vld [vmem:[#allocation22 + $0x970] sm:$0xff] }
 0x419   :  { %2782 = vmatpush.msra.mxu1 %v2618_v25  ;;  %2741 = vmatpush.msrb.mxu3 %v2359_v20  ;;  %v2633_v25 = vld [vmem:[#allocation22 + $0xc48] sm:$0xff]  ;;  %v2535_v20 = vld [vmem:[#allocation22 + $0x938] sm:$0xff] }
 0x41a   :  { %2718 = vmatpush.msrb.mxu2 %v2247_v8  ;;  %2757 = vmatpush.msra.mxu0 %v2520_v22  ;;  %v2626_v8 = vld [vmem:[#allocation22 + $0xc10] sm:$0xff]  ;;  %v4613_v22 = vld [vmem:[#allocation20] sm:$0xf] }
 0x41b   :  { %2783 = vmatpush.msra.mxu1 %v2611_v46  ;;  %2742 = vmatpush.msrb.mxu3 %v2352_v10  ;;  %v2528_v46 = vld [vmem:[#allocation22 + $0x900] sm:$0xff]  ;;  %v2619_v10 = vld [vmem:[#allocation22 + $0xbd8] sm:$0xff] }
 0x41c   :  { %2719 = vmatpush.msrb.mxu2 %v2240_v40  ;;  %2758 = vmatpush.msra.mxu0 %v2513_v14  ;;  %v2521_v40 = vld [vmem:[#allocation22 + $0x8c8] sm:$0xff]  ;;  %v2514_v14 = vld [vmem:[#allocation22 + $0x890] sm:$0xff] }
 0x41d   :  { %2143 = vmatmul.f32.gmra.mxu2 %v4597_v44  ;;  %2166 = vmatmul.f32.gmra.mxu3 %v4599_v42 }
 0x41e   :  { %2189 = vmatmul.f32.gmra.mxu0 %v4597_v44  ;;  %2212 = vmatmul.f32.gmra.mxu1 %v4599_v42  ;;  %v2590_v44 = vld [vmem:[#allocation22 + $0xaf0] sm:$0xff]  ;;  %v2276_v42 = vld [vmem:[#allocation22 + $0x120] sm:$0xff] }
 0x41f   :  { %2819 = vmatpush.msra.mxu3 %v2458_v23  ;;  %2796 = vmatpush.msra.mxu2 %v2346_v11  ;;  %v2612_v23 = vld [vmem:[#allocation22 + $0xba0] sm:$0xff]  ;;  %v2025_v11 = vperm.slane %v4613_v22, 1 }
 0x420   :  { %2784 = vmatpush.msra.mxu1 %v2604_v15  ;;  %2759 = vmatpush.msra.mxu0 %v2506_v36  ;;  %v2605_v15 = vld [vmem:[#allocation22 + $0xb68] sm:$0xff] }
 0x421   :  { %2820 = vmatpush.msra.mxu3 %v2451_v17  ;;  %2797 = vmatpush.msra.mxu2 %v2339_v41  ;;  %v2507_v41 = vld [vmem:[#allocation22 + $0x858] sm:$0xff] }
 0x422   :  { %2785 = vmatpush.msra.mxu1 %v2597_v30  ;;  %2760 = vmatpush.msra.mxu0 %v2499_v39  ;;  %v2452_v30 = vld [vmem:[#allocation22 + $0x6a0] sm:$0xff]  ;;  %v2445_v39 = vld [vmem:[#allocation22 + $0x668] sm:$0xff] }
 0x423   :  { %2821 = vmatpush.msra.mxu3 %v2444_v28  ;;  %2798 = vmatpush.msra.mxu2 %v2332_v21  ;;  %v2598_v28 = vld [vmem:[#allocation22 + $0xb30] sm:$0xff] }
 0x424   :  { %2786 = vmatpush.msra.mxu1 %v2590_v44  ;;  %2761 = vmatpush.msra.mxu0 %v2492_v47  ;;  %v2347_v44 = vld [vmem:[#allocation22 + $0x358] sm:$0xff]  ;;  %v2438_v47 = vld [vmem:[#allocation22 + $0x630] sm:$0xff] }
 0x425   :  { %2822 = vmatpush.msra.mxu3 %v2437_v24  ;;  %2799 = vmatpush.msra.mxu2 %v2325_v4  ;;  %v2024_v4 = vperm.slane %v4613_v22, 0 }
 0x426   :  { %2787 = vmatpush.msra.mxu1 %v2583_v58  ;;  %2762 = vmatpush.msra.mxu0 %v2485_v9  ;;  %v2340_v58 = vld [vmem:[#allocation22 + $0x320] sm:$0xff]  ;;  %v2333_v9 = vld [vmem:[#allocation22 + $0x2e8] sm:$0xff] }
 0x427   :  { %2823 = vmatpush.msra.mxu3 %v2430_v26  ;;  %2800 = vmatpush.msra.mxu2 %v2318_v27  ;;  %v2500_v26 = vld [vmem:[#allocation22 + $0x820] sm:$0xff]  ;;  %v2591_v27 = vld [vmem:[#allocation22 + $0xaf8] sm:$0xff] }
 0x428   :  { %2788 = vmatpush.msra.mxu1 %v2576_v51  ;;  %2763 = vmatpush.msra.mxu0 %v2478_v55  ;;  %v2424_v51 = vld [vmem:[#allocation22 + $0x5c0] sm:$0xff]  ;;  %v2410_v55 = vld [vmem:[#allocation22 + $0x550] sm:$0xff] }
 0x429   :  { %2824 = vmatpush.msra.mxu3 %v2423_v48  ;;  %2801 = vmatpush.msra.mxu2 %v2311_v33  ;;  %v2493_v33 = vld [vmem:[#allocation22 + $0x7e8] sm:$0xff] }
 0x42a   :  { %2865 = vmatpush.msrb.mxu1 %v2682_v54  ;;  %2764 = vmatpush.msra.mxu0 %v2471_v53  ;;  %v2319_v54 = vld [vmem:[#allocation22 + $0x278] sm:$0xff]  ;;  %v2305_v53 = vld [vmem:[#allocation22 + $0x208] sm:$0xff] }
 0x42b   :  { %2825 = vmatpush.msra.mxu3 %v2416_v34  ;;  %2802 = vmatpush.msra.mxu2 %v2304_v35  ;;  %v2584_v34 = vld [vmem:[#allocation22 + $0xac0] sm:$0xff] }
 0x42c   :  { %2866 = vmatpush.msrb.mxu1 %v2675_v16  ;;  %2765 = vmatpush.msra.mxu0 %v2464_v12  ;;  %v2403_v16 = vld [vmem:[#allocation22 + $0x518] sm:$0xff]  ;;  %v2396_v12 = vld [vmem:[#allocation22 + $0x4e0] sm:$0xff] }
 0x42d   :  { %2826 = vmatpush.msra.mxu3 %v2409_v62  ;;  %2803 = vmatpush.msra.mxu2 %v2297_v37 }
 0x42e   :  { %2867 = vmatpush.msrb.mxu1 %v2668_v32  ;;  %2842 = vmatpush.msrb.mxu0 %v2570_v56  ;;  %v2298_v56 = vld [vmem:[#allocation22 + $0x1d0] sm:$0xff] }
 0x42f   :  { %2827 = vmatpush.msra.mxu3 %v2402_v13  ;;  %2804 = vmatpush.msra.mxu2 %v2290_v31  ;;  %v2459_v13 = vld [vmem:[#allocation22 + $0x6d8] sm:$0xff]  ;;  %v2486_v31 = vld [vmem:[#allocation22 + $0x7b0] sm:$0xff] }
 0x430   :  { %2868 = vmatpush.msrb.mxu1 %v2661_v59  ;;  %2843 = vmatpush.msrb.mxu0 %v2563_v60  ;;  %v2389_v59 = vld [vmem:[#allocation22 + $0x4a8] sm:$0xff] }
 0x431   :  { %2828 = vmatpush.msra.mxu3 %v2395_v57  ;;  %2805 = vmatpush.msra.mxu2 %v2283_v43  ;;  %v2577_v57 = vld [vmem:[#allocation22 + $0xa88] sm:$0xff]  ;;  %v2479_v43 = vld [vmem:[#allocation22 + $0x778] sm:$0xff] }
 0x432   :  { %2869 = vmatpush.msrb.mxu1 %v2654_v61  ;;  %2844 = vmatpush.msrb.mxu0 %v2556_v1  ;;  %v2291_v61 = vld [vmem:[#allocation22 + $0x198] sm:$0xff]  ;;  %v2382_v1 = vld [vmem:[#allocation22 + $0x470] sm:$0xff] }
 0x433   :  { %2829 = vmatpush.msra.mxu3 %v2388_v29  ;;  %2806 = vmatpush.msra.mxu2 %v2276_v42  ;;  %v2472_v42 = vld [vmem:[#allocation22 + $0x740] sm:$0xff] }
 0x434   :  { %2870 = vmatpush.msrb.mxu1 %v2647_v2  ;;  %2845 = vmatpush.msrb.mxu0 %v2549_v0 }
 0x435   :  { %2830 = vmatpush.msra.mxu3 %v2381_v38  ;;  %2807 = vmatpush.msra.mxu2 %v2269_v49  ;;  %v2465_v49 = vld [vmem:[#allocation22 + $0x708] sm:$0xff] }
 0x436   :  { %2871 = vmatpush.msrb.mxu1 %v2640_v5  ;;  %2846 = vmatpush.msrb.mxu0 %v2542_v7  ;;  %v2027_v7 = vperm.slane %v4613_v22, 3 }
 0x437   :  { %2831 = vmatpush.msra.mxu3 %v2374_v19  ;;  %2808 = vmatpush.msra.mxu2 %v2262_v6  ;;  %v2326_v6 = vld [vmem:[#allocation22 + $0x2b0] sm:$0xff] }
 0x438   :  { %2872 = vmatpush.msrb.mxu1 %v2633_v25  ;;  %2847 = vmatpush.msrb.mxu0 %v2535_v20  ;;  %v2284_v25 = vld [vmem:[#allocation22 + $0x160] sm:$0xff] }
 0x439   :  { %2832 = vmatpush.msra.mxu3 %v2367_v45  ;;  %2809 = vmatpush.msra.mxu2 %v2255_v3  ;;  %v2312_v3 = vld [vmem:[#allocation22 + $0x240] sm:$0xff] }
 0x43a   :  { %2873 = vmatpush.msrb.mxu1 %v2626_v8  ;;  %2848 = vmatpush.msrb.mxu0 %v2528_v46  ;;  %v2375_v8 = vld [vmem:[#allocation22 + $0x438] sm:$0xff] }
 0x43b   :  { %2833 = vmatpush.msra.mxu3 %v2360_v50  ;;  %2810 = vmatpush.msra.mxu2 %v2248_v18  ;;  %v2431_v50 = vld [vmem:[#allocation22 + $0x5f8] sm:$0xff] }
 0x43c   :  { %2874 = vmatpush.msrb.mxu1 %v2619_v10  ;;  %2849 = vmatpush.msrb.mxu0 %v2521_v40  ;;  %v2277_v10 = vld [vmem:[#allocation22 + $0x128] sm:$0xff] }
 0x43d   :  { %2834 = vmatpush.msra.mxu3 %v2353_v52  ;;  %2811 = vmatpush.msra.mxu2 %v2241_v63  ;;  %v2417_v52 = vld [vmem:[#allocation22 + $0x588] sm:$0xff] }
 0x43e   :  { %2875 = vmatpush.msrb.mxu1 %v2612_v23  ;;  %2850 = vmatpush.msrb.mxu0 %v2514_v14  ;;  %v2368_v14 = vld [vmem:[#allocation22 + $0x400] sm:$0xff] }
 0x440   :  { %2876 = vmatpush.msrb.mxu1 %v2605_v15  ;;  %2851 = vmatpush.msrb.mxu0 %v2507_v41 }
 0x442   :  { %2877 = vmatpush.msrb.mxu1 %v2598_v28  ;;  %2852 = vmatpush.msrb.mxu0 %v2500_v26  ;;  %v2361_v28 = vld [vmem:[#allocation22 + $0x3c8] sm:$0xff] }
 0x444   :  { %2878 = vmatpush.msrb.mxu1 %v2591_v27  ;;  %2853 = vmatpush.msrb.mxu0 %v2493_v33  ;;  %v2354_v27 = vld [vmem:[#allocation22 + $0x390] sm:$0xff] }
 0x446   :  { %2879 = vmatpush.msrb.mxu1 %v2584_v34  ;;  %2854 = vmatpush.msrb.mxu0 %v2486_v31 }
 0x448   :  { %2880 = vmatpush.msrb.mxu1 %v2577_v57  ;;  %2855 = vmatpush.msrb.mxu0 %v2479_v43  ;;  %v2249_v43 = vld [vmem:[#allocation22 + $0x48] sm:$0xff] }
 0x44a   :  { %2856 = vmatpush.msrb.mxu0 %v2472_v42  ;;  %v2446_v42 = vld [vmem:[#allocation22 + $0x670] sm:$0xff] }
 0x44c   :  { %2857 = vmatpush.msrb.mxu0 %v2465_v49 }
 0x473   :  { %v2095_v17 = vpop.f32.mrf.mxu0  ;;  %v2118_v24 = vpop.f32.mrf.mxu1 }
 0x474   :  { %v2096_v21 = vadd.f32 %v2095_v17, %v2025_v11  ;;  %v2270_v17 = vld [vmem:[#allocation22 + $0xf0] sm:$0xff] }
 0x476   :  { %v2119_v48 = vadd.f32 %v2118_v24, %v2096_v21  ;;  %v2026_v21 = vperm.slane %v4613_v22, 2  ;;  %v2256_v22 = vld [vmem:[#allocation22 + $0x80] sm:$0xff] }
 0x478   :  { %vm2217_vm0 = vcmp.gt.f32.partialorder %v2119_v48, 0.0  ;;  %v2225_v35 = vmul.f32 0.2, %v2119_v48  ;;  %v2049_v62 = vpop.f32.mrf.mxu2  ;;  %v2072_v38 = vpop.f32.mrf.mxu3 }
 0x479   :  { %v2050_v37 = vadd.f32 %v2049_v62, %v2024_v4  ;;  %v2683_v62 = vld [vmem:[#allocation22 + $0xdd8] sm:$0xff] }
 0x47a   :  { %v4621_v29 = vsel %vm2217_vm0, %v2119_v48, %v2225_v35 }
 0x47b   :  { %v2073_v36 = vadd.f32 %v2072_v38, %v2050_v37  ;;  %2743 = vmatmul.f32.vlgmr.msrb.gmra.mxu3 %v4621_v29  ;;  %v2460_v37 = vld [vmem:[#allocation22 + $0x6e0] sm:$0xff] }
 0x47c   :  { %2911 = vmatpush.msrb.mxu3 %v2459_v13  ;;  %v2676_v38 = vld [vmem:[#allocation22 + $0xda0] sm:$0xff] }
 0x47d   :  { %vm2216_vm1 = vcmp.gt.f32.partialorder %v2073_v36, 0.0  ;;  %v2224_v19 = vmul.f32 0.2, %v2073_v36 }
 0x47e   :  { %2912 = vmatpush.msrb.mxu3 %v2452_v30 }
 0x47f   :  { %v4624_v45 = vsel %vm2216_vm1, %v2073_v36, %v2224_v19  ;;  %v2453_v36 = vld [vmem:[#allocation22 + $0x6a8] sm:$0xff] }
 0x480   :  { %2913 = vmatpush.msrb.mxu3 %v2445_v39  ;;  %2720 = vmatmul.f32.vlgmr.msrb.gmra.mxu2 %v4624_v45 }
 0x481   :  { %2888 = vmatpush.msrb.mxu2 %v2347_v44  ;;  %v2669_v44 = vld [vmem:[#allocation22 + $0xd68] sm:$0xff] }
 0x482   :  { %2914 = vmatpush.msrb.mxu3 %v2438_v47 }
 0x483   :  { %2889 = vmatpush.msrb.mxu2 %v2340_v58  ;;  %v2242_v58 = vld [vmem:[#allocation22 + $0x10] sm:$0xff] }
 0x484   :  { %2915 = vmatpush.msrb.mxu3 %v2431_v50  ;;  %v2571_v50 = vld [vmem:[#allocation22 + $0xa58] sm:$0xff] }
 0x485   :  { %2890 = vmatpush.msrb.mxu2 %v2333_v9 }
 0x486   :  { %2916 = vmatpush.msrb.mxu3 %v2424_v51 }
 0x487   :  { %2891 = vmatpush.msrb.mxu2 %v2326_v6  ;;  %v2662_v6 = vld [vmem:[#allocation22 + $0xd30] sm:$0xff] }
 0x488   :  { %2917 = vmatpush.msrb.mxu3 %v2417_v52  ;;  %v2348_v52 = vld [vmem:[#allocation22 + $0x360] sm:$0xff] }
 0x489   :  { %2892 = vmatpush.msrb.mxu2 %v2319_v54 }
 0x48a   :  { %2918 = vmatpush.msrb.mxu3 %v2410_v55  ;;  %v2439_v55 = vld [vmem:[#allocation22 + $0x638] sm:$0xff] }
 0x48b   :  { %v2098_v18 = vpop.f32.mrf.mxu0  ;;  %v2121_v32 = vpop.f32.mrf.mxu1  ;;  %2893 = vmatpush.msrb.mxu2 %v2312_v3 }
 0x48c   :  { %v2099_v63 = vadd.f32 %v2098_v18, %v2025_v11  ;;  %2919 = vmatpush.msrb.mxu3 %v2403_v16 }
 0x48d   :  { %2894 = vmatpush.msrb.mxu2 %v2305_v53  ;;  %v2564_v53 = vld [vmem:[#allocation22 + $0xa20] sm:$0xff] }
 0x48e   :  { %v2122_v60 = vadd.f32 %v2121_v32, %v2099_v63  ;;  %2920 = vmatpush.msrb.mxu3 %v2396_v12  ;;  %v2655_v32 = vld [vmem:[#allocation22 + $0xcf8] sm:$0xff]  ;;  %v2341_v12 = vld [vmem:[#allocation22 + $0x328] sm:$0xff]  ;;  %v2432_v63 = vld [vmem:[#allocation22 + $0x600] sm:$0xff] }
 0x48f   :  { %2895 = vmatpush.msrb.mxu2 %v2298_v56  ;;  %v2557_v56 = vld [vmem:[#allocation22 + $0x9e8] sm:$0xff] }
 0x490   :  { %vm2221_vm2 = vcmp.gt.f32.partialorder %v2122_v60, 0.0  ;;  %v2229_v2 = vmul.f32 0.2, %v2122_v60  ;;  %2921 = vmatpush.msrb.mxu3 %v2389_v59  ;;  %v2052_v0 = vpop.f32.mrf.mxu2  ;;  %v2075_v5 = vpop.f32.mrf.mxu3 }
 0x491   :  { %v2053_v20 = vadd.f32 %v2052_v0, %v2024_v4  ;;  %2896 = vmatpush.msrb.mxu2 %v2291_v61  ;;  %v2263_v4 = vld [vmem:[#allocation22 + $0xb8] sm:$0xff]  ;;  %v2334_v61 = vld [vmem:[#allocation22 + $0x2f0] sm:$0xff]  ;;  %v2641_v0 = vld [vmem:[#allocation22 + $0xc88] sm:$0xff] }
 0x492   :  { %v4632_v46 = vsel %vm2221_vm2, %v2122_v60, %v2229_v2  ;;  %2922 = vmatpush.msrb.mxu3 %v2382_v1  ;;  %v2648_v60 = vld [vmem:[#allocation22 + $0xcc0] sm:$0xff]  ;;  %v2425_v1 = vld [vmem:[#allocation22 + $0x5c8] sm:$0xff]  ;;  %v2550_v2 = vld [vmem:[#allocation22 + $0x9b0] sm:$0xff] }
 0x493   :  { %v2076_v40 = vadd.f32 %v2075_v5, %v2053_v20  ;;  %v2187_v23 = vpop.f32.mrf.mxu0  ;;  %v2210_v11 = vpop.f32.mrf.mxu1  ;;  %2746 = vmatmul.f32.gmra.mxu3 %v4632_v46  ;;  %2897 = vmatpush.msrb.mxu2 %v2284_v25  ;;  %v2327_v5 = vld [vmem:[#allocation22 + $0x2b8] sm:$0xff]  ;;  %v2418_v25 = vld [vmem:[#allocation22 + $0x590] sm:$0xff] }
 0x494   :  { %v2188_v15 = vadd.f32 %v2187_v23, %v2027_v7  ;;  %2923 = vmatpush.msrb.mxu3 %v2375_v8  ;;  %v2543_v20 = vld [vmem:[#allocation22 + $0x978] sm:$0xff]  ;;  %v2634_v8 = vld [vmem:[#allocation22 + $0xc50] sm:$0xff]  ;;  %v2536_v23 = vld [vmem:[#allocation22 + $0x940] sm:$0xff] }
 0x495   :  { %vm2220_vm3 = vcmp.gt.f32.partialorder %v2076_v40, 0.0  ;;  %v2228_v41 = vmul.f32 0.2, %v2076_v40  ;;  %2898 = vmatpush.msrb.mxu2 %v2277_v10  ;;  %v2320_v10 = vld [vmem:[#allocation22 + $0x280] sm:$0xff] }
 0x496   :  { %v2211_v24 = vadd.f32 %v2210_v11, %v2188_v15  ;;  %2924 = vmatpush.msrb.mxu3 %v2368_v14  ;;  %v2627_v11 = vld [vmem:[#allocation22 + $0xc18] sm:$0xff]  ;;  %v2313_v14 = vld [vmem:[#allocation22 + $0x248] sm:$0xff]  ;;  %v2404_v15 = vld [vmem:[#allocation22 + $0x520] sm:$0xff] }
 0x497   :  { %v4636_v26 = vsel %vm2220_vm3, %v2076_v40, %v2228_v41  ;;  %2899 = vmatpush.msrb.mxu2 %v2270_v17  ;;  %v2411_v40 = vld [vmem:[#allocation22 + $0x558] sm:$0xff]  ;;  %v2529_v17 = vld [vmem:[#allocation22 + $0x908] sm:$0xff]  ;;  %v2620_v41 = vld [vmem:[#allocation22 + $0xbe0] sm:$0xff] }
 0x498   :  { %vm2219_vm4 = vcmp.gt.f32.partialorder %v2211_v24, 0.0  ;;  %v2227_v48 = vmul.f32 0.2, %v2211_v24  ;;  %2925 = vmatpush.msrb.mxu3 %v2361_v28  ;;  %v2141_v33 = vpop.f32.mrf.mxu2  ;;  %v2164_v34 = vpop.f32.mrf.mxu3  ;;  %2723 = vmatmul.f32.gmra.mxu2 %v4636_v26  ;;  %v2306_v28 = vld [vmem:[#allocation22 + $0x210] sm:$0xff] }
 0x499   :  { %v2142_v35 = vadd.f32 %v2141_v33, %v2026_v21  ;;  %2900 = vmatpush.msrb.mxu2 %v2263_v4  ;;  %v2613_v4 = vld [vmem:[#allocation22 + $0xba8] sm:$0xff]  ;;  %v2515_v33 = vld [vmem:[#allocation22 + $0x898] sm:$0xff] }
 0x49a   :  { %v4639_v13 = vsel %vm2219_vm4, %v2211_v24, %v2227_v48  ;;  %2926 = vmatpush.msrb.mxu3 %v2354_v27  ;;  %v2522_v24 = vld [vmem:[#allocation22 + $0x8d0] sm:$0xff]  ;;  %v2299_v27 = vld [vmem:[#allocation22 + $0x1d8] sm:$0xff] }
 0x49b   :  { %v2165_v31 = vadd.f32 %v2164_v34, %v2142_v35  ;;  %v2190_v57 = vpop.f32.mrf.mxu0  ;;  %2789 = vmatmul.f32.vlgmr.msra.gmra.mxu1 %v4639_v13  ;;  %2835 = vmatmul.f32.vlgmr.msra.gmra.mxu3 %v4621_v29  ;;  %v2213_v39 = vpop.f32.mrf.mxu1  ;;  %v2390_v48 = vld [vmem:[#allocation22 + $0x4b0] sm:$0xff]  ;;  %v2292_v35 = vld [vmem:[#allocation22 + $0x1a0] sm:$0xff] }
 0x49c   :  { %v2191_v30 = vadd.f32 %v2190_v57, %v2027_v7  ;;  %2957 = vmatpush.msra.mxu1 %v2683_v62  ;;  %3003 = vmatpush.msra.mxu3 %v2460_v37  ;;  %v2606_v34 = vld [vmem:[#allocation22 + $0xb70] sm:$0xff]  ;;  %v2383_v62 = vld [vmem:[#allocation22 + $0x478] sm:$0xff]  ;;  %v2508_v37 = vld [vmem:[#allocation22 + $0x860] sm:$0xff] }
 0x49d   :  { %vm2218_vm5 = vcmp.gt.f32.partialorder %v2165_v31, 0.0  ;;  %v2226_v19 = vmul.f32 0.2, %v2165_v31  ;;  %2901 = vmatpush.msrb.mxu2 %v2256_v22  ;;  %v2599_v22 = vld [vmem:[#allocation22 + $0xb38] sm:$0xff]  ;;  %v2376_v57 = vld [vmem:[#allocation22 + $0x440] sm:$0xff] }
 0x49e   :  { %v2214_v47 = vadd.f32 %v2213_v39, %v2191_v30  ;;  %2958 = vmatpush.msra.mxu1 %v2676_v38  ;;  %3004 = vmatpush.msra.mxu3 %v2453_v36  ;;  %v2501_v38 = vld [vmem:[#allocation22 + $0x828] sm:$0xff]  ;;  %v2592_v36 = vld [vmem:[#allocation22 + $0xb00] sm:$0xff]  ;;  %v2278_v30 = vld [vmem:[#allocation22 + $0x130] sm:$0xff] }
 0x49f   :  { %v4643_v49 = vsel %vm2218_vm5, %v2165_v31, %v2226_v19  ;;  %2902 = vmatpush.msrb.mxu2 %v2249_v43  ;;  %v2285_v31 = vld [vmem:[#allocation22 + $0x168] sm:$0xff]  ;;  %v2494_v19 = vld [vmem:[#allocation22 + $0x7f0] sm:$0xff] }
 0x4a0   :  { %vm2223_vm6 = vcmp.gt.f32.partialorder %v2214_v47, 0.0  ;;  %v2231_v9 = vmul.f32 0.2, %v2214_v47  ;;  %2959 = vmatpush.msra.mxu1 %v2669_v44  ;;  %3005 = vmatpush.msra.mxu3 %v2446_v42  ;;  %v2144_v51 = vpop.f32.mrf.mxu2  ;;  %v2167_v16 = vpop.f32.mrf.mxu3  ;;  %v2369_v43 = vld [vmem:[#allocation22 + $0x408] sm:$0xff]  ;;  %v2271_v44 = vld [vmem:[#allocation22 + $0xf8] sm:$0xff]  ;;  %v2362_v42 = vld [vmem:[#allocation22 + $0x3d0] sm:$0xff] }
 0x4a1   :  { %2903 = vmatpush.msrb.mxu2 %v2242_v58  ;;  %v2145_v54 = vadd.f32 %v2144_v51, %v2026_v21  ;;  %2766 = vmatmul.f32.vlgmr.msra.gmra.mxu0 %v4643_v49  ;;  %v2397_v21 = vld [vmem:[#allocation22 + $0x4e8] sm:$0xff]  ;;  %v2578_v58 = vld [vmem:[#allocation22 + $0xa90] sm:$0xff]  ;;  %v2684_v51 = vld [vmem:[#allocation22 + $0xde0] sm:$0xff] }
 0x4a2   :  { %v4646_v3 = vsel %vm2223_vm6, %v2214_v47, %v2231_v9  ;;  %2812 = vmatmul.f32.vlgmr.msra.gmra.mxu2 %v4624_v45  ;;  %2934 = vmatpush.msra.mxu0 %v2571_v50  ;;  %v2585_v39 = vld [vmem:[#allocation22 + $0xac8] sm:$0xff]  ;;  %v2487_v47 = vld [vmem:[#allocation22 + $0x7b8] sm:$0xff]  ;;  %v2264_v50 = vld [vmem:[#allocation22 + $0xc0] sm:$0xff] }
 0x4a3   :  { %v2168_v18 = vadd.f32 %v2167_v16, %v2145_v54  ;;  %2960 = vmatpush.msra.mxu1 %v2662_v6  ;;  %2980 = vmatpush.msra.mxu2 %v2348_v52  ;;  %v2355_v9 = vld [vmem:[#allocation22 + $0x398] sm:$0xff]  ;;  %v2461_v6 = vld [vmem:[#allocation22 + $0x6e8] sm:$0xff]  ;;  %v2480_v52 = vld [vmem:[#allocation22 + $0x780] sm:$0xff] }
 0x4a4   :  { %3006 = vmatpush.msra.mxu3 %v2439_v55  ;;  %2792 = vmatmul.f32.gmra.mxu1 %v4646_v3  ;;  %v2257_v54 = vld [vmem:[#allocation22 + $0x88] sm:$0xff]  ;;  %v2454_v16 = vld [vmem:[#allocation22 + $0x6b0] sm:$0xff] }
 0x4a5   :  { %vm2222_vm7 = vcmp.gt.f32.partialorder %v2168_v18, 0.0  ;;  %v2230_v59 = vmul.f32 0.2, %v2168_v18  ;;  %2838 = vmatmul.f32.gmra.mxu3 %v4632_v46  ;;  %2935 = vmatpush.msra.mxu0 %v2564_v53  ;;  %v2677_v55 = vld [vmem:[#allocation22 + $0xda8] sm:$0xff] }
 0x4a6   :  { %2961 = vmatpush.msra.mxu1 %v2655_v32  ;;  %2981 = vmatpush.msra.mxu2 %v2341_v12  ;;  %v2473_v53 = vld [vmem:[#allocation22 + $0x748] sm:$0xff]  ;;  %v2670_v32 = vld [vmem:[#allocation22 + $0xd70] sm:$0xff]  ;;  %v2447_v12 = vld [vmem:[#allocation22 + $0x678] sm:$0xff] }
 0x4a7   :  { %3007 = vmatpush.msra.mxu3 %v2432_v63  ;;  %2936 = vmatpush.msra.mxu0 %v2557_v56  ;;  %v4651_v7 = vsel %vm2222_vm7, %v2168_v18, %v2230_v59  ;;  %v2250_v18 = vld [vmem:[#allocation22 + $0x50] sm:$0xff]  ;;  %v2243_v56 = vld [vmem:[#allocation22 + $0x18] sm:$0xff]  ;;  %v2572_v59 = vld [vmem:[#allocation22 + $0xa60] sm:$0xff] }
 0x4a8   :  { %2962 = vmatpush.msra.mxu1 %v2648_v60  ;;  %2982 = vmatpush.msra.mxu2 %v2334_v61  ;;  %v2466_v63 = vld [vmem:[#allocation22 + $0x710] sm:$0xff]  ;;  %v2663_v60 = vld [vmem:[#allocation22 + $0xd38] sm:$0xff]  ;;  %v2349_v61 = vld [vmem:[#allocation22 + $0x368] sm:$0xff] }
 0x4a9   :  { %3008 = vmatpush.msra.mxu3 %v2425_v1  ;;  %2937 = vmatpush.msra.mxu0 %v2550_v2  ;;  %v2440_v1 = vld [vmem:[#allocation22 + $0x640] sm:$0xff]  ;;  %v2565_v2 = vld [vmem:[#allocation22 + $0xa28] sm:$0xff] }
 0x4aa   :  { %2963 = vmatpush.msra.mxu1 %v2641_v0  ;;  %2983 = vmatpush.msra.mxu2 %v2327_v5  ;;  %v2656_v0 = vld [vmem:[#allocation22 + $0xd00] sm:$0xff]  ;;  %v2342_v5 = vld [vmem:[#allocation22 + $0x330] sm:$0xff] }
 0x4ab   :  { %3009 = vmatpush.msra.mxu3 %v2418_v25  ;;  %2769 = vmatmul.f32.gmra.mxu0 %v4651_v7  ;;  %v2433_v25 = vld [vmem:[#allocation22 + $0x608] sm:$0xff] }
 0x4ac   :  { %2815 = vmatmul.f32.gmra.mxu2 %v4636_v26  ;;  %2938 = vmatpush.msra.mxu0 %v2543_v20  ;;  %v2558_v20 = vld [vmem:[#allocation22 + $0x9f0] sm:$0xff] }
 0x4ad   :  { %2964 = vmatpush.msra.mxu1 %v2634_v8  ;;  %2984 = vmatpush.msra.mxu2 %v2320_v10  ;;  %v2649_v8 = vld [vmem:[#allocation22 + $0xcc8] sm:$0xff]  ;;  %v2335_v10 = vld [vmem:[#allocation22 + $0x2f8] sm:$0xff] }
 0x4ae   :  { %3010 = vmatpush.msra.mxu3 %v2411_v40  ;;  %2881 = vmatmul.f32.vlgmr.msrb.gmra.mxu1 %v4639_v13  ;;  %v2426_v40 = vld [vmem:[#allocation22 + $0x5d0] sm:$0xff] }
 0x4af   :  { %2927 = vmatmul.f32.vlgmr.msrb.gmra.mxu3 %v4621_v29  ;;  %2939 = vmatpush.msra.mxu0 %v2536_v23  ;;  %v2551_v23 = vld [vmem:[#allocation22 + $0x9b8] sm:$0xff] }
 0x4b0   :  { %2965 = vmatpush.msra.mxu1 %v2627_v11  ;;  %2985 = vmatpush.msra.mxu2 %v2313_v14  ;;  %v2642_v11 = vld [vmem:[#allocation22 + $0xc90] sm:$0xff]  ;;  %v2328_v14 = vld [vmem:[#allocation22 + $0x2c0] sm:$0xff] }
 0x4b1   :  { %3011 = vmatpush.msra.mxu3 %v2404_v15  ;;  %2940 = vmatpush.msra.mxu0 %v2529_v17  ;;  %v2419_v15 = vld [vmem:[#allocation22 + $0x598] sm:$0xff]  ;;  %v2544_v17 = vld [vmem:[#allocation22 + $0x980] sm:$0xff] }
 0x4b2   :  { %2966 = vmatpush.msra.mxu1 %v2620_v41  ;;  %2986 = vmatpush.msra.mxu2 %v2306_v28  ;;  %v2635_v41 = vld [vmem:[#allocation22 + $0xc58] sm:$0xff]  ;;  %v2321_v28 = vld [vmem:[#allocation22 + $0x288] sm:$0xff] }
 0x4b3   :  { %3012 = vmatpush.msra.mxu3 %v2397_v21  ;;  %2941 = vmatpush.msra.mxu0 %v2522_v24  ;;  %v2412_v21 = vld [vmem:[#allocation22 + $0x560] sm:$0xff]  ;;  %v2537_v24 = vld [vmem:[#allocation22 + $0x948] sm:$0xff] }
 0x4b4   :  { %2967 = vmatpush.msra.mxu1 %v2613_v4  ;;  %2987 = vmatpush.msra.mxu2 %v2299_v27  ;;  %v2628_v4 = vld [vmem:[#allocation22 + $0xc20] sm:$0xff]  ;;  %v2314_v27 = vld [vmem:[#allocation22 + $0x250] sm:$0xff] }
 0x4b5   :  { %3013 = vmatpush.msra.mxu3 %v2390_v48  ;;  %2858 = vmatmul.f32.vlgmr.msrb.gmra.mxu0 %v4643_v49  ;;  %v2405_v48 = vld [vmem:[#allocation22 + $0x528] sm:$0xff] }
 0x4b6   :  { %2904 = vmatmul.f32.vlgmr.msrb.gmra.mxu2 %v4624_v45  ;;  %2942 = vmatpush.msra.mxu0 %v2515_v33  ;;  %v2530_v33 = vld [vmem:[#allocation22 + $0x910] sm:$0xff] }
 0x4b7   :  { %2968 = vmatpush.msra.mxu1 %v2606_v34  ;;  %2988 = vmatpush.msra.mxu2 %v2292_v35  ;;  %v2621_v34 = vld [vmem:[#allocation22 + $0xbe8] sm:$0xff]  ;;  %v2307_v35 = vld [vmem:[#allocation22 + $0x218] sm:$0xff] }
 0x4b8   :  { %3014 = vmatpush.msra.mxu3 %v2383_v62  ;;  %2884 = vmatmul.f32.gmra.mxu1 %v4646_v3  ;;  %v2398_v62 = vld [vmem:[#allocation22 + $0x4f0] sm:$0xff] }
 0x4b9   :  { %2930 = vmatmul.f32.gmra.mxu3 %v4632_v46  ;;  %2943 = vmatpush.msra.mxu0 %v2508_v37  ;;  %v2523_v37 = vld [vmem:[#allocation22 + $0x8d8] sm:$0xff] }
 0x4ba   :  { %2969 = vmatpush.msra.mxu1 %v2599_v22  ;;  %2989 = vmatpush.msra.mxu2 %v2285_v31  ;;  %v2614_v22 = vld [vmem:[#allocation22 + $0xbb0] sm:$0xff]  ;;  %v2300_v31 = vld [vmem:[#allocation22 + $0x1e0] sm:$0xff] }
 0x4bb   :  { %3015 = vmatpush.msra.mxu3 %v2376_v57  ;;  %2944 = vmatpush.msra.mxu0 %v2501_v38  ;;  %v2391_v57 = vld [vmem:[#allocation22 + $0x4b8] sm:$0xff]  ;;  %v2516_v38 = vld [vmem:[#allocation22 + $0x8a0] sm:$0xff] }
 0x4bc   :  { %2970 = vmatpush.msra.mxu1 %v2592_v36  ;;  %2990 = vmatpush.msra.mxu2 %v2278_v30  ;;  %v2607_v36 = vld [vmem:[#allocation22 + $0xb78] sm:$0xff]  ;;  %v2293_v30 = vld [vmem:[#allocation22 + $0x1a8] sm:$0xff] }
 0x4bd   :  { %3016 = vmatpush.msra.mxu3 %v2369_v43  ;;  %2945 = vmatpush.msra.mxu0 %v2494_v19  ;;  %v2384_v43 = vld [vmem:[#allocation22 + $0x480] sm:$0xff]  ;;  %v2509_v19 = vld [vmem:[#allocation22 + $0x868] sm:$0xff] }
 0x4be   :  { %2971 = vmatpush.msra.mxu1 %v2585_v39  ;;  %2991 = vmatpush.msra.mxu2 %v2271_v44  ;;  %v2600_v39 = vld [vmem:[#allocation22 + $0xb40] sm:$0xff]  ;;  %v2286_v44 = vld [vmem:[#allocation22 + $0x170] sm:$0xff] }
 0x4bf   :  { %3017 = vmatpush.msra.mxu3 %v2362_v42  ;;  %2861 = vmatmul.f32.gmra.mxu0 %v4651_v7  ;;  %v2377_v42 = vld [vmem:[#allocation22 + $0x448] sm:$0xff] }
 0x4c0   :  { %2907 = vmatmul.f32.gmra.mxu2 %v4636_v26  ;;  %2946 = vmatpush.msra.mxu0 %v2487_v47  ;;  %v2502_v47 = vld [vmem:[#allocation22 + $0x830] sm:$0xff] }
 0x4c1   :  { %2972 = vmatpush.msra.mxu1 %v2578_v58  ;;  %2992 = vmatpush.msra.mxu2 %v2264_v50  ;;  %v2593_v58 = vld [vmem:[#allocation22 + $0xb08] sm:$0xff]  ;;  %v2279_v50 = vld [vmem:[#allocation22 + $0x138] sm:$0xff] }
 0x4c2   :  { %3018 = vmatpush.msra.mxu3 %v2355_v9  ;;  %2947 = vmatpush.msra.mxu0 %v2480_v52  ;;  %v2370_v9 = vld [vmem:[#allocation22 + $0x410] sm:$0xff]  ;;  %v2272_v52 = vld [vmem:[#allocation22 + $0x100] sm:$0xff] }
 0x4c3   :  { %3049 = vmatpush.msrb.mxu1 %v2684_v51  ;;  %2993 = vmatpush.msra.mxu2 %v2257_v54  ;;  %v2495_v51 = vld [vmem:[#allocation22 + $0x7f8] sm:$0xff] }
 0x4c4   :  { %3095 = vmatpush.msrb.mxu3 %v2461_v6  ;;  %2973 = vmatmul.f32.vlgmr.msra.gmra.mxu1 %v4639_v13  ;;  %v2586_v6 = vld [vmem:[#allocation22 + $0xad0] sm:$0xff]  ;;  %v2363_v54 = vld [vmem:[#allocation22 + $0x3d8] sm:$0xff] }
 0x4c5   :  { %3019 = vmatmul.f32.vlgmr.msra.gmra.mxu3 %v4621_v29  ;;  %3050 = vmatpush.msrb.mxu1 %v2677_v55  ;;  %v2488_v55 = vld [vmem:[#allocation22 + $0x7c0] sm:$0xff] }
 0x4c6   :  { %3096 = vmatpush.msrb.mxu3 %v2454_v16  ;;  %2948 = vmatpush.msra.mxu0 %v2473_v53  ;;  %v2579_v16 = vld [vmem:[#allocation22 + $0xa98] sm:$0xff]  ;;  %v2265_v53 = vld [vmem:[#allocation22 + $0xc8] sm:$0xff] }
 0x4c7   :  { %2994 = vmatpush.msra.mxu2 %v2250_v18  ;;  %3051 = vmatpush.msrb.mxu1 %v2670_v32  ;;  %v2356_v18 = vld [vmem:[#allocation22 + $0x3a0] sm:$0xff]  ;;  %v2685_v32 = vld [vmem:[#allocation22 + $0xde8] sm:$0xff] }
 0x4c8   :  { %3097 = vmatpush.msrb.mxu3 %v2447_v12  ;;  %2949 = vmatpush.msra.mxu0 %v2466_v63  ;;  %v2462_v12 = vld [vmem:[#allocation22 + $0x6f0] sm:$0xff]  ;;  %v2481_v63 = vld [vmem:[#allocation22 + $0x788] sm:$0xff] }
 0x4c9   :  { %2995 = vmatpush.msra.mxu2 %v2243_v56  ;;  %3052 = vmatpush.msrb.mxu1 %v2663_v60  ;;  %v2258_v56 = vld [vmem:[#allocation22 + $0x90] sm:$0xff]  ;;  %v2455_v60 = vld [vmem:[#allocation22 + $0x6b8] sm:$0xff] }
 0x4ca   :  { %3026 = vmatpush.msrb.mxu0 %v2572_v59  ;;  %3098 = vmatpush.msrb.mxu3 %v2440_v1  ;;  %v2678_v59 = vld [vmem:[#allocation22 + $0xdb0] sm:$0xff]  ;;  %v2251_v1 = vld [vmem:[#allocation22 + $0x58] sm:$0xff] }
 0x4cb   :  { %3072 = vmatpush.msrb.mxu2 %v2349_v61  ;;  %2950 = vmatmul.f32.vlgmr.msra.gmra.mxu0 %v4643_v49  ;;  %v2474_v61 = vld [vmem:[#allocation22 + $0x750] sm:$0xff] }
 0x4cc   :  { %2996 = vmatmul.f32.vlgmr.msra.gmra.mxu2 %v4624_v45  ;;  %3027 = vmatpush.msrb.mxu0 %v2565_v2  ;;  %v2671_v2 = vld [vmem:[#allocation22 + $0xd78] sm:$0xff] }
 0x4cd   :  { %3053 = vmatpush.msrb.mxu1 %v2656_v0  ;;  %3073 = vmatpush.msrb.mxu2 %v2342_v5  ;;  %v2448_v0 = vld [vmem:[#allocation22 + $0x680] sm:$0xff]  ;;  %v2467_v5 = vld [vmem:[#allocation22 + $0x718] sm:$0xff] }
 0x4ce   :  { %3099 = vmatpush.msrb.mxu3 %v2433_v25  ;;  %2976 = vmatmul.f32.gmra.mxu1 %v4646_v3  ;;  %v2244_v25 = vld [vmem:[#allocation22 + $0x20] sm:$0xff] }
 0x4cf   :  { %3022 = vmatmul.f32.gmra.mxu3 %v4632_v46  ;;  %3028 = vmatpush.msrb.mxu0 %v2558_v20  ;;  %v2573_v20 = vld [vmem:[#allocation22 + $0xa68] sm:$0xff] }
 0x4d0   :  { %3054 = vmatpush.msrb.mxu1 %v2649_v8  ;;  %3074 = vmatpush.msrb.mxu2 %v2335_v10  ;;  %v2664_v8 = vld [vmem:[#allocation22 + $0xd40] sm:$0xff]  ;;  %v2350_v10 = vld [vmem:[#allocation22 + $0x370] sm:$0xff] }
 0x4d1   :  { %3100 = vmatpush.msrb.mxu3 %v2426_v40  ;;  %3029 = vmatpush.msrb.mxu0 %v2551_v23  ;;  %v2441_v40 = vld [vmem:[#allocation22 + $0x648] sm:$0xff]  ;;  %v2566_v23 = vld [vmem:[#allocation22 + $0xa30] sm:$0xff] }
 0x4d2   :  { %3055 = vmatpush.msrb.mxu1 %v2642_v11  ;;  %3075 = vmatpush.msrb.mxu2 %v2328_v14  ;;  %v2657_v11 = vld [vmem:[#allocation22 + $0xd08] sm:$0xff]  ;;  %v2343_v14 = vld [vmem:[#allocation22 + $0x338] sm:$0xff] }
 0x4d3   :  { %3101 = vmatpush.msrb.mxu3 %v2419_v15  ;;  %3030 = vmatpush.msrb.mxu0 %v2544_v17  ;;  %v2434_v15 = vld [vmem:[#allocation22 + $0x610] sm:$0xff]  ;;  %v2559_v17 = vld [vmem:[#allocation22 + $0x9f8] sm:$0xff] }
 0x4d4   :  { %3056 = vmatpush.msrb.mxu1 %v2635_v41  ;;  %3076 = vmatpush.msrb.mxu2 %v2321_v28  ;;  %v2650_v41 = vld [vmem:[#allocation22 + $0xcd0] sm:$0xff]  ;;  %v2336_v28 = vld [vmem:[#allocation22 + $0x300] sm:$0xff] }
 0x4d5   :  { %3102 = vmatpush.msrb.mxu3 %v2412_v21  ;;  %2953 = vmatmul.f32.gmra.mxu0 %v4651_v7  ;;  %v2427_v21 = vld [vmem:[#allocation22 + $0x5d8] sm:$0xff] }
 0x4d6   :  { %2999 = vmatmul.f32.gmra.mxu2 %v4636_v26  ;;  %3031 = vmatpush.msrb.mxu0 %v2537_v24  ;;  %v2552_v24 = vld [vmem:[#allocation22 + $0x9c0] sm:$0xff] }
 0x4d7   :  { %3057 = vmatpush.msrb.mxu1 %v2628_v4  ;;  %3077 = vmatpush.msrb.mxu2 %v2314_v27  ;;  %v2643_v4 = vld [vmem:[#allocation22 + $0xc98] sm:$0xff]  ;;  %v2329_v27 = vld [vmem:[#allocation22 + $0x2c8] sm:$0xff] }
 0x4d8   :  { %3103 = vmatpush.msrb.mxu3 %v2405_v48  ;;  %3032 = vmatpush.msrb.mxu0 %v2530_v33  ;;  %v2420_v48 = vld [vmem:[#allocation22 + $0x5a0] sm:$0xff]  ;;  %v2545_v33 = vld [vmem:[#allocation22 + $0x988] sm:$0xff] }
 0x4d9   :  { %3058 = vmatpush.msrb.mxu1 %v2621_v34  ;;  %3078 = vmatpush.msrb.mxu2 %v2307_v35  ;;  %v2636_v34 = vld [vmem:[#allocation22 + $0xc60] sm:$0xff]  ;;  %v2322_v35 = vld [vmem:[#allocation22 + $0x290] sm:$0xff] }
 0x4da   :  { %3104 = vmatpush.msrb.mxu3 %v2398_v62  ;;  %3033 = vmatpush.msrb.mxu0 %v2523_v37  ;;  %v2413_v62 = vld [vmem:[#allocation22 + $0x568] sm:$0xff]  ;;  %v2538_v37 = vld [vmem:[#allocation22 + $0x950] sm:$0xff] }
 0x4db   :  { %3059 = vmatpush.msrb.mxu1 %v2614_v22  ;;  %3079 = vmatpush.msrb.mxu2 %v2300_v31  ;;  %v2629_v22 = vld [vmem:[#allocation22 + $0xc28] sm:$0xff]  ;;  %v2315_v31 = vld [vmem:[#allocation22 + $0x258] sm:$0xff] }
 0x4dc   :  { %3105 = vmatpush.msrb.mxu3 %v2391_v57  ;;  %3034 = vmatpush.msrb.mxu0 %v2516_v38  ;;  %v2406_v57 = vld [vmem:[#allocation22 + $0x530] sm:$0xff]  ;;  %v2531_v38 = vld [vmem:[#allocation22 + $0x918] sm:$0xff] }
 0x4dd   :  { %3060 = vmatpush.msrb.mxu1 %v2607_v36  ;;  %3080 = vmatpush.msrb.mxu2 %v2293_v30  ;;  %v2622_v36 = vld [vmem:[#allocation22 + $0xbf0] sm:$0xff]  ;;  %v2308_v30 = vld [vmem:[#allocation22 + $0x220] sm:$0xff] }
 0x4de   :  { %3106 = vmatpush.msrb.mxu3 %v2384_v43  ;;  %3035 = vmatpush.msrb.mxu0 %v2509_v19  ;;  %v2399_v43 = vld [vmem:[#allocation22 + $0x4f8] sm:$0xff]  ;;  %v2524_v19 = vld [vmem:[#allocation22 + $0x8e0] sm:$0xff] }
 0x4df   :  { %3061 = vmatpush.msrb.mxu1 %v2600_v39  ;;  %3081 = vmatpush.msrb.mxu2 %v2286_v44  ;;  %v2615_v39 = vld [vmem:[#allocation22 + $0xbb8] sm:$0xff]  ;;  %v2301_v44 = vld [vmem:[#allocation22 + $0x1e8] sm:$0xff] }
 0x4e0   :  { %3107 = vmatpush.msrb.mxu3 %v2377_v42  ;;  %3036 = vmatpush.msrb.mxu0 %v2502_v47  ;;  %v2392_v42 = vld [vmem:[#allocation22 + $0x4c0] sm:$0xff]  ;;  %v2517_v47 = vld [vmem:[#allocation22 + $0x8a8] sm:$0xff] }
 0x4e1   :  { %3062 = vmatpush.msrb.mxu1 %v2593_v58  ;;  %3082 = vmatpush.msrb.mxu2 %v2279_v50  ;;  %v2608_v58 = vld [vmem:[#allocation22 + $0xb80] sm:$0xff]  ;;  %v2294_v50 = vld [vmem:[#allocation22 + $0x1b0] sm:$0xff] }
 0x4e2   :  { %3108 = vmatpush.msrb.mxu3 %v2370_v9  ;;  %3037 = vmatpush.msrb.mxu0 %v2495_v51  ;;  %v2385_v9 = vld [vmem:[#allocation22 + $0x488] sm:$0xff]  ;;  %v2510_v51 = vld [vmem:[#allocation22 + $0x870] sm:$0xff] }
 0x4e3   :  { %3063 = vmatpush.msrb.mxu1 %v2586_v6  ;;  %3083 = vmatpush.msrb.mxu2 %v2272_v52  ;;  %v2601_v6 = vld [vmem:[#allocation22 + $0xb48] sm:$0xff]  ;;  %v2287_v52 = vld [vmem:[#allocation22 + $0x178] sm:$0xff] }
 0x4e4   :  { %3109 = vmatpush.msrb.mxu3 %v2363_v54  ;;  %3038 = vmatpush.msrb.mxu0 %v2488_v55  ;;  %v2378_v54 = vld [vmem:[#allocation22 + $0x450] sm:$0xff]  ;;  %v2503_v55 = vld [vmem:[#allocation22 + $0x838] sm:$0xff] }
 0x4e5   :  { %3064 = vmatpush.msrb.mxu1 %v2579_v16  ;;  %3084 = vmatpush.msrb.mxu2 %v2265_v53  ;;  %v2594_v16 = vld [vmem:[#allocation22 + $0xb10] sm:$0xff]  ;;  %v2280_v53 = vld [vmem:[#allocation22 + $0x140] sm:$0xff] }
 0x4e6   :  { %3110 = vmatpush.msrb.mxu3 %v2356_v18  ;;  %3065 = vmatmul.f32.vlgmr.msrb.gmra.mxu1 %v4639_v13  ;;  %v2371_v18 = vld [vmem:[#allocation22 + $0x418] sm:$0xff] }
 0x4e7   :  { %3111 = vmatmul.f32.vlgmr.msrb.gmra.mxu3 %v4621_v29  ;;  %3141 = vmatpush.msra.mxu1 %v2685_v32  ;;  %v2496_v32 = vld [vmem:[#allocation22 + $0x800] sm:$0xff] }
 0x4e8   :  { %3187 = vmatpush.msra.mxu3 %v2462_v12  ;;  %3039 = vmatpush.msrb.mxu0 %v2481_v63  ;;  %v2587_v12 = vld [vmem:[#allocation22 + $0xad8] sm:$0xff]  ;;  %v2273_v63 = vld [vmem:[#allocation22 + $0x108] sm:$0xff] }
 0x4e9   :  { %3085 = vmatpush.msrb.mxu2 %v2258_v56  ;;  %3142 = vmatpush.msra.mxu1 %v2678_v59  ;;  %v2364_v56 = vld [vmem:[#allocation22 + $0x3e0] sm:$0xff]  ;;  %v2489_v59 = vld [vmem:[#allocation22 + $0x7c8] sm:$0xff] }
 0x4ea   :  { %3188 = vmatpush.msra.mxu3 %v2455_v60  ;;  %3040 = vmatpush.msrb.mxu0 %v2474_v61  ;;  %v2580_v60 = vld [vmem:[#allocation22 + $0xaa0] sm:$0xff]  ;;  %v2266_v61 = vld [vmem:[#allocation22 + $0xd0] sm:$0xff] }
 0x4eb   :  { %3086 = vmatpush.msrb.mxu2 %v2251_v1  ;;  %3143 = vmatpush.msra.mxu1 %v2671_v2  ;;  %v2357_v1 = vld [vmem:[#allocation22 + $0x3a8] sm:$0xff]  ;;  %v2686_v2 = vld [vmem:[#allocation22 + $0xdf0] sm:$0xff] }
 0x4ec   :  { %3189 = vmatpush.msra.mxu3 %v2448_v0  ;;  %3041 = vmatpush.msrb.mxu0 %v2467_v5  ;;  %v2463_v0 = vld [vmem:[#allocation22 + $0x6f8] sm:$0xff]  ;;  %v2482_v5 = vld [vmem:[#allocation22 + $0x790] sm:$0xff] }
 0x4ed   :  { %3087 = vmatpush.msrb.mxu2 %v2244_v25  ;;  %3042 = vmatmul.f32.vlgmr.msrb.gmra.mxu0 %v4643_v49  ;;  %v2259_v25 = vld [vmem:[#allocation22 + $0x98] sm:$0xff] }
 0x4ee   :  { %3088 = vmatmul.f32.vlgmr.msrb.gmra.mxu2 %v4624_v45  ;;  %3118 = vmatpush.msra.mxu0 %v2573_v20  ;;  %v2679_v20 = vld [vmem:[#allocation22 + $0xdb8] sm:$0xff] }
 0x4ef   :  { %3144 = vmatpush.msra.mxu1 %v2664_v8  ;;  %3164 = vmatpush.msra.mxu2 %v2350_v10  ;;  %v2456_v8 = vld [vmem:[#allocation22 + $0x6c0] sm:$0xff]  ;;  %v2475_v10 = vld [vmem:[#allocation22 + $0x758] sm:$0xff] }
 0x4f0   :  { %3190 = vmatpush.msra.mxu3 %v2441_v40  ;;  %3068 = vmatmul.f32.gmra.mxu1 %v4646_v3  ;;  %v2252_v40 = vld [vmem:[#allocation22 + $0x60] sm:$0xff] }
 0x4f1   :  { %3114 = vmatmul.f32.gmra.mxu3 %v4632_v46  ;;  %3119 = vmatpush.msra.mxu0 %v2566_v23  ;;  %v2672_v23 = vld [vmem:[#allocation22 + $0xd80] sm:$0xff] }
 0x4f2   :  { %3145 = vmatpush.msra.mxu1 %v2657_v11  ;;  %3165 = vmatpush.msra.mxu2 %v2343_v14  ;;  %v2449_v11 = vld [vmem:[#allocation22 + $0x688] sm:$0xff]  ;;  %v2468_v14 = vld [vmem:[#allocation22 + $0x720] sm:$0xff] }
 0x4f3   :  { %3191 = vmatpush.msra.mxu3 %v2434_v15  ;;  %3120 = vmatpush.msra.mxu0 %v2559_v17  ;;  %v2245_v15 = vld [vmem:[#allocation22 + $0x28] sm:$0xff]  ;;  %v2574_v17 = vld [vmem:[#allocation22 + $0xa70] sm:$0xff] }
 0x4f4   :  { %3146 = vmatpush.msra.mxu1 %v2650_v41  ;;  %3166 = vmatpush.msra.mxu2 %v2336_v28  ;;  %v2665_v41 = vld [vmem:[#allocation22 + $0xd48] sm:$0xff]  ;;  %v2351_v28 = vld [vmem:[#allocation22 + $0x378] sm:$0xff] }
 0x4f5   :  { %3192 = vmatpush.msra.mxu3 %v2427_v21  ;;  %3121 = vmatpush.msra.mxu0 %v2552_v24  ;;  %v2442_v21 = vld [vmem:[#allocation22 + $0x650] sm:$0xff]  ;;  %v2567_v24 = vld [vmem:[#allocation22 + $0xa38] sm:$0xff] }
 0x4f6   :  { %3147 = vmatpush.msra.mxu1 %v2643_v4  ;;  %3167 = vmatpush.msra.mxu2 %v2329_v27  ;;  %v4683_v4 = vld [vmem:[#allocation23] sm:$0xff]  ;;  %v2658_v27 = vld [vmem:[#allocation22 + $0xd10] sm:$0xff] }
 0x4f7   :  { %3193 = vmatpush.msra.mxu3 %v2420_v48  ;;  %3045 = vmatmul.f32.gmra.mxu0 %v4651_v7  ;;  %v2344_v48 = vld [vmem:[#allocation22 + $0x340] sm:$0xff] }
 0x4f8   :  { %3091 = vmatmul.f32.gmra.mxu2 %v4636_v26  ;;  %3122 = vmatpush.msra.mxu0 %v2545_v33  ;;  %v2435_v33 = vld [vmem:[#allocation22 + $0x618] sm:$0xff] }
 0x4f9   :  { %3148 = vmatpush.msra.mxu1 %v2636_v34  ;;  %3168 = vmatpush.msra.mxu2 %v2322_v35  ;;  %v2560_v34 = vld [vmem:[#allocation22 + $0xa00] sm:$0xff]  ;;  %v2651_v35 = vld [vmem:[#allocation22 + $0xcd8] sm:$0xff] }
 0x4fa   :  { %3194 = vmatpush.msra.mxu3 %v2413_v62  ;;  %3123 = vmatpush.msra.mxu0 %v2538_v37  ;;  %v2337_v62 = vld [vmem:[#allocation22 + $0x308] sm:$0xff]  ;;  %v2690_v37 = vperm.slane %v4683_v4, 0 }
 0x4fb   :  { %3149 = vmatpush.msra.mxu1 %v2629_v22  ;;  %3169 = vmatpush.msra.mxu2 %v2315_v31  ;;  %v2428_v22 = vld [vmem:[#allocation22 + $0x5e0] sm:$0xff]  ;;  %v2553_v31 = vld [vmem:[#allocation22 + $0x9c8] sm:$0xff] }
 0x4fc   :  { %3195 = vmatpush.msra.mxu3 %v2406_v57  ;;  %3124 = vmatpush.msra.mxu0 %v2531_v38  ;;  %v2644_v38 = vld [vmem:[#allocation22 + $0xca0] sm:$0xff] }
 0x4fd   :  { %3150 = vmatpush.msra.mxu1 %v2622_v36  ;;  %3170 = vmatpush.msra.mxu2 %v2308_v30  ;;  %v2330_v36 = vld [vmem:[#allocation22 + $0x2d0] sm:$0xff]  ;;  %v2421_v30 = vld [vmem:[#allocation22 + $0x5a8] sm:$0xff] }
 0x4fe   :  { %3196 = vmatpush.msra.mxu3 %v2399_v43  ;;  %3125 = vmatpush.msra.mxu0 %v2524_v19  ;;  %v2546_v19 = vld [vmem:[#allocation22 + $0x990] sm:$0xff] }
 0x4ff   :  { %3151 = vmatpush.msra.mxu1 %v2615_v39  ;;  %3171 = vmatpush.msra.mxu2 %v2301_v44  ;;  %v2637_v39 = vld [vmem:[#allocation22 + $0xc68] sm:$0xff]  ;;  %v2323_v44 = vld [vmem:[#allocation22 + $0x298] sm:$0xff] }
 0x500   :  { %3197 = vmatpush.msra.mxu3 %v2392_v42  ;;  %3126 = vmatpush.msra.mxu0 %v2517_v47  ;;  %v2414_v42 = vld [vmem:[#allocation22 + $0x570] sm:$0xff]  ;;  %v2539_v47 = vld [vmem:[#allocation22 + $0x958] sm:$0xff] }
 0x501   :  { %3152 = vmatpush.msra.mxu1 %v2608_v58  ;;  %3172 = vmatpush.msra.mxu2 %v2294_v50  ;;  %v2744_v58 = vpop.f32.mrf.mxu3  ;;  %v2630_v50 = vld [vmem:[#allocation22 + $0xc30] sm:$0xff] }
 0x502   :  { %3198 = vmatpush.msra.mxu3 %v2385_v9  ;;  %3127 = vmatpush.msra.mxu0 %v2510_v51  ;;  %v2316_v9 = vld [vmem:[#allocation22 + $0x260] sm:$0xff]  ;;  %v2407_v51 = vld [vmem:[#allocation22 + $0x538] sm:$0xff] }
 0x503   :  { %3153 = vmatpush.msra.mxu1 %v2601_v6  ;;  %3173 = vmatpush.msra.mxu2 %v2287_v52  ;;  %v2721_v57 = vpop.f32.mrf.mxu2  ;;  %v2532_v6 = vld [vmem:[#allocation22 + $0x920] sm:$0xff] }
 0x504   :  { %3199 = vmatpush.msra.mxu3 %v2378_v54  ;;  %3128 = vmatpush.msra.mxu0 %v2503_v55  ;;  %v2722_v43 = vadd.f32 %v2721_v57, %v2690_v37  ;;  %v2623_v54 = vld [vmem:[#allocation22 + $0xbf8] sm:$0xff]  ;;  %v2309_v55 = vld [vmem:[#allocation22 + $0x228] sm:$0xff] }
 0x505   :  { %3154 = vmatpush.msra.mxu1 %v2594_v16  ;;  %3174 = vmatpush.msra.mxu2 %v2280_v53  ;;  %v2400_v53 = vld [vmem:[#allocation22 + $0x500] sm:$0xff] }
 0x506   :  { %3200 = vmatpush.msra.mxu3 %v2371_v18  ;;  %3129 = vmatpush.msra.mxu0 %v2496_v32  ;;  %v2745_v52 = vadd.f32 %v2744_v58, %v2722_v43  ;;  %v2525_v18 = vld [vmem:[#allocation22 + $0x8e8] sm:$0xff]  ;;  %v2687_v43 = vld [vmem:[#allocation22 + $0xdf8] sm:$0xff]  ;;  %v2680_v58 = vld [vmem:[#allocation22 + $0xdc0] sm:$0xff] }
 0x507   :  { %3155 = vmatpush.msra.mxu1 %v2587_v12  ;;  %3175 = vmatpush.msra.mxu2 %v2273_v63  ;;  %v2616_v12 = vld [vmem:[#allocation22 + $0xbc0] sm:$0xff]  ;;  %v2302_v63 = vld [vmem:[#allocation22 + $0x1f0] sm:$0xff] }
 0x508   :  { %3201 = vmatpush.msra.mxu3 %v2364_v56  ;;  %3130 = vmatpush.msra.mxu0 %v2489_v59 }
 0x509   :  { %3156 = vmatpush.msra.mxu1 %v2580_v60  ;;  %3176 = vmatpush.msra.mxu2 %v2266_v61  ;;  %v2393_v60 = vld [vmem:[#allocation22 + $0x4c8] sm:$0xff]  ;;  %v2518_v61 = vld [vmem:[#allocation22 + $0x8b0] sm:$0xff] }
 0x50a   :  { %3202 = vmatpush.msra.mxu3 %v2357_v1  ;;  %3157 = vmatmul.f32.vlgmr.msra.gmra.mxu1 %v4639_v13 }
 0x50b   :  { %3203 = vmatmul.f32.vlgmr.msra.gmra.mxu3 %v4621_v29  ;;  %3233 = vmatpush.msrb.mxu1 %v2686_v2  ;;  %v2609_v2 = vld [vmem:[#allocation22 + $0xb88] sm:$0xff] }
 0x50c   :  { %3279 = vmatpush.msrb.mxu3 %v2463_v0  ;;  %3131 = vmatpush.msra.mxu0 %v2482_v5  ;;  %v2295_v0 = vld [vmem:[#allocation22 + $0x1b8] sm:$0xff]  ;;  %v2386_v5 = vld [vmem:[#allocation22 + $0x490] sm:$0xff] }
 0x50d   :  { %3177 = vmatpush.msra.mxu2 %v2259_v25  ;;  %3234 = vmatpush.msrb.mxu1 %v2679_v20  ;;  %v2511_v25 = vld [vmem:[#allocation22 + $0x878] sm:$0xff] }
 0x50e   :  { %3280 = vmatpush.msrb.mxu3 %v2456_v8  ;;  %3132 = vmatpush.msra.mxu0 %v2475_v10  ;;  %v2602_v10 = vld [vmem:[#allocation22 + $0xb50] sm:$0xff] }
 0x50f   :  { %3178 = vmatpush.msra.mxu2 %v2252_v40  ;;  %3235 = vmatpush.msrb.mxu1 %v2672_v23  ;;  %v2288_v40 = vld [vmem:[#allocation22 + $0x180] sm:$0xff]  ;;  %v2379_v23 = vld [vmem:[#allocation22 + $0x458] sm:$0xff] }
 0x510   :  { %3281 = vmatpush.msrb.mxu3 %v2449_v11  ;;  %3133 = vmatpush.msra.mxu0 %v2468_v14  ;;  %v2504_v11 = vld [vmem:[#allocation22 + $0x840] sm:$0xff]  ;;  %v2595_v14 = vld [vmem:[#allocation22 + $0xb18] sm:$0xff] }
 0x511   :  { %3179 = vmatpush.msra.mxu2 %v2245_v15  ;;  %3134 = vmatmul.f32.vlgmr.msra.gmra.mxu0 %v4643_v49  ;;  %v2281_v15 = vld [vmem:[#allocation22 + $0x148] sm:$0xff] }
 0x512   :  { %3180 = vmatmul.f32.vlgmr.msra.gmra.mxu2 %v4624_v45  ;;  %3210 = vmatpush.msrb.mxu0 %v2574_v17 }
 0x513   :  { %3236 = vmatpush.msrb.mxu1 %v2665_v41  ;;  %3256 = vmatpush.msrb.mxu2 %v2351_v28  ;;  %v2372_v41 = vld [vmem:[#allocation22 + $0x420] sm:$0xff]  ;;  %v2497_v28 = vld [vmem:[#allocation22 + $0x808] sm:$0xff] }
 0x514   :  { %3282 = vmatpush.msrb.mxu3 %v2442_v21  ;;  %3160 = vmatmul.f32.gmra.mxu1 %v4646_v3 }
 0x515   :  { %3206 = vmatmul.f32.gmra.mxu3 %v4632_v46  ;;  %3211 = vmatpush.msrb.mxu0 %v2567_v24  ;;  %v2588_v24 = vld [vmem:[#allocation22 + $0xae0] sm:$0xff] }
 0x516   :  { %3237 = vmatpush.msrb.mxu1 %v2658_v27  ;;  %3257 = vmatpush.msrb.mxu2 %v2344_v48  ;;  %v2747_v17 = vpop.f32.mrf.mxu3  ;;  %v2274_v27 = vld [vmem:[#allocation22 + $0x110] sm:$0xff] }
 0x517   :  { %3283 = vmatpush.msrb.mxu3 %v2435_v33  ;;  %3212 = vmatpush.msrb.mxu0 %v2560_v34  ;;  %v2365_v33 = vld [vmem:[#allocation22 + $0x3e8] sm:$0xff]  ;;  %v2490_v34 = vld [vmem:[#allocation22 + $0x7d0] sm:$0xff] }
 0x518   :  { %3238 = vmatpush.msrb.mxu1 %v2651_v35  ;;  %3258 = vmatpush.msrb.mxu2 %v2337_v62  ;;  %v2790_v56 = vpop.f32.mrf.mxu1  ;;  %v2691_v35 = vperm.slane %v4683_v4, 1 }
 0x519   :  { %3284 = vmatpush.msrb.mxu3 %v2428_v22  ;;  %3213 = vmatpush.msrb.mxu0 %v2553_v31  ;;  %v2267_v22 = vld [vmem:[#allocation22 + $0xd8] sm:$0xff] }
 0x51a   :  { %3239 = vmatpush.msrb.mxu1 %v2644_v38  ;;  %3259 = vmatpush.msrb.mxu2 %v2330_v36  ;;  %v2358_v36 = vld [vmem:[#allocation22 + $0x3b0] sm:$0xff] }
 0x51b   :  { %3285 = vmatpush.msrb.mxu3 %v2421_v30  ;;  %3137 = vmatmul.f32.gmra.mxu0 %v4651_v7  ;;  %v2724_v59 = vpop.f32.mrf.mxu2 }
 0x51c   :  { %3183 = vmatmul.f32.gmra.mxu2 %v4636_v26  ;;  %3214 = vmatpush.msrb.mxu0 %v2546_v19  ;;  %v2725_v20 = vadd.f32 %v2724_v59, %v2690_v37  ;;  %v2581_v37 = vld [vmem:[#allocation22 + $0xaa8] sm:$0xff] }
 0x51d   :  { %3240 = vmatpush.msrb.mxu1 %v2637_v39  ;;  %3260 = vmatpush.msrb.mxu2 %v2323_v44  ;;  %v2483_v39 = vld [vmem:[#allocation22 + $0x798] sm:$0xff] }
 0x51e   :  { %3286 = vmatpush.msrb.mxu3 %v2414_v42  ;;  %3215 = vmatpush.msrb.mxu0 %v2539_v47  ;;  %v2767_v16 = vpop.f32.mrf.mxu0  ;;  %v2748_v21 = vadd.f32 %v2747_v17, %v2725_v20  ;;  %v2260_v47 = vld [vmem:[#allocation22 + $0xa0] sm:$0xff] }
 0x51f   :  { %3241 = vmatpush.msrb.mxu1 %v2630_v50  ;;  %3261 = vmatpush.msrb.mxu2 %v2316_v9  ;;  %v2768_v32 = vadd.f32 %v2767_v16, %v2745_v52  ;;  %v2476_v50 = vld [vmem:[#allocation22 + $0x760] sm:$0xff]  ;;  %v2253_v9 = vld [vmem:[#allocation22 + $0x68] sm:$0xff] }
 0x520   :  { %3287 = vmatpush.msrb.mxu3 %v2407_v51  ;;  %3216 = vmatpush.msrb.mxu0 %v2532_v6  ;;  %v2673_v51 = vld [vmem:[#allocation22 + $0xd88] sm:$0xff]  ;;  %v2836_v6 = vpop.f32.mrf.mxu3 }
 0x521   :  { %3242 = vmatpush.msrb.mxu1 %v2623_v54  ;;  %3262 = vmatpush.msrb.mxu2 %v2309_v55  ;;  %v2791_v1 = vadd.f32 %v2790_v56, %v2768_v32  ;;  %v2793_v31 = vpop.f32.mrf.mxu1  ;;  %v2469_v52 = vld [vmem:[#allocation22 + $0x728] sm:$0xff]  ;;  %v2246_v55 = vld [vmem:[#allocation22 + $0x30] sm:$0xff] }
 0x522   :  { %3288 = vmatpush.msrb.mxu3 %v2400_v53  ;;  %3217 = vmatpush.msrb.mxu0 %v2525_v18  ;;  %v2575_v53 = vld [vmem:[#allocation22 + $0xa78] sm:$0xff]  ;;  %v2666_v32 = vld [vmem:[#allocation22 + $0xd50] sm:$0xff] }
 0x523   :  { %3243 = vmatpush.msrb.mxu1 %v2616_v12  ;;  %3263 = vmatpush.msrb.mxu2 %v2302_v63  ;;  %v3674_v8 = vmul.f32 -1.442695, %v2791_v1 }
 0x524   :  { %3289 = vmatpush.msrb.mxu3 %v2393_v60  ;;  %3218 = vmatpush.msrb.mxu0 %v2518_v61  ;;  %v2568_v61 = vld [vmem:[#allocation22 + $0xa40] sm:$0xff] }
 0x525   :  { %3244 = vmatpush.msrb.mxu1 %v2609_v2  ;;  %3264 = vmatpush.msrb.mxu2 %v2295_v0  ;;  %3754 = vpow2.f32 %v3674_v8  ;;  %v2813_v57 = vpop.f32.mrf.mxu2  ;;  %v2659_v0 = vld [vmem:[#allocation22 + $0xd18] sm:$0xff]  ;;  %v2561_v8 = vld [vmem:[#allocation22 + $0xa08] sm:$0xff] }
 0x526   :  { %3290 = vmatpush.msrb.mxu3 %v2386_v5  ;;  %3219 = vmatpush.msrb.mxu0 %v2511_v25  ;;  %v2814_v44 = vadd.f32 %v2813_v57, %v2691_v35  ;;  %v2631_v57 = vld [vmem:[#allocation22 + $0xc38] sm:$0xff] }
 0x527   :  { %3245 = vmatpush.msrb.mxu1 %v2602_v10  ;;  %3265 = vmatpush.msrb.mxu2 %v2288_v40  ;;  %v2652_v40 = vld [vmem:[#allocation22 + $0xce0] sm:$0xff] }
 0x528   :  { %3291 = vmatpush.msrb.mxu3 %v2379_v23  ;;  %3220 = vmatpush.msrb.mxu0 %v2504_v11  ;;  %v2770_v48 = vpop.f32.mrf.mxu0  ;;  %v2837_v54 = vadd.f32 %v2836_v6, %v2814_v44  ;;  %v2554_v23 = vld [vmem:[#allocation22 + $0x9d0] sm:$0xff]  ;;  %v2839_v11 = vpop.f32.mrf.mxu3 }
 0x529   :  { %3246 = vmatpush.msrb.mxu1 %v2595_v14  ;;  %3266 = vmatpush.msrb.mxu2 %v2281_v15  ;;  %v2771_v62 = vadd.f32 %v2770_v48, %v2748_v21  ;;  %v2645_v15 = vld [vmem:[#allocation22 + $0xca8] sm:$0xff]  ;;  %v2547_v21 = vld [vmem:[#allocation22 + $0x998] sm:$0xff] }
 0x52a   :  { %3292 = vmatpush.msrb.mxu3 %v2372_v41  ;;  %3221 = vmatpush.msrb.mxu0 %v2497_v28 }
 0x52b   :  { %v3755_v38 = vpop.eup %3754  ;;  %3247 = vmatpush.msrb.mxu1 %v2588_v24  ;;  %3267 = vmatpush.msrb.mxu2 %v2274_v27  ;;  %v2794_v30 = vadd.f32 %v2793_v31, %v2771_v62  ;;  %v2882_v12 = vpop.f32.mrf.mxu1 }
 0x52c   :  { %3293 = vmatpush.msrb.mxu3 %v2365_v33  ;;  %3222 = vmatpush.msrb.mxu0 %v2490_v34  ;;  %v4695_v19 = vadd.f32 1.0, %v3755_v38  ;;  %v2638_v33 = vld [vmem:[#allocation22 + $0xc70] sm:$0xff] }
 0x52d   :  { %3248 = vmatpush.msrb.mxu1 %v2581_v37  ;;  %3268 = vmatpush.msrb.mxu2 %v2267_v22  ;;  %v3681_v42 = vmul.f32 -1.442695, %v2794_v30  ;;  %v2540_v37 = vld [vmem:[#allocation22 + $0x960] sm:$0xff]  ;;  %v2692_v22 = vperm.slane %v4683_v4, 2 }
 0x52e   :  { %3294 = vmatpush.msrb.mxu3 %v2358_v36  ;;  %3249 = vmatmul.f32.vlgmr.msrb.gmra.mxu1 %v4639_v13  ;;  %3756 = vrcp.f32 %v4695_v19  ;;  %v3415_v20 = vand.u32 2147483648, %v4695_v19  ;;  %v3413_v10 = vand.u32 2147483647, %v4695_v19  ;;  %vm3409_vm9 = vweird.f32 %v4695_v19 }
 0x52f   :  { %3295 = vmatmul.f32.vlgmr.msrb.gmra.mxu3 %v4621_v29  ;;  %3325 = vmatpush.msra.mxu1 %v2687_v43  ;;  %3758 = vpow2.f32 %v3681_v42  ;;  %v2816_v63 = vpop.f32.mrf.mxu2  ;;  %v2624_v42 = vld [vmem:[#allocation22 + $0xc00] sm:$0xff] }
 0x530   :  { %3704 = vmatpush.msra.mxu3 %v2687_v43  ;;  %3223 = vmatpush.msrb.mxu0 %v2483_v39  ;;  %v2817_v5 = vadd.f32 %v2816_v63, %v2691_v35  ;;  %v3416_v41 = vor.u32 1.1754944e-38, %v3415_v20  ;;  %vm3414_vm11 = vcmp.eq.f32.partialorder %v3413_v10, 8.507059e+37  ;;  %v2533_v43 = vld [vmem:[#allocation22 + $0x928] sm:$0xff] }
 0x531   :  { %3269 = vmatpush.msrb.mxu2 %v2260_v47  ;;  %3326 = vmatpush.msra.mxu1 %v2680_v58  ;;  %v2526_v47 = vld [vmem:[#allocation22 + $0x8f0] sm:$0xff]  ;;  %v2589_v10 = vld [vmem:[#allocation22 + $0xae8] sm:$0xff] }
 0x532   :  { %3705 = vmatpush.msra.mxu3 %v2680_v58  ;;  %3224 = vmatpush.msrb.mxu0 %v2476_v50  ;;  %v2859_v16 = vpop.f32.mrf.mxu0  ;;  %v2840_v17 = vadd.f32 %v2839_v11, %v2817_v5  ;;  %v2617_v50 = vld [vmem:[#allocation22 + $0xbc8] sm:$0xff] }
 0x533   :  { %3270 = vmatpush.msrb.mxu2 %v2253_v9  ;;  %3327 = vmatpush.msra.mxu1 %v2673_v51  ;;  %v2860_v29 = vadd.f32 %v2859_v16, %v2837_v54  ;;  %v2928_v54 = vpop.f32.mrf.mxu3  ;;  %v2512_v16 = vld [vmem:[#allocation22 + $0x880] sm:$0xff] }
 0x534   :  { %v3757_v18 = vpop.eup %3756  ;;  %3706 = vmatpush.msra.mxu3 %v2673_v51  ;;  %3225 = vmatpush.msrb.mxu0 %v2469_v52  ;;  %v2519_v51 = vld [vmem:[#allocation22 + $0x8b8] sm:$0xff]  ;;  %v2610_v52 = vld [vmem:[#allocation22 + $0xb90] sm:$0xff] }
 0x535   :  { %v3759_v56 = vpop.eup %3758  ;;  %3271 = vmatpush.msrb.mxu2 %v2246_v55  ;;  %3226 = vmatmul.f32.vlgmr.msrb.gmra.mxu0 %v4643_v49  ;;  %v3405_v59 = vmul.f32 %v3757_v18, %v4695_v19  ;;  %v2883_v60 = vadd.f32 %v2882_v12, %v2860_v29  ;;  %vm3410_vm8 = vweird.f32 %v3757_v18  ;;  %v2885_v34 = vpop.f32.mrf.mxu1 }
 0x536   :  { %3272 = vmatmul.f32.vlgmr.msrb.gmra.mxu2 %v4624_v45  ;;  %3302 = vmatpush.msra.mxu0 %v2575_v53  ;;  %v4705_v1 = vadd.f32 1.0, %v3759_v56  ;;  %vm3411_vm10 = vmor %vm3409_vm9, %vm3410_vm8 }
 0x537   :  { %3688 = vmatpush.msra.mxu2 %v2575_v53  ;;  %3328 = vmatpush.msra.mxu1 %v2666_v32  ;;  %v3406_v2 = vsub.f32 1.0, %v3405_v59  ;;  %v3675_v25 = vmul.f32 -1.442695, %v2883_v60  ;;  %v2505_v59 = vld [vmem:[#allocation22 + $0x848] sm:$0xff] }
 0x538   :  { %3707 = vmatpush.msra.mxu3 %v2666_v32  ;;  %3252 = vmatmul.f32.gmra.mxu1 %v4646_v3  ;;  %3760 = vrcp.f32 %v4705_v1  ;;  %v3518_v39 = vand.u32 2147483647, %v4705_v1  ;;  %v3520_v44 = vand.u32 2147483648, %v4705_v1  ;;  %vm3514_vm13 = vweird.f32 %v4705_v1  ;;  %v2603_v32 = vld [vmem:[#allocation22 + $0xb58] sm:$0xff] }
 0x539   :  { %v3407_v45 = vmul.f32 %v3757_v18, %v3406_v2  ;;  %3298 = vmatmul.f32.gmra.mxu3 %v4632_v46  ;;  %3303 = vmatpush.msra.mxu0 %v2568_v61  ;;  %3762 = vpow2.f32 %v3675_v25  ;;  %v2905_v36 = vpop.f32.mrf.mxu2  ;;  %v2498_v25 = vld [vmem:[#allocation22 + $0x810] sm:$0xff] }
 0x53a   :  { %3689 = vmatpush.msra.mxu2 %v2568_v61  ;;  %3329 = vmatpush.msra.mxu1 %v2659_v0  ;;  %v2906_v58 = vadd.f32 %v2905_v36, %v2692_v22  ;;  %v3521_v6 = vor.u32 1.1754944e-38, %v3520_v44  ;;  %vm3519_vm15 = vcmp.eq.f32.partialorder %v3518_v39, 8.507059e+37  ;;  %v2596_v61 = vld [vmem:[#allocation22 + $0xb20] sm:$0xff] }
 0x53b   :  { %v3408_v14 = vadd.f32 %v3757_v18, %v3407_v45  ;;  %3708 = vmatpush.msra.mxu3 %v2659_v0  ;;  %3304 = vmatpush.msra.mxu0 %v2561_v8 }
 0x53c   :  { %3690 = vmatpush.msra.mxu2 %v2561_v8  ;;  %3330 = vmatpush.msra.mxu1 %v2652_v40  ;;  %v2862_v46 = vpop.f32.mrf.mxu0  ;;  %v2929_v53 = vadd.f32 %v2928_v54, %v2906_v58 }
 0x53d   :  { %v3412_v28 = vsel %vm3411_vm10, %v3757_v18, %v3408_v14  ;;  %3709 = vmatpush.msra.mxu3 %v2652_v40  ;;  %3305 = vmatpush.msra.mxu0 %v2554_v23  ;;  %v2863_v24 = vadd.f32 %v2862_v46, %v2840_v17  ;;  %v2931_v46 = vpop.f32.mrf.mxu3 }
 0x53e   :  { %v3761_v27 = vpop.eup %3760  ;;  %v3417_v48 = vsel %vm3414_vm11, %v3416_v41, %v3412_v28  ;;  %3691 = vmatpush.msra.mxu2 %v2554_v23  ;;  %3331 = vmatpush.msra.mxu1 %v2645_v15  ;;  %v2491_v23 = vld [vmem:[#allocation22 + $0x7d8] sm:$0xff]  ;;  %v2484_v28 = vld [vmem:[#allocation22 + $0x7a0] sm:$0xff] }
 0x53f   :  { %v3763_v35 = vpop.eup %3762  ;;  %3614 = vst [vmem:[#allocation25] sm:$0xff] %v3417_v48  ;;  %3710 = vmatpush.msra.mxu3 %v2645_v15  ;;  %3229 = vmatmul.f32.gmra.mxu0 %v4651_v7  ;;  %v3510_v62 = vmul.f32 %v3761_v27, %v4705_v1  ;;  %v2886_v31 = vadd.f32 %v2885_v34, %v2863_v24  ;;  %vm3515_vm12 = vweird.f32 %v3761_v27  ;;  %v2582_v15 = vld [vmem:[#allocation22 + $0xab0] sm:$0xff] }
 0x540   :  { %3275 = vmatmul.f32.gmra.mxu2 %v4636_v26  ;;  %3306 = vmatpush.msra.mxu0 %v2547_v21  ;;  %v4720_v38 = vadd.f32 1.0, %v3763_v35  ;;  %vm3516_vm14 = vmor %vm3514_vm13, %vm3515_vm12 }
 0x541   :  { %3692 = vmatpush.msra.mxu2 %v2547_v21  ;;  %3332 = vmatpush.msra.mxu1 %v2638_v33  ;;  %v3511_v30 = vsub.f32 1.0, %v3510_v62  ;;  %v3682_v19 = vmul.f32 -1.442695, %v2886_v31  ;;  %v2974_v2 = vpop.f32.mrf.mxu1 }
 0x542   :  { %3711 = vmatpush.msra.mxu3 %v2638_v33  ;;  %3307 = vmatpush.msra.mxu0 %v2540_v37  ;;  %3764 = vrcp.f32 %v4720_v38  ;;  %v3428_v8 = vand.u32 2147483647, %v4720_v38  ;;  %v3430_v45 = vand.u32 2147483648, %v4720_v38  ;;  %vm3424_vm1 = vweird.f32 %v4720_v38  ;;  %v2477_v33 = vld [vmem:[#allocation22 + $0x768] sm:$0xff] }
 0x543   :  { %v3512_v26 = vmul.f32 %v3761_v27, %v3511_v30  ;;  %3693 = vmatpush.msra.mxu2 %v2540_v37  ;;  %3333 = vmatpush.msra.mxu1 %v2631_v57  ;;  %3766 = vpow2.f32 %v3682_v19  ;;  %v2908_v0 = vpop.f32.mrf.mxu2  ;;  %v2470_v37 = vld [vmem:[#allocation22 + $0x730] sm:$0xff] }
 0x544   :  { %3712 = vmatpush.msra.mxu3 %v2631_v57  ;;  %3308 = vmatpush.msra.mxu0 %v2533_v43  ;;  %v2909_v11 = vadd.f32 %v2908_v0, %v2692_v22  ;;  %v3431_v41 = vor.u32 1.1754944e-38, %v3430_v45  ;;  %vm3429_vm3 = vcmp.eq.f32.partialorder %v3428_v8, 8.507059e+37 }
 0x545   :  { %v3513_v9 = vadd.f32 %v3761_v27, %v3512_v26  ;;  %3694 = vmatpush.msra.mxu2 %v2533_v43  ;;  %3334 = vmatpush.msra.mxu1 %v2624_v42 }
 0x546   :  { %3713 = vmatpush.msra.mxu3 %v2624_v42  ;;  %3309 = vmatpush.msra.mxu0 %v2526_v47  ;;  %v2932_v24 = vadd.f32 %v2931_v46, %v2909_v11 }
 0x547   :  { %v3517_v55 = vsel %vm3516_vm14, %v3761_v27, %v3513_v9  ;;  %3695 = vmatpush.msra.mxu2 %v2526_v47  ;;  %3335 = vmatpush.msra.mxu1 %v2617_v50 }
 0x548   :  { %v3765_v29 = vpop.eup %3764  ;;  %v3522_v18 = vsel %vm3519_vm15, %v3521_v6, %v3517_v55  ;;  %3714 = vmatpush.msra.mxu3 %v2617_v50  ;;  %3310 = vmatpush.msra.mxu0 %v2519_v51  ;;  %v2951_v12 = vpop.f32.mrf.mxu0 }
 0x549   :  { %v3767_v63 = vpop.eup %3766  ;;  %3621 = vst [vmem:[#allocation25 + $0x38] sm:$0xff] %v3522_v18  ;;  %3696 = vmatpush.msra.mxu2 %v2519_v51  ;;  %3336 = vmatpush.msra.mxu1 %v2610_v52  ;;  %v3420_v56 = vmul.f32 %v3765_v29, %v4720_v38  ;;  %v2952_v60 = vadd.f32 %v2951_v12, %v2929_v53  ;;  %vm3425_vm0 = vweird.f32 %v3765_v29 }
 0x54a   :  { %3715 = vmatpush.msra.mxu3 %v2610_v52  ;;  %3311 = vmatpush.msra.mxu0 %v2512_v16  ;;  %v4729_v1 = vadd.f32 1.0, %v3767_v63  ;;  %vm3426_vm2 = vmor %vm3424_vm1, %vm3425_vm0 }
 0x54b   :  { %v3421_v5 = vsub.f32 1.0, %v3420_v56  ;;  %3697 = vmatpush.msra.mxu2 %v2512_v16  ;;  %3337 = vmatpush.msra.mxu1 %v2603_v32  ;;  %v2975_v20 = vadd.f32 %v2974_v2, %v2952_v60  ;;  %v2977_v22 = vpop.f32.mrf.mxu1 }
 0x54c   :  { %3716 = vmatpush.msra.mxu3 %v2603_v32  ;;  %3312 = vmatpush.msra.mxu0 %v2505_v59  ;;  %3768 = vrcp.f32 %v4729_v1  ;;  %v3535_v36 = vand.u32 2147483648, %v4729_v1  ;;  %v3533_v43 = vand.u32 2147483647, %v4729_v1  ;;  %vm3529_vm5 = vweird.f32 %v4729_v1  ;;  %v3020_v32 = vpop.f32.mrf.mxu3 }
 0x54d   :  { %v3422_v40 = vmul.f32 %v3765_v29, %v3421_v5  ;;  %3698 = vmatpush.msra.mxu2 %v2505_v59  ;;  %3338 = vmatpush.msra.mxu1 %v2596_v61  ;;  %v3676_v14 = vmul.f32 -1.442695, %v2975_v20 }
 0x54e   :  { %3717 = vmatpush.msra.mxu3 %v2596_v61  ;;  %3313 = vmatpush.msra.mxu0 %v2498_v25  ;;  %v3536_v39 = vor.u32 1.1754944e-38, %v3535_v36  ;;  %vm3534_vm7 = vcmp.eq.f32.partialorder %v3533_v43, 8.507059e+37 }
 0x54f   :  { %v3423_v17 = vadd.f32 %v3765_v29, %v3422_v40  ;;  %3699 = vmatpush.msra.mxu2 %v2498_v25  ;;  %3339 = vmatpush.msra.mxu1 %v2589_v10  ;;  %3770 = vpow2.f32 %v3676_v14  ;;  %v2997_v6 = vpop.f32.mrf.mxu2 }
 0x550   :  { %3718 = vmatpush.msra.mxu3 %v2589_v10  ;;  %3314 = vmatpush.msra.mxu0 %v2491_v23 }
 0x551   :  { %v3427_v21 = vsel %vm3426_vm2, %v3765_v29, %v3423_v17  ;;  %3700 = vmatpush.msra.mxu2 %v2491_v23  ;;  %3340 = vmatpush.msra.mxu1 %v2582_v15 }
 0x552   :  { %v3769_v27 = vpop.eup %3768  ;;  %v3432_v48 = vsel %vm3429_vm3, %v3431_v41, %v3427_v21  ;;  %3719 = vmatpush.msra.mxu3 %v2582_v15  ;;  %3341 = vmatmul.f32.vlgmr.msra.gmra.mxu1 %v4639_v13  ;;  %v2954_v34 = vpop.f32.mrf.mxu0 }
 0x553   :  { %3615 = vst [vmem:[#allocation25 + $0x8] sm:$0xff] %v3432_v48  ;;  %v3525_v35 = vmul.f32 %v3769_v27, %v4729_v1  ;;  %3344 = vmatmul.f32.vlgmr.msra.gmra.mxu3 %v4646_v3  ;;  %3315 = vmatpush.msra.mxu0 %v2484_v28  ;;  %v2955_v62 = vadd.f32 %v2954_v34, %v2932_v24  ;;  %vm3530_vm4 = vweird.f32 %v3769_v27 }
 0x554   :  { %3701 = vmatpush.msra.mxu2 %v2484_v28  ;;  %vm3531_vm6 = vmor %vm3529_vm5, %vm3530_vm4  ;;  %v3023_v11 = vpop.f32.mrf.mxu3 }
 0x555   :  { %v3771_v31 = vpop.eup %3770  ;;  %v3526_v57 = vsub.f32 1.0, %v3525_v35  ;;  %3316 = vmatpush.msra.mxu0 %v2477_v33  ;;  %v2978_v38 = vadd.f32 %v2977_v22, %v2955_v62 }
 0x556   :  { %3702 = vmatpush.msra.mxu2 %v2477_v33  ;;  %v3392_v13 = vadd.f32 1.0, %v3771_v31  ;;  %v2694_v31 = vperm.slane %v4683_v4, 4 }
 0x557   :  { %v3527_v30 = vmul.f32 %v3769_v27, %v3526_v57  ;;  %3317 = vmatpush.msra.mxu0 %v2470_v37  ;;  %v3683_v19 = vmul.f32 -1.442695, %v2978_v38 }
 0x558   :  { %3703 = vmatpush.msra.mxu2 %v2470_v37  ;;  %3318 = vmatmul.f32.vlgmr.msra.gmra.mxu0 %v4643_v49  ;;  %3772 = vrcp.f32 %v3392_v13  ;;  %v2693_v49 = vperm.slane %v4683_v4, 3  ;;  %v3445_v51 = vand.u32 2147483648, %v3392_v13  ;;  %vm3439_vm9 = vweird.f32 %v3392_v13 }
 0x559   :  { %v3528_v3 = vadd.f32 %v3769_v27, %v3527_v30  ;;  %3321 = vmatmul.f32.vlgmr.msra.gmra.mxu2 %v4651_v7  ;;  %3774 = vpow2.f32 %v3683_v19  ;;  %v3443_v7 = vand.u32 2147483647, %v3392_v13  ;;  %v3000_v1 = vpop.f32.mrf.mxu2 }
 0x55a   :  { %v2998_v55 = vadd.f32 %v2997_v6, %v2693_v49  ;;  %v3446_v16 = vor.u32 1.1754944e-38, %v3445_v51  ;;  %v3001_v8 = vadd.f32 %v3000_v1, %v2693_v49 }
 0x55b   :  { %v3532_v44 = vsel %vm3531_vm6, %v3769_v27, %v3528_v3  ;;  %vm3444_vm11 = vcmp.eq.f32.partialorder %v3443_v7, 8.507059e+37 }
 0x55c   :  { %v3537_v42 = vsel %vm3534_vm7, %v3536_v39, %v3532_v44  ;;  %v3021_v63 = vadd.f32 %v3020_v32, %v2998_v55  ;;  %v3024_v14 = vadd.f32 %v3023_v11, %v3001_v8 }
 0x55d   :  { %3622 = vst [vmem:[#allocation25 + $0x40] sm:$0xff] %v3537_v42 }
 0x55e   :  { %v3773_v26 = vpop.eup %3772 }
 0x55f   :  { %v3775_v47 = vpop.eup %3774  ;;  %v3435_v58 = vmul.f32 %v3773_v26, %v3392_v13  ;;  %vm3440_vm8 = vweird.f32 %v3773_v26 }
 0x560   :  { %v3399_v50 = vadd.f32 1.0, %v3775_v47  ;;  %vm3441_vm10 = vmor %vm3439_vm9, %vm3440_vm8 }
 0x561   :  { %v3436_v9 = vsub.f32 1.0, %v3435_v58 }
 0x562   :  { %3776 = vrcp.f32 %v3399_v50  ;;  %v3550_v61 = vand.u32 2147483648, %v3399_v50  ;;  %v3548_v5 = vand.u32 2147483647, %v3399_v50  ;;  %vm3544_vm13 = vweird.f32 %v3399_v50 }
 0x563   :  { %v3437_v52 = vmul.f32 %v3773_v26, %v3436_v9  ;;  %v3066_v2 = vpop.f32.mrf.mxu1 }
 0x564   :  { %v3551_v10 = vor.u32 1.1754944e-38, %v3550_v61  ;;  %vm3549_vm15 = vcmp.eq.f32.partialorder %v3548_v5, 8.507059e+37 }
 0x565   :  { %v3438_v54 = vadd.f32 %v3773_v26, %v3437_v52 }
 0x567   :  { %v3442_v53 = vsel %vm3441_vm10, %v3773_v26, %v3438_v54 }
 0x568   :  { %v3777_v29 = vpop.eup %3776  ;;  %v3447_v18 = vsel %vm3444_vm11, %v3446_v16, %v3442_v53 }
 0x569   :  { %3616 = vst [vmem:[#allocation25 + $0x10] sm:$0xff] %v3447_v18  ;;  %v3540_v12 = vmul.f32 %v3777_v29, %v3399_v50  ;;  %vm3545_vm12 = vweird.f32 %v3777_v29 }
 0x56a   :  { %v3043_v56 = vpop.f32.mrf.mxu0  ;;  %vm3546_vm14 = vmor %vm3544_vm13, %vm3545_vm12  ;;  %v3112_v39 = vpop.f32.mrf.mxu3 }
 0x56b   :  { %v3541_v59 = vsub.f32 1.0, %v3540_v12  ;;  %v3044_v60 = vadd.f32 %v3043_v56, %v3021_v63 }
 0x56d   :  { %v3542_v0 = vmul.f32 %v3777_v29, %v3541_v59  ;;  %v3067_v25 = vadd.f32 %v3066_v2, %v3044_v60  ;;  %v3069_v41 = vpop.f32.mrf.mxu1 }
 0x56f   :  { %v3543_v20 = vadd.f32 %v3777_v29, %v3542_v0  ;;  %v3677_v45 = vmul.f32 -1.442695, %v3067_v25 }
 0x571   :  { %v3547_v40 = vsel %vm3546_vm14, %v3777_v29, %v3543_v20  ;;  %3778 = vpow2.f32 %v3677_v45  ;;  %v3089_v57 = vpop.f32.mrf.mxu2 }
 0x572   :  { %v3552_v23 = vsel %vm3549_vm15, %v3551_v10, %v3547_v40  ;;  %v3090_v30 = vadd.f32 %v3089_v57, %v2694_v31  ;;  %v2695_v10 = vperm.slane %v4683_v4, 5 }
 0x573   :  { %3623 = vst [vmem:[#allocation25 + $0x48] sm:$0xff] %v3552_v23 }
 0x574   :  { %v3046_v15 = vpop.f32.mrf.mxu0  ;;  %v3113_v42 = vadd.f32 %v3112_v39, %v3090_v30  ;;  %v3115_v29 = vpop.f32.mrf.mxu3 }
 0x575   :  { %v3047_v17 = vadd.f32 %v3046_v15, %v3024_v14 }
 0x577   :  { %v3779_v46 = vpop.eup %3778  ;;  %v3070_v28 = vadd.f32 %v3069_v41, %v3047_v17 }
 0x578   :  { %v3393_v21 = vadd.f32 1.0, %v3779_v46 }
 0x579   :  { %v3684_v24 = vmul.f32 -1.442695, %v3070_v28 }
 0x57a   :  { %3780 = vrcp.f32 %v3393_v21  ;;  %v3460_v62 = vand.u32 2147483648, %v3393_v21  ;;  %v3458_v22 = vand.u32 2147483647, %v3393_v21  ;;  %vm3454_vm1 = vweird.f32 %v3393_v21 }
 0x57b   :  { %3782 = vpow2.f32 %v3684_v24  ;;  %v3092_v49 = vpop.f32.mrf.mxu2 }
 0x57c   :  { %v3461_v36 = vor.u32 1.1754944e-38, %v3460_v62  ;;  %vm3459_vm3 = vcmp.eq.f32.partialorder %v3458_v22, 8.507059e+37  ;;  %v3093_v55 = vadd.f32 %v3092_v49, %v2694_v31 }
 0x57e   :  { %v3116_v18 = vadd.f32 %v3115_v29, %v3093_v55 }
 0x580   :  { %v3781_v27 = vpop.eup %3780 }
 0x581   :  { %v3783_v48 = vpop.eup %3782  ;;  %v3450_v33 = vmul.f32 %v3781_v27, %v3393_v21  ;;  %vm3455_vm0 = vweird.f32 %v3781_v27 }
 0x582   :  { %v3400_v34 = vadd.f32 1.0, %v3783_v48  ;;  %vm3456_vm2 = vmor %vm3454_vm1, %vm3455_vm0 }
 0x583   :  { %v3451_v35 = vsub.f32 1.0, %v3450_v33 }
 0x584   :  { %3784 = vrcp.f32 %v3400_v34  ;;  %v3565_v26 = vand.u32 2147483648, %v3400_v34  ;;  %v3563_v50 = vand.u32 2147483647, %v3400_v34  ;;  %vm3559_vm5 = vweird.f32 %v3400_v34 }
 0x585   :  { %v3452_v37 = vmul.f32 %v3781_v27, %v3451_v35 }
 0x586   :  { %v3566_v7 = vor.u32 1.1754944e-38, %v3565_v26  ;;  %vm3564_vm7 = vcmp.eq.f32.partialorder %v3563_v50, 8.507059e+37 }
 0x587   :  { %v3453_v38 = vadd.f32 %v3781_v27, %v3452_v37  ;;  %v3158_v51 = vpop.f32.mrf.mxu1 }
 0x589   :  { %v3457_v13 = vsel %vm3456_vm2, %v3781_v27, %v3453_v38 }
 0x58a   :  { %v3785_v43 = vpop.eup %3784  ;;  %v3462_v19 = vsel %vm3459_vm3, %v3461_v36, %v3457_v13 }
 0x58b   :  { %3617 = vst [vmem:[#allocation25 + $0x18] sm:$0xff] %v3462_v19  ;;  %v3555_v3 = vmul.f32 %v3785_v43, %v3400_v34  ;;  %vm3560_vm4 = vweird.f32 %v3785_v43 }
 0x58c   :  { %vm3561_vm6 = vmor %vm3559_vm5, %vm3560_vm4 }
 0x58d   :  { %v3556_v44 = vsub.f32 1.0, %v3555_v3 }
 0x58e   :  { %v3135_v47 = vpop.f32.mrf.mxu0  ;;  %v3204_v28 = vpop.f32.mrf.mxu3 }
 0x58f   :  { %v3557_v58 = vmul.f32 %v3785_v43, %v3556_v44  ;;  %v3136_v9 = vadd.f32 %v3135_v47, %v3113_v42 }
 0x591   :  { %v3558_v6 = vadd.f32 %v3785_v43, %v3557_v58  ;;  %v3159_v52 = vadd.f32 %v3158_v51, %v3136_v9  ;;  %v3161_v63 = vpop.f32.mrf.mxu1 }
 0x593   :  { %v3562_v54 = vsel %vm3561_vm6, %v3785_v43, %v3558_v6  ;;  %v3678_v16 = vmul.f32 -1.442695, %v3159_v52 }
 0x594   :  { %v3567_v53 = vsel %vm3564_vm7, %v3566_v7, %v3562_v54  ;;  %v3824_v54 = vld [vmem:[#allocation23] sm:$0xff] }
 0x595   :  { %3624 = vst [vmem:[#allocation25 + $0x50] sm:$0xff] %v3567_v53  ;;  %3786 = vpow2.f32 %v3678_v16  ;;  %v3181_v40 = vpop.f32.mrf.mxu2  ;;  %v2696_v55 = vperm.slane %v3824_v54, 6 }
 0x596   :  { %v3182_v15 = vadd.f32 %v3181_v40, %v2695_v10 }
 0x598   :  { %v3138_v32 = vpop.f32.mrf.mxu0  ;;  %v3205_v24 = vadd.f32 %v3204_v28, %v3182_v15  ;;  %v3207_v30 = vpop.f32.mrf.mxu3 }
 0x599   :  { %v3139_v12 = vadd.f32 %v3138_v32, %v3116_v18 }
 0x59b   :  { %v3787_v56 = vpop.eup %3786  ;;  %v3162_v59 = vadd.f32 %v3161_v63, %v3139_v12 }
 0x59c   :  { %v3394_v60 = vadd.f32 1.0, %v3787_v56 }
 0x59d   :  { %v3685_v61 = vmul.f32 -1.442695, %v3162_v59 }
 0x59e   :  { %3788 = vrcp.f32 %v3394_v60  ;;  %v3475_v20 = vand.u32 2147483648, %v3394_v60  ;;  %v3473_v45 = vand.u32 2147483647, %v3394_v60  ;;  %vm3469_vm9 = vweird.f32 %v3394_v60 }
 0x59f   :  { %3790 = vpow2.f32 %v3685_v61  ;;  %v3184_v35 = vpop.f32.mrf.mxu2 }
 0x5a0   :  { %v3476_v11 = vor.u32 1.1754944e-38, %v3475_v20  ;;  %vm3474_vm11 = vcmp.eq.f32.partialorder %v3473_v45, 8.507059e+37  ;;  %v3185_v38 = vadd.f32 %v3184_v35, %v2695_v10 }
 0x5a2   :  { %v3208_v43 = vadd.f32 %v3207_v30, %v3185_v38 }
 0x5a4   :  { %v3789_v1 = vpop.eup %3788 }
 0x5a5   :  { %v3791_v2 = vpop.eup %3790  ;;  %v3465_v0 = vmul.f32 %v3789_v1, %v3394_v60  ;;  %vm3470_vm8 = vweird.f32 %v3789_v1 }
 0x5a6   :  { %v3401_v5 = vadd.f32 1.0, %v3791_v2  ;;  %vm3471_vm10 = vmor %vm3469_vm9, %vm3470_vm8 }
 0x5a7   :  { %v3466_v25 = vsub.f32 1.0, %v3465_v0 }
 0x5a8   :  { %3792 = vrcp.f32 %v3401_v5  ;;  %v3580_v27 = vand.u32 2147483648, %v3401_v5  ;;  %v3578_v4 = vand.u32 2147483647, %v3401_v5  ;;  %vm3574_vm13 = vweird.f32 %v3401_v5 }
 0x5a9   :  { %v3467_v8 = vmul.f32 %v3789_v1, %v3466_v25 }
 0x5aa   :  { %v3581_v31 = vor.u32 1.1754944e-38, %v3580_v27  ;;  %vm3579_vm15 = vcmp.eq.f32.partialorder %v3578_v4, 8.507059e+37 }
 0x5ab   :  { %v3468_v23 = vadd.f32 %v3789_v1, %v3467_v8  ;;  %v3250_v62 = vpop.f32.mrf.mxu1 }
 0x5ad   :  { %v3472_v14 = vsel %vm3471_vm10, %v3789_v1, %v3468_v23 }
 0x5ae   :  { %v3793_v17 = vpop.eup %3792  ;;  %v3477_v41 = vsel %vm3474_vm11, %v3476_v11, %v3472_v14 }
 0x5af   :  { %3618 = vst [vmem:[#allocation25 + $0x20] sm:$0xff] %v3477_v41  ;;  %v3570_v46 = vmul.f32 %v3793_v17, %v3401_v5  ;;  %vm3575_vm12 = vweird.f32 %v3793_v17 }
 0x5b0   :  { %vm3576_vm14 = vmor %vm3574_vm13, %vm3575_vm12 }
 0x5b1   :  { %v3571_v21 = vsub.f32 1.0, %v3570_v46 }
 0x5b2   :  { %v3227_v48 = vpop.f32.mrf.mxu0  ;;  %v3296_v7 = vpop.f32.mrf.mxu3 }
 0x5b3   :  { %v3572_v33 = vmul.f32 %v3793_v17, %v3571_v21  ;;  %v3228_v34 = vadd.f32 %v3227_v48, %v3205_v24 }
 0x5b5   :  { %v3573_v37 = vadd.f32 %v3793_v17, %v3572_v33  ;;  %v3251_v22 = vadd.f32 %v3250_v62, %v3228_v34  ;;  %v3253_v39 = vpop.f32.mrf.mxu1 }
 0x5b7   :  { %v3577_v57 = vsel %vm3576_vm14, %v3793_v17, %v3573_v37  ;;  %v3679_v36 = vmul.f32 -1.442695, %v3251_v22 }
 0x5b8   :  { %v3582_v13 = vsel %vm3579_vm15, %v3581_v31, %v3577_v57 }
 0x5b9   :  { %3625 = vst [vmem:[#allocation25 + $0x58] sm:$0xff] %v3582_v13  ;;  %3794 = vpow2.f32 %v3679_v36  ;;  %v3273_v49 = vpop.f32.mrf.mxu2 }
 0x5ba   :  { %v3274_v32 = vadd.f32 %v3273_v49, %v2696_v55 }
 0x5bc   :  { %v3230_v19 = vpop.f32.mrf.mxu0  ;;  %v3297_v61 = vadd.f32 %v3296_v7, %v3274_v32  ;;  %v3299_v5 = vpop.f32.mrf.mxu3 }
 0x5bd   :  { %v3231_v3 = vadd.f32 %v3230_v19, %v3208_v43 }
 0x5bf   :  { %v3795_v44 = vpop.eup %3794  ;;  %v3254_v42 = vadd.f32 %v3253_v39, %v3231_v3 }
 0x5c0   :  { %v3395_v26 = vadd.f32 1.0, %v3795_v44 }
 0x5c1   :  { %v3686_v47 = vmul.f32 -1.442695, %v3254_v42 }
 0x5c2   :  { %3796 = vrcp.f32 %v3395_v26  ;;  %v3490_v52 = vand.u32 2147483648, %v3395_v26  ;;  %v3488_v53 = vand.u32 2147483647, %v3395_v26  ;;  %vm3484_vm1 = vweird.f32 %v3395_v26 }
 0x5c3   :  { %3798 = vpow2.f32 %v3686_v47  ;;  %v3276_v60 = vpop.f32.mrf.mxu2 }
 0x5c4   :  { %v3491_v18 = vor.u32 1.1754944e-38, %v3490_v52  ;;  %vm3489_vm3 = vcmp.eq.f32.partialorder %v3488_v53, 8.507059e+37  ;;  %v3277_v45 = vadd.f32 %v3276_v60, %v2696_v55 }
 0x5c6   :  { %v3300_v17 = vadd.f32 %v3299_v5, %v3277_v45 }
 0x5c8   :  { %v3797_v58 = vpop.eup %3796 }
 0x5c9   :  { %v3799_v50 = vpop.eup %3798  ;;  %v3480_v9 = vmul.f32 %v3797_v58, %v3395_v26  ;;  %vm3485_vm0 = vweird.f32 %v3797_v58 }
 0x5ca   :  { %v3402_v51 = vadd.f32 1.0, %v3799_v50  ;;  %vm3486_vm2 = vmor %vm3484_vm1, %vm3485_vm0 }
 0x5cb   :  { %v3481_v6 = vsub.f32 1.0, %v3480_v9 }
 0x5cc   :  { %3800 = vrcp.f32 %v3402_v51  ;;  %v3595_v0 = vand.u32 2147483648, %v3402_v51  ;;  %v3593_v8 = vand.u32 2147483647, %v3402_v51  ;;  %vm3589_vm5 = vweird.f32 %v3402_v51 }
 0x5cd   :  { %v3482_v16 = vmul.f32 %v3797_v58, %v3481_v6 }
 0x5ce   :  { %v3596_v11 = vor.u32 1.1754944e-38, %v3595_v0  ;;  %vm3594_vm7 = vcmp.eq.f32.partialorder %v3593_v8, 8.507059e+37 }
 0x5cf   :  { %v3483_v29 = vadd.f32 %v3797_v58, %v3482_v16  ;;  %v3342_v10 = vpop.f32.mrf.mxu1 }
 0x5d1   :  { %v3487_v12 = vsel %vm3486_vm2, %v3797_v58, %v3483_v29 }
 0x5d2   :  { %v3801_v63 = vpop.eup %3800  ;;  %v3492_v56 = vsel %vm3489_vm3, %v3491_v18, %v3487_v12 }
 0x5d3   :  { %3619 = vst [vmem:[#allocation25 + $0x28] sm:$0xff] %v3492_v56  ;;  %v3585_v59 = vmul.f32 %v3801_v63, %v3402_v51  ;;  %vm3590_vm4 = vweird.f32 %v3801_v63 }
 0x5d4   :  { %vm3591_vm6 = vmor %vm3589_vm5, %vm3590_vm4 }
 0x5d5   :  { %v3586_v1 = vsub.f32 1.0, %v3585_v59  ;;  %v3319_v2 = vpop.f32.mrf.mxu0 }
 0x5d6   :  { %v3320_v25 = vadd.f32 %v3319_v2, %v3297_v61  ;;  %v3345_v21 = vpop.f32.mrf.mxu3 }
 0x5d7   :  { %v3587_v20 = vmul.f32 %v3801_v63, %v3586_v1 }
 0x5d8   :  { %v3343_v40 = vadd.f32 %v3342_v10, %v3320_v25 }
 0x5d9   :  { %v3588_v23 = vadd.f32 %v3801_v63, %v3587_v20 }
 0x5da   :  { %v3680_v14 = vmul.f32 -1.442695, %v3343_v40 }
 0x5db   :  { %v3592_v15 = vsel %vm3591_vm6, %v3801_v63, %v3588_v23 }
 0x5dc   :  { %v3597_v41 = vsel %vm3594_vm7, %v3596_v11, %v3592_v15  ;;  %3802 = vpow2.f32 %v3680_v14  ;;  %v3322_v46 = vpop.f32.mrf.mxu2 }
 0x5dd   :  { %3626 = vst [vmem:[#allocation25 + $0x60] sm:$0xff] %v3597_v41  ;;  %v3323_v28 = vadd.f32 %v3322_v46, %v3300_v17 }
 0x5df   :  { %v3346_v24 = vadd.f32 %v3345_v21, %v3323_v28 }
 0x5e1   :  { %v3687_v27 = vmul.f32 -1.442695, %v3346_v24 }
 0x5e2   :  { %v3803_v48 = vpop.eup %3802 }
 0x5e3   :  { %v3396_v33 = vadd.f32 1.0, %v3803_v48  ;;  %3804 = vpow2.f32 %v3687_v27 }
 0x5e5   :  { %3806 = vrcp.f32 %v3396_v33  ;;  %v3505_v22 = vand.u32 2147483648, %v3396_v33  ;;  %v3503_v57 = vand.u32 2147483647, %v3396_v33  ;;  %vm3499_vm9 = vweird.f32 %v3396_v33 }
 0x5e7   :  { %v3506_v13 = vor.u32 1.1754944e-38, %v3505_v22  ;;  %vm3504_vm11 = vcmp.eq.f32.partialorder %v3503_v57, 8.507059e+37 }
 0x5e9   :  { %v3805_v4 = vpop.eup %3804 }
 0x5ea   :  { %v3403_v34 = vadd.f32 1.0, %v3805_v4 }
 0x5eb   :  { %v3807_v35 = vpop.eup %3806 }
 0x5ec   :  { %v3495_v62 = vmul.f32 %v3807_v35, %v3396_v33  ;;  %3808 = vrcp.f32 %v3403_v34  ;;  %vm3500_vm8 = vweird.f32 %v3807_v35  ;;  %v3610_v39 = vand.u32 2147483648, %v3403_v34 }
 0x5ed   :  { %vm3501_vm10 = vmor %vm3499_vm9, %vm3500_vm8  ;;  %v3608_v42 = vand.u32 2147483647, %v3403_v34  ;;  %vm3604_vm13 = vweird.f32 %v3403_v34 }
 0x5ee   :  { %v3496_v37 = vsub.f32 1.0, %v3495_v62  ;;  %v3611_v47 = vor.u32 1.1754944e-38, %v3610_v39 }
 0x5ef   :  { %vm3609_vm15 = vcmp.eq.f32.partialorder %v3608_v42, 8.507059e+37 }
 0x5f0   :  { %v3497_v31 = vmul.f32 %v3807_v35, %v3496_v37 }
 0x5f2   :  { %v3809_v38 = vpop.eup %3808  ;;  %v3498_v36 = vadd.f32 %v3807_v35, %v3497_v31 }
 0x5f3   :  { %v3600_v30 = vmul.f32 %v3809_v38, %v3403_v34  ;;  %vm3605_vm12 = vweird.f32 %v3809_v38 }
 0x5f4   :  { %v3502_v43 = vsel %vm3501_vm10, %v3807_v35, %v3498_v36  ;;  %vm3606_vm14 = vmor %vm3604_vm13, %vm3605_vm12 }
 0x5f5   :  { %v3507_v19 = vsel %vm3504_vm11, %v3506_v13, %v3502_v43  ;;  %v3601_v3 = vsub.f32 1.0, %v3600_v30 }
 0x5f6   :  { %3620 = vst [vmem:[#allocation25 + $0x30] sm:$0xff] %v3507_v19 }
 0x5f7   :  { %v3602_v44 = vmul.f32 %v3809_v38, %v3601_v3 }
 0x5f9   :  { %v3603_v26 = vadd.f32 %v3809_v38, %v3602_v44 }
 0x5fb   :  { %v3607_v58 = vsel %vm3606_vm14, %v3809_v38, %v3603_v26 }
 0x5fc   :  { %v3612_v50 = vsel %vm3609_vm15, %v3611_v47, %v3607_v58 }
 0x5fd   :  { %3627 = vst [vmem:[#allocation25 + $0x68] sm:$0xff] %v3612_v50 }
 0x5fe   :  { %3642 = dma.vmem_to_hbm [thread:$0]  %s3635_s26, 1792, %s3637_s4, [#allocation4], %s4238_s22, %s4238_s22, %s4239_s23  }
 0x5ff   :  { %4225 = dma.done.wait [#allocation4], 1792  }
 0x600   :  { %4226 = vsyncadd [#allocation4], 4294965504 }
 0x601   :  { %4227 = dma.done.wait [#allocation27], 256  }
 0x602   :  { %4228 = vsyncadd [#allocation27], 4294967040 }
 0x603   :  { %3664 = vsyncpa [#allocation3], 1 }
 0x604   :  { %3665 = vsyncpa [#allocation6], 1 }
 0x605   :  { %3666 = vsyncpa [#allocation9], 1 }
 0x606   :  { %3667 = vsyncpa [#allocation12], 1 }
 0x607   :  { %3668 = vsyncpa [#allocation15], 1 }
 0x608   :  { %3669 = vsyncpa [#allocation18], 1 }
 0x609   :  { %3670 = vsyncpa [#allocation21], 1 }
 0x60a   :  { %3671 = vsyncpa [#allocation24], 1 }
 0x60b   :  { %3672 = vsyncpa [#allocation4], 1 }
 0x60c   :  { %3673 = vsyncpa [#allocation27], 1 }

</bundles_post_ra>
